<compile_context>
chip_gen: v5e
topology: v5e:2x2
jax: 0.10.0
libtpu: 0.0.40
codegen_flags: <defaults>
</compile_context>

<pallas_src>
import functools

import jax
import jax.numpy as jnp
from jax.experimental import pallas as pl
from jax.experimental.pallas import tpu as pltpu


# ----------------------------------------------------------------------------
# Kernel 1: conv1 as a single fused matmul   out = relu(p1 @ w1 + b1)
#   p1 : (M1, 128) bf16   im2col patches, K zero-padded 100 -> 128
#   w1 : (128, 128) bf16  zero-padded rows
#   b1 : (1, 128)  f32
#   out: (M1, 128) bf16   lane-dense NHWC conv1 activations
# ----------------------------------------------------------------------------
def _conv1_kernel(p1_ref, w_ref, b_ref, o_ref):
    acc = jnp.dot(p1_ref[...], w_ref[...], preferred_element_type=jnp.float32)
    o_ref[...] = jnp.maximum(acc + b_ref[...], 0.0).astype(o_ref.dtype)


def pallas_conv1(p1, w, b):
    M, K = p1.shape
    K2, N = w.shape
    assert K == K2
    return pl.pallas_call(
        _conv1_kernel,
        out_shape=jax.ShapeDtypeStruct((M, N), jnp.bfloat16),
        grid_spec=pltpu.PrefetchScalarGridSpec(
            num_scalar_prefetch=0,
            grid=(1,),
            in_specs=[
                pl.BlockSpec((M, K), lambda i: (0, 0)),
                pl.BlockSpec((K, N), lambda i: (0, 0)),
                pl.BlockSpec((1, N), lambda i: (0, 0)),
            ],
            out_specs=pl.BlockSpec((M, N), lambda i: (0, 0)),
        ),
        compiler_params=pltpu.CompilerParams(
            dimension_semantics=("arbitrary",)),
    )(p1, w, b.reshape(1, N).astype(jnp.float32))


# ----------------------------------------------------------------------------
# Kernel 2 (fused tail): conv2 -> ReLU -> fc1 -> ReLU -> [Critic|Actor] heads
#                        -> masked log_softmax over the actor columns.
#   p2    : (spatial*B, 25*C1) bf16, rows ordered (ho, wo, b)
#   w2    : (25*C1, 64) bf16,  b2: (1, 64) f32
#   fc1_w : (spatial*64, 256) bf16 rows ordered (h, w, c),  fc1_b: (1, 256) f32
#   head_w: (256, 128) bf16 (col 0 = Critic, cols 1..1+A = Actor, rest zero)
# Outputs: heads (B, 128) f32, log_probs (B, 128) f32 (actor cols filled).
# ----------------------------------------------------------------------------
def _tail_kernel(p2_ref, w2_ref, b2_ref, fc1w_ref, fc1b_ref, hw_ref, hb_ref,
                 heads_ref, logp_ref, h2_scr,
                 *, batch, spatial, c2, num_outputs):
    # conv2: one big lane-dense matmul, relu'd activation kept in VMEM scratch.
    h2 = jnp.dot(p2_ref[...], w2_ref[...], preferred_element_type=jnp.float32)
    h2_scr[...] = jnp.maximum(h2 + b2_ref[...], 0.0)          # (spatial*B, 64)

    # fc1 as a 16-tap accumulation over spatial positions: rows of h2 are
    # (s, b)-ordered and rows of fc1_w are (s, c)-ordered, so no reshape of the
    # (32, 64) activation is ever needed.
    hidden = fc1w_ref.shape[1]
    acc = jnp.zeros((batch, hidden), jnp.float32)
    for s in range(spatial):                                   # static unroll
        hs = h2_scr[s * batch:(s + 1) * batch, :].astype(jnp.bfloat16)  # (B, 64)
        ws = fc1w_ref[s * c2:(s + 1) * c2, :]                           # (64, H)
        acc = acc + jnp.dot(hs, ws, preferred_element_type=jnp.float32)
    state = jnp.maximum(acc + fc1b_ref[...], 0.0)              # (B, 256) f32

    # heads: [Critic | Actor | zero pad], lane-dense 128-wide output.
    heads = jnp.dot(state.astype(hw_ref.dtype), hw_ref[...],
                    preferred_element_type=jnp.float32) + hb_ref[...]
    heads_ref[...] = heads

    # log_softmax over actor columns (1 .. num_outputs), padded lanes masked.
    col = jax.lax.broadcasted_iota(jnp.int32, heads.shape, 1)
    amask = (col >= 1) & (col < 1 + num_outputs)
    neg = jnp.float32(-1e30)
    m = jnp.max(jnp.where(amask, heads, neg), axis=-1, keepdims=True)
    e = jnp.exp(jnp.where(amask, heads - m, neg))
    denom = jnp.sum(e, axis=-1, keepdims=True)
    logp = heads - m - jnp.log(denom)
    logp_ref[...] = jnp.where(amask, logp, 0.0)


def pallas_conv2_fc1_heads(p2, w2, b2, fc1_w, fc1_b, head_w, head_b,
                           *, batch, spatial, num_outputs):
    M, K = p2.shape
    K2, C2 = w2.shape
    F, H = fc1_w.shape
    H2, NOP = head_w.shape
    assert K == K2 and F == spatial * C2 and H == H2 and M == spatial * batch

    kernel = functools.partial(_tail_kernel, batch=batch, spatial=spatial,
                               c2=C2, num_outputs=num_outputs)
    return pl.pallas_call(
        kernel,
        out_shape=(jax.ShapeDtypeStruct((batch, NOP), jnp.float32),
                   jax.ShapeDtypeStruct((batch, NOP), jnp.float32)),
        grid_spec=pltpu.PrefetchScalarGridSpec(
            num_scalar_prefetch=0,
            grid=(1,),
            in_specs=[
                pl.BlockSpec((M, K), lambda i: (0, 0)),
                pl.BlockSpec((K, C2), lambda i: (0, 0)),
                pl.BlockSpec((1, C2), lambda i: (0, 0)),
                pl.BlockSpec((F, H), lambda i: (0, 0)),
                pl.BlockSpec((1, H), lambda i: (0, 0)),
                pl.BlockSpec((H, NOP), lambda i: (0, 0)),
                pl.BlockSpec((1, NOP), lambda i: (0, 0)),
            ],
            out_specs=[
                pl.BlockSpec((batch, NOP), lambda i: (0, 0)),
                pl.BlockSpec((batch, NOP), lambda i: (0, 0)),
            ],
            scratch_shapes=[pltpu.VMEM((M, C2), jnp.float32)],
        ),
        compiler_params=pltpu.CompilerParams(
            dimension_semantics=("arbitrary",)),
    )(p2, w2, b2.reshape(1, C2).astype(jnp.float32),
      fc1_w, fc1_b.reshape(1, H).astype(jnp.float32),
      head_w, head_b.reshape(1, NOP).astype(jnp.float32))


# ----------------------------------------------------------------------------
# XLA glue: channels-last im2col for a 5x5 / stride-4 / pad-2 conv.
# Pure data movement (strided slices + stack + reshape); columns are ordered
# (kh, kw, cin) and weights are permuted once to match.
# ----------------------------------------------------------------------------
def _im2col_nhwc(x_nhwc, k=5, stride=4, pad=2, row_order="bhw"):
    B, H, W, C = x_nhwc.shape
    xp = jnp.pad(x_nhwc, ((0, 0), (pad, pad), (pad, pad), (0, 0)))
    Ho = (H + 2 * pad - k) // stride + 1
    Wo = (W + 2 * pad - k) // stride + 1
    taps = []
    for kh in range(k):
        for kw in range(k):
            taps.append(
                xp[:, kh:kh + stride * Ho:stride, kw:kw + stride * Wo:stride, :])
    patches = jnp.stack(taps, axis=3)                      # (B, Ho, Wo, k*k, C)
    if row_order == "hwb":                                 # rows ordered (h, w, b)
        patches = jnp.transpose(patches, (1, 2, 0, 3, 4))  # (Ho, Wo, B, k*k, C)
        return patches.reshape(Ho * Wo * B, k * k * C), Ho, Wo
    return patches.reshape(B * Ho * Wo, k * k * C), Ho, Wo


# ----------------------------------------------------------------------------
# SmallThickNet forward (inference: Dropout(0.5) is identity in eval mode).
# ----------------------------------------------------------------------------
def small_thick_net_forward(x_nchw, kp, *, num_outputs):
    # single layout change: NCHW -> NHWC, bf16 activations
    x = jnp.transpose(x_nchw, (0, 2, 3, 1)).astype(jnp.bfloat16)
    B = x.shape[0]

    # conv1 -> relu  (dropout skipped: eval)
    # TODO(synk): training-mode Dropout(0.5) not implemented (eval semantics).
    p1, Ho, Wo = _im2col_nhwc(x, row_order="bhw")          # (B*16*16, Cin*25)
    K1 = kp["w1"].shape[0]                                 # zero-padded K (128)
    p1 = jnp.pad(p1, ((0, 0), (0, K1 - p1.shape[1])))      # lane-pad 100 -> 128
    h = pallas_conv1(p1, kp["w1"], kp["b1"])               # (512, 128) bf16
    h = h.reshape(B, Ho, Wo, -1)                           # NHWC, no transpose

    # conv2 -> relu -> flatten -> fc1 -> relu -> heads -> log_softmax,
    # all inside ONE fused pallas_call.
    p2, Ho2, Wo2 = _im2col_nhwc(h, row_order="hwb")        # (16*B, C1*25)
    heads, logp = pallas_conv2_fc1_heads(
        p2, kp["w2"], kp["b2"], kp["fc1_w"], kp["fc1_b"],
        kp["head_w"], kp["head_b"],
        batch=B, spatial=Ho2 * Wo2, num_outputs=num_outputs)

    value = heads[:, :1]                                   # (B, 1)
    logits = heads[:, 1:1 + num_outputs]                   # (B, num_outputs)
    log_probs = logp[:, 1:1 + num_outputs]                 # normalized log-probs
    # Categorical(logits=logits) represented by logits + normalized log-probs.
    return (logits, log_probs), value


# ----------------------------------------------------------------------------
# Parameters: torch-layout init + one-time layout/precision prep (outside jit).
# ----------------------------------------------------------------------------
def init_params(key, in_channels, num_outputs, base_channels):
    c1 = 32 * base_channels
    ks = jax.random.split(key, 10)

    def u(k, shape, fan_in):
        bound = 1.0 / jnp.sqrt(fan_in)
        return jax.random.uniform(k, shape, jnp.float32, -bound, bound)

    return {
        "conv1_w": u(ks[0], (c1, in_channels, 5, 5), in_channels * 25),
        "conv1_b": u(ks[1], (c1,), in_channels * 25),
        "conv2_w": u(ks[2], (64, c1, 5, 5), c1 * 25),
        "conv2_b": u(ks[3], (64,), c1 * 25),
        "fc1_w":  u(ks[4], (256, 4 * 4 * 64), 4 * 4 * 64),
        "fc1_b":  u(ks[5], (256,), 4 * 4 * 64),
        "actor_w": u(ks[6], (num_outputs, 256), 256),
        "actor_b": u(ks[7], (num_outputs,), 256),
        "critic_w": u(ks[8], (1, 256), 256),
        "critic_b": u(ks[9], (1,), 256),
    }


def prepare_params(p):
    """One-time permute/pad/cast of torch-layout weights to kernel layouts."""
    cout1 = p["conv1_w"].shape[0]
    cout2 = p["conv2_w"].shape[0]
    hidden, fc1_in = p["fc1_w"].shape
    sp = int(round((fc1_in // cout2) ** 0.5))     # conv2 output spatial (= 4)
    num_outputs = p["actor_w"].shape[0]

    # conv weights: (Cout, Cin, KH, KW) -> (KH*KW*Cin, Cout); pad conv1 K to 128.
    w1 = jnp.transpose(p["conv1_w"], (2, 3, 1, 0)).reshape(-1, cout1)
    k_pad = ((w1.shape[0] + 127) // 128) * 128
    w1 = jnp.pad(w1, ((0, k_pad - w1.shape[0]), (0, 0)))
    w2 = jnp.transpose(p["conv2_w"], (2, 3, 1, 0)).reshape(-1, cout2)

    # fc1: torch columns are (c, h, w); kernel rows are (h, w, c).
    fc1_w = p["fc1_w"].reshape(hidden, cout2, sp, sp)
    fc1_w = fc1_w.transpose(0, 2, 3, 1).reshape(hidden, fc1_in).T   # (fc1_in, 256)

    # heads: column 0 = Critic, columns 1.. = Actor; pad to 128 lanes.
    head_w = jnp.concatenate([p["critic_w"].T, p["actor_w"].T], axis=1)
    head_b = jnp.concatenate([p["critic_b"], p["actor_b"]])
    head_pad = max(128, ((1 + num_outputs + 127) // 128) * 128)
    head_w = jnp.pad(head_w, ((0, 0), (0, head_pad - head_w.shape[1])))
    head_b = jnp.pad(head_b, (0, head_pad - head_b.shape[0]))

    return {
        "w1": w1.astype(jnp.bfloat16), "b1": p["conv1_b"].astype(jnp.float32),
        "w2": w2.astype(jnp.bfloat16), "b2": p["conv2_b"].astype(jnp.float32),
        "fc1_w": fc1_w.astype(jnp.bfloat16),
        "fc1_b": p["fc1_b"].astype(jnp.float32),
        "head_w": head_w.astype(jnp.bfloat16),
        "head_b": head_b.astype(jnp.float32),
    }


if __name__ == "__main__":
    key = jax.random.PRNGKey(0)
    kx, kp_key = jax.random.split(key)

    # fc1 = Linear(4*4*64, 256) requires the conv2 output to be 4x4 spatially,
    # i.e. a 64x64 input through two stride-4 convs (64 -> 16 -> 4).
    B, C_in, H, W = 2, 4, 64, 64
    num_outputs = 6
    base_channels = 4          # conv1 out channels = 32 * 4 = 128 (lane-dense)

    x = jax.random.normal(kx, (B, C_in, H, W), dtype=jnp.float32)
    params = init_params(kp_key, C_in, num_outputs, base_channels)
    kparams = prepare_params(params)   # one-time, outside jit

    fwd = jax.jit(functools.partial(small_thick_net_forward,
                                    num_outputs=num_outputs))
    (logits, log_probs), value = fwd(x, kparams)
    jax.block_until_ready((logits, log_probs, value))

    assert logits.shape == (B, num_outputs)
    assert log_probs.shape == (B, num_outputs)
    assert value.shape == (B, 1)
    print("KERNEL_OK")
</pallas_src>

<mosaic_0001>
module attributes {stable_mosaic.version = 11 : i64} {
  func.func @_conv1_kernel(%arg0: i32, %arg1: memref<512x128xbf16, #tpu.memory_space<vmem>>, %arg2: memref<128x128xbf16, #tpu.memory_space<vmem>>, %arg3: memref<1x128xf32, #tpu.memory_space<vmem>>, %arg4: memref<512x128xbf16, #tpu.memory_space<vmem>>) attributes {dimension_semantics = [#tpu.dimension_semantics<arbitrary>], iteration_bounds = array<i64: 1>, scalar_prefetch = 0 : i64, scratch_operands = 0 : i64, tpu.core_type = #tpu.core_type<tc>, window_params = [{pipeline_mode = #tpu.pipeline_mode<synchronous>, transform_indices = @transform_0, window_bounds = array<i64: 512, 128>}, {pipeline_mode = #tpu.pipeline_mode<synchronous>, transform_indices = @transform_1, window_bounds = array<i64: 128, 128>}, {pipeline_mode = #tpu.pipeline_mode<synchronous>, transform_indices = @transform_2, window_bounds = array<i64: 1, 128>}, {pipeline_mode = #tpu.pipeline_mode<synchronous>, transform_indices = @transform_3, window_bounds = array<i64: 512, 128>}]} {
    %c0 = arith.constant 0 : index
    %c0_0 = arith.constant 0 : index
    %0 = vector.load %arg1[%c0, %c0_0] : memref<512x128xbf16, #tpu.memory_space<vmem>>, vector<512x128xbf16>
    %c0_1 = arith.constant 0 : index
    %c0_2 = arith.constant 0 : index
    %1 = vector.load %arg2[%c0_1, %c0_2] : memref<128x128xbf16, #tpu.memory_space<vmem>>, vector<128x128xbf16>
    %cst = arith.constant dense<0.000000e+00> : vector<512x128xf32>
    %2 = tpu.matmul %0, %1, %cst {dimension_numbers = #tpu.dot_dimension_numbers<[1], [0], [0], [1], [0, 0, 1, 1], [], []>} : vector<512x128xbf16>, vector<128x128xbf16>, vector<512x128xf32> -> vector<512x128xf32>
    %c0_3 = arith.constant 0 : index
    %c0_4 = arith.constant 0 : index
    %3 = vector.load %arg3[%c0_3, %c0_4] : memref<1x128xf32, #tpu.memory_space<vmem>>, vector<1x128xf32>
    %4 = vector.broadcast %3 : vector<1x128xf32> to vector<512x128xf32>
    %5 = arith.addf %2, %4 : vector<512x128xf32>
    %cst_5 = arith.constant 0.000000e+00 : f32
    %6 = vector.broadcast %cst_5 : f32 to vector<512x128xf32>
    %7 = arith.maximumf %5, %6 : vector<512x128xf32>
    %8 = arith.truncf %7 : vector<512x128xf32> to vector<512x128xbf16>
    %c0_6 = arith.constant 0 : index
    %c0_7 = arith.constant 0 : index
    %9 = vector.load %arg4[%c0_6, %c0_7] : memref<512x128xbf16, #tpu.memory_space<vmem>>, vector<512x128xbf16>
    tpu.vector_store %arg4[%c0_6, %c0_7], %8 {strides = array<i32>} : memref<512x128xbf16, #tpu.memory_space<vmem>>, vector<512x128xbf16>,
    return
  }
  func.func @transform_0(%arg0: i32) -> (i32, i32) {
    %c0_i32 = arith.constant 0 : i32
    %c0_i32_0 = arith.constant 0 : i32
    %c0_i32_1 = arith.constant 0 : i32
    return %c0_i32, %c0_i32_0 : i32, i32
  }
  func.func @transform_1(%arg0: i32) -> (i32, i32) {
    %c0_i32 = arith.constant 0 : i32
    %c0_i32_0 = arith.constant 0 : i32
    %c0_i32_1 = arith.constant 0 : i32
    return %c0_i32, %c0_i32_0 : i32, i32
  }
  func.func @transform_2(%arg0: i32) -> (i32, i32) {
    %c0_i32 = arith.constant 0 : i32
    %c0_i32_0 = arith.constant 0 : i32
    %c0_i32_1 = arith.constant 0 : i32
    return %c0_i32, %c0_i32_0 : i32, i32
  }
  func.func @transform_3(%arg0: i32) -> (i32, i32) {
    %c0_i32 = arith.constant 0 : i32
    %c0_i32_0 = arith.constant 0 : i32
    %c0_i32_1 = arith.constant 0 : i32
    return %c0_i32, %c0_i32_0 : i32, i32
  }
}

module attributes {stable_mosaic.version = 11 : i64} {
  func.func @_tail_kernel(%arg0: i32, %arg1: memref<32x3200xbf16, #tpu.memory_space<vmem>>, %arg2: memref<3200x64xbf16, #tpu.memory_space<vmem>>, %arg3: memref<1x64xf32, #tpu.memory_space<vmem>>, %arg4: memref<1024x256xbf16, #tpu.memory_space<vmem>>, %arg5: memref<1x256xf32, #tpu.memory_space<vmem>>, %arg6: memref<256x128xbf16, #tpu.memory_space<vmem>>, %arg7: memref<1x128xf32, #tpu.memory_space<vmem>>, %arg8: memref<2x128xf32, #tpu.memory_space<vmem>>, %arg9: memref<2x128xf32, #tpu.memory_space<vmem>>, %arg10: memref<32x64xf32, #tpu.memory_space<vmem>>) attributes {dimension_semantics = [#tpu.dimension_semantics<arbitrary>], iteration_bounds = array<i64: 1>, scalar_prefetch = 0 : i64, scratch_operands = 1 : i64, tpu.core_type = #tpu.core_type<tc>, window_params = [{pipeline_mode = #tpu.pipeline_mode<synchronous>, transform_indices = @transform_0, window_bounds = array<i64: 32, 3200>}, {pipeline_mode = #tpu.pipeline_mode<synchronous>, transform_indices = @transform_1, window_bounds = array<i64: 3200, 64>}, {pipeline_mode = #tpu.pipeline_mode<synchronous>, transform_indices = @transform_2, window_bounds = array<i64: 1, 64>}, {pipeline_mode = #tpu.pipeline_mode<synchronous>, transform_indices = @transform_3, window_bounds = array<i64: 1024, 256>}, {pipeline_mode = #tpu.pipeline_mode<synchronous>, transform_indices = @transform_4, window_bounds = array<i64: 1, 256>}, {pipeline_mode = #tpu.pipeline_mode<synchronous>, transform_indices = @transform_5, window_bounds = array<i64: 256, 128>}, {pipeline_mode = #tpu.pipeline_mode<synchronous>, transform_indices = @transform_6, window_bounds = array<i64: 1, 128>}, {pipeline_mode = #tpu.pipeline_mode<synchronous>, transform_indices = @transform_7, window_bounds = array<i64: 2, 128>}, {pipeline_mode = #tpu.pipeline_mode<synchronous>, transform_indices = @transform_8, window_bounds = array<i64: 2, 128>}]} {
    %c0 = arith.constant 0 : index
    %c0_0 = arith.constant 0 : index
    %0 = vector.load %arg1[%c0, %c0_0] : memref<32x3200xbf16, #tpu.memory_space<vmem>>, vector<32x3200xbf16>
    %c0_1 = arith.constant 0 : index
    %c0_2 = arith.constant 0 : index
    %1 = vector.load %arg2[%c0_1, %c0_2] : memref<3200x64xbf16, #tpu.memory_space<vmem>>, vector<3200x64xbf16>
    %cst = arith.constant dense<0.000000e+00> : vector<32x64xf32>
    %2 = tpu.matmul %0, %1, %cst {dimension_numbers = #tpu.dot_dimension_numbers<[1], [0], [0], [1], [0, 0, 1, 1], [], []>} : vector<32x3200xbf16>, vector<3200x64xbf16>, vector<32x64xf32> -> vector<32x64xf32>
    %c0_3 = arith.constant 0 : index
    %c0_4 = arith.constant 0 : index
    %3 = vector.load %arg3[%c0_3, %c0_4] : memref<1x64xf32, #tpu.memory_space<vmem>>, vector<1x64xf32>
    %4 = vector.broadcast %3 : vector<1x64xf32> to vector<32x64xf32>
    %5 = arith.addf %2, %4 : vector<32x64xf32>
    %cst_5 = arith.constant 0.000000e+00 : f32
    %6 = vector.broadcast %cst_5 : f32 to vector<32x64xf32>
    %7 = arith.maximumf %5, %6 : vector<32x64xf32>
    %c0_6 = arith.constant 0 : index
    %c0_7 = arith.constant 0 : index
    %8 = vector.load %arg10[%c0_6, %c0_7] : memref<32x64xf32, #tpu.memory_space<vmem>>, vector<32x64xf32>
    tpu.vector_store %arg10[%c0_6, %c0_7], %7 {strides = array<i32>} : memref<32x64xf32, #tpu.memory_space<vmem>>, vector<32x64xf32>,
    %cst_8 = arith.constant 0.000000e+00 : f32
    %9 = vector.broadcast %cst_8 : f32 to vector<2x256xf32>
    %c0_9 = arith.constant 0 : index
    %c0_10 = arith.constant 0 : index
    %10 = vector.load %arg10[%c0_9, %c0_10] : memref<32x64xf32, #tpu.memory_space<vmem>>, vector<2x64xf32>
    %11 = arith.truncf %10 : vector<2x64xf32> to vector<2x64xbf16>
    %c0_11 = arith.constant 0 : index
    %c0_12 = arith.constant 0 : index
    %12 = vector.load %arg4[%c0_11, %c0_12] : memref<1024x256xbf16, #tpu.memory_space<vmem>>, vector<64x256xbf16>
    %cst_13 = arith.constant dense<0.000000e+00> : vector<2x256xf32>
    %13 = tpu.matmul %11, %12, %cst_13 {dimension_numbers = #tpu.dot_dimension_numbers<[1], [0], [0], [1], [0, 0, 1, 1], [], []>} : vector<2x64xbf16>, vector<64x256xbf16>, vector<2x256xf32> -> vector<2x256xf32>
    %14 = arith.addf %9, %13 : vector<2x256xf32>
    %c2 = arith.constant 2 : index
    %c0_14 = arith.constant 0 : index
    %15 = vector.load %arg10[%c2, %c0_14] : memref<32x64xf32, #tpu.memory_space<vmem>>, vector<2x64xf32>
    %16 = arith.truncf %15 : vector<2x64xf32> to vector<2x64xbf16>
    %c64 = arith.constant 64 : index
    %c0_15 = arith.constant 0 : index
    %17 = vector.load %arg4[%c64, %c0_15] : memref<1024x256xbf16, #tpu.memory_space<vmem>>, vector<64x256xbf16>
    %cst_16 = arith.constant dense<0.000000e+00> : vector<2x256xf32>
    %18 = tpu.matmul %16, %17, %cst_16 {dimension_numbers = #tpu.dot_dimension_numbers<[1], [0], [0], [1], [0, 0, 1, 1], [], []>} : vector<2x64xbf16>, vector<64x256xbf16>, vector<2x256xf32> -> vector<2x256xf32>
    %19 = arith.addf %14, %18 : vector<2x256xf32>
    %c4 = arith.constant 4 : index
    %c0_17 = arith.constant 0 : index
    %20 = vector.load %arg10[%c4, %c0_17] : memref<32x64xf32, #tpu.memory_space<vmem>>, vector<2x64xf32>
    %21 = arith.truncf %20 : vector<2x64xf32> to vector<2x64xbf16>
    %c128 = arith.constant 128 : index
    %c0_18 = arith.constant 0 : index
    %22 = vector.load %arg4[%c128, %c0_18] : memref<1024x256xbf16, #tpu.memory_space<vmem>>, vector<64x256xbf16>
    %cst_19 = arith.constant dense<0.000000e+00> : vector<2x256xf32>
    %23 = tpu.matmul %21, %22, %cst_19 {dimension_numbers = #tpu.dot_dimension_numbers<[1], [0], [0], [1], [0, 0, 1, 1], [], []>} : vector<2x64xbf16>, vector<64x256xbf16>, vector<2x256xf32> -> vector<2x256xf32>
    %24 = arith.addf %19, %23 : vector<2x256xf32>
    %c6 = arith.constant 6 : index
    %c0_20 = arith.constant 0 : index
    %25 = vector.load %arg10[%c6, %c0_20] : memref<32x64xf32, #tpu.memory_space<vmem>>, vector<2x64xf32>
    %26 = arith.truncf %25 : vector<2x64xf32> to vector<2x64xbf16>
    %c192 = arith.constant 192 : index
    %c0_21 = arith.constant 0 : index
    %27 = vector.load %arg4[%c192, %c0_21] : memref<1024x256xbf16, #tpu.memory_space<vmem>>, vector<64x256xbf16>
    %cst_22 = arith.constant dense<0.000000e+00> : vector<2x256xf32>
    %28 = tpu.matmul %26, %27, %cst_22 {dimension_numbers = #tpu.dot_dimension_numbers<[1], [0], [0], [1], [0, 0, 1, 1], [], []>} : vector<2x64xbf16>, vector<64x256xbf16>, vector<2x256xf32> -> vector<2x256xf32>
    %29 = arith.addf %24, %28 : vector<2x256xf32>
    %c8 = arith.constant 8 : index
    %c0_23 = arith.constant 0 : index
    %30 = vector.load %arg10[%c8, %c0_23] : memref<32x64xf32, #tpu.memory_space<vmem>>, vector<2x64xf32>
    %31 = arith.truncf %30 : vector<2x64xf32> to vector<2x64xbf16>
    %c256 = arith.constant 256 : index
    %c0_24 = arith.constant 0 : index
    %32 = vector.load %arg4[%c256, %c0_24] : memref<1024x256xbf16, #tpu.memory_space<vmem>>, vector<64x256xbf16>
    %cst_25 = arith.constant dense<0.000000e+00> : vector<2x256xf32>
    %33 = tpu.matmul %31, %32, %cst_25 {dimension_numbers = #tpu.dot_dimension_numbers<[1], [0], [0], [1], [0, 0, 1, 1], [], []>} : vector<2x64xbf16>, vector<64x256xbf16>, vector<2x256xf32> -> vector<2x256xf32>
    %34 = arith.addf %29, %33 : vector<2x256xf32>
    %c10 = arith.constant 10 : index
    %c0_26 = arith.constant 0 : index
    %35 = vector.load %arg10[%c10, %c0_26] : memref<32x64xf32, #tpu.memory_space<vmem>>, vector<2x64xf32>
    %36 = arith.truncf %35 : vector<2x64xf32> to vector<2x64xbf16>
    %c320 = arith.constant 320 : index
    %c0_27 = arith.constant 0 : index
    %37 = vector.load %arg4[%c320, %c0_27] : memref<1024x256xbf16, #tpu.memory_space<vmem>>, vector<64x256xbf16>
    %cst_28 = arith.constant dense<0.000000e+00> : vector<2x256xf32>
    %38 = tpu.matmul %36, %37, %cst_28 {dimension_numbers = #tpu.dot_dimension_numbers<[1], [0], [0], [1], [0, 0, 1, 1], [], []>} : vector<2x64xbf16>, vector<64x256xbf16>, vector<2x256xf32> -> vector<2x256xf32>
    %39 = arith.addf %34, %38 : vector<2x256xf32>
    %c12 = arith.constant 12 : index
    %c0_29 = arith.constant 0 : index
    %40 = vector.load %arg10[%c12, %c0_29] : memref<32x64xf32, #tpu.memory_space<vmem>>, vector<2x64xf32>
    %41 = arith.truncf %40 : vector<2x64xf32> to vector<2x64xbf16>
    %c384 = arith.constant 384 : index
    %c0_30 = arith.constant 0 : index
    %42 = vector.load %arg4[%c384, %c0_30] : memref<1024x256xbf16, #tpu.memory_space<vmem>>, vector<64x256xbf16>
    %cst_31 = arith.constant dense<0.000000e+00> : vector<2x256xf32>
    %43 = tpu.matmul %41, %42, %cst_31 {dimension_numbers = #tpu.dot_dimension_numbers<[1], [0], [0], [1], [0, 0, 1, 1], [], []>} : vector<2x64xbf16>, vector<64x256xbf16>, vector<2x256xf32> -> vector<2x256xf32>
    %44 = arith.addf %39, %43 : vector<2x256xf32>
    %c14 = arith.constant 14 : index
    %c0_32 = arith.constant 0 : index
    %45 = vector.load %arg10[%c14, %c0_32] : memref<32x64xf32, #tpu.memory_space<vmem>>, vector<2x64xf32>
    %46 = arith.truncf %45 : vector<2x64xf32> to vector<2x64xbf16>
    %c448 = arith.constant 448 : index
    %c0_33 = arith.constant 0 : index
    %47 = vector.load %arg4[%c448, %c0_33] : memref<1024x256xbf16, #tpu.memory_space<vmem>>, vector<64x256xbf16>
    %cst_34 = arith.constant dense<0.000000e+00> : vector<2x256xf32>
    %48 = tpu.matmul %46, %47, %cst_34 {dimension_numbers = #tpu.dot_dimension_numbers<[1], [0], [0], [1], [0, 0, 1, 1], [], []>} : vector<2x64xbf16>, vector<64x256xbf16>, vector<2x256xf32> -> vector<2x256xf32>
    %49 = arith.addf %44, %48 : vector<2x256xf32>
    %c16 = arith.constant 16 : index
    %c0_35 = arith.constant 0 : index
    %50 = vector.load %arg10[%c16, %c0_35] : memref<32x64xf32, #tpu.memory_space<vmem>>, vector<2x64xf32>
    %51 = arith.truncf %50 : vector<2x64xf32> to vector<2x64xbf16>
    %c512 = arith.constant 512 : index
    %c0_36 = arith.constant 0 : index
    %52 = vector.load %arg4[%c512, %c0_36] : memref<1024x256xbf16, #tpu.memory_space<vmem>>, vector<64x256xbf16>
    %cst_37 = arith.constant dense<0.000000e+00> : vector<2x256xf32>
    %53 = tpu.matmul %51, %52, %cst_37 {dimension_numbers = #tpu.dot_dimension_numbers<[1], [0], [0], [1], [0, 0, 1, 1], [], []>} : vector<2x64xbf16>, vector<64x256xbf16>, vector<2x256xf32> -> vector<2x256xf32>
    %54 = arith.addf %49, %53 : vector<2x256xf32>
    %c18 = arith.constant 18 : index
    %c0_38 = arith.constant 0 : index
    %55 = vector.load %arg10[%c18, %c0_38] : memref<32x64xf32, #tpu.memory_space<vmem>>, vector<2x64xf32>
    %56 = arith.truncf %55 : vector<2x64xf32> to vector<2x64xbf16>
    %c576 = arith.constant 576 : index
    %c0_39 = arith.constant 0 : index
    %57 = vector.load %arg4[%c576, %c0_39] : memref<1024x256xbf16, #tpu.memory_space<vmem>>, vector<64x256xbf16>
    %cst_40 = arith.constant dense<0.000000e+00> : vector<2x256xf32>
    %58 = tpu.matmul %56, %57, %cst_40 {dimension_numbers = #tpu.dot_dimension_numbers<[1], [0], [0], [1], [0, 0, 1, 1], [], []>} : vector<2x64xbf16>, vector<64x256xbf16>, vector<2x256xf32> -> vector<2x256xf32>
    %59 = arith.addf %54, %58 : vector<2x256xf32>
    %c20 = arith.constant 20 : index
    %c0_41 = arith.constant 0 : index
    %60 = vector.load %arg10[%c20, %c0_41] : memref<32x64xf32, #tpu.memory_space<vmem>>, vector<2x64xf32>
    %61 = arith.truncf %60 : vector<2x64xf32> to vector<2x64xbf16>
    %c640 = arith.constant 640 : index
    %c0_42 = arith.constant 0 : index
    %62 = vector.load %arg4[%c640, %c0_42] : memref<1024x256xbf16, #tpu.memory_space<vmem>>, vector<64x256xbf16>
    %cst_43 = arith.constant dense<0.000000e+00> : vector<2x256xf32>
    %63 = tpu.matmul %61, %62, %cst_43 {dimension_numbers = #tpu.dot_dimension_numbers<[1], [0], [0], [1], [0, 0, 1, 1], [], []>} : vector<2x64xbf16>, vector<64x256xbf16>, vector<2x256xf32> -> vector<2x256xf32>
    %64 = arith.addf %59, %63 : vector<2x256xf32>
    %c22 = arith.constant 22 : index
    %c0_44 = arith.constant 0 : index
    %65 = vector.load %arg10[%c22, %c0_44] : memref<32x64xf32, #tpu.memory_space<vmem>>, vector<2x64xf32>
    %66 = arith.truncf %65 : vector<2x64xf32> to vector<2x64xbf16>
    %c704 = arith.constant 704 : index
    %c0_45 = arith.constant 0 : index
    %67 = vector.load %arg4[%c704, %c0_45] : memref<1024x256xbf16, #tpu.memory_space<vmem>>, vector<64x256xbf16>
    %cst_46 = arith.constant dense<0.000000e+00> : vector<2x256xf32>
    %68 = tpu.matmul %66, %67, %cst_46 {dimension_numbers = #tpu.dot_dimension_numbers<[1], [0], [0], [1], [0, 0, 1, 1], [], []>} : vector<2x64xbf16>, vector<64x256xbf16>, vector<2x256xf32> -> vector<2x256xf32>
    %69 = arith.addf %64, %68 : vector<2x256xf32>
    %c24 = arith.constant 24 : index
    %c0_47 = arith.constant 0 : index
    %70 = vector.load %arg10[%c24, %c0_47] : memref<32x64xf32, #tpu.memory_space<vmem>>, vector<2x64xf32>
    %71 = arith.truncf %70 : vector<2x64xf32> to vector<2x64xbf16>
    %c768 = arith.constant 768 : index
    %c0_48 = arith.constant 0 : index
    %72 = vector.load %arg4[%c768, %c0_48] : memref<1024x256xbf16, #tpu.memory_space<vmem>>, vector<64x256xbf16>
    %cst_49 = arith.constant dense<0.000000e+00> : vector<2x256xf32>
    %73 = tpu.matmul %71, %72, %cst_49 {dimension_numbers = #tpu.dot_dimension_numbers<[1], [0], [0], [1], [0, 0, 1, 1], [], []>} : vector<2x64xbf16>, vector<64x256xbf16>, vector<2x256xf32> -> vector<2x256xf32>
    %74 = arith.addf %69, %73 : vector<2x256xf32>
    %c26 = arith.constant 26 : index
    %c0_50 = arith.constant 0 : index
    %75 = vector.load %arg10[%c26, %c0_50] : memref<32x64xf32, #tpu.memory_space<vmem>>, vector<2x64xf32>
    %76 = arith.truncf %75 : vector<2x64xf32> to vector<2x64xbf16>
    %c832 = arith.constant 832 : index
    %c0_51 = arith.constant 0 : index
    %77 = vector.load %arg4[%c832, %c0_51] : memref<1024x256xbf16, #tpu.memory_space<vmem>>, vector<64x256xbf16>
    %cst_52 = arith.constant dense<0.000000e+00> : vector<2x256xf32>
    %78 = tpu.matmul %76, %77, %cst_52 {dimension_numbers = #tpu.dot_dimension_numbers<[1], [0], [0], [1], [0, 0, 1, 1], [], []>} : vector<2x64xbf16>, vector<64x256xbf16>, vector<2x256xf32> -> vector<2x256xf32>
    %79 = arith.addf %74, %78 : vector<2x256xf32>
    %c28 = arith.constant 28 : index
    %c0_53 = arith.constant 0 : index
    %80 = vector.load %arg10[%c28, %c0_53] : memref<32x64xf32, #tpu.memory_space<vmem>>, vector<2x64xf32>
    %81 = arith.truncf %80 : vector<2x64xf32> to vector<2x64xbf16>
    %c896 = arith.constant 896 : index
    %c0_54 = arith.constant 0 : index
    %82 = vector.load %arg4[%c896, %c0_54] : memref<1024x256xbf16, #tpu.memory_space<vmem>>, vector<64x256xbf16>
    %cst_55 = arith.constant dense<0.000000e+00> : vector<2x256xf32>
    %83 = tpu.matmul %81, %82, %cst_55 {dimension_numbers = #tpu.dot_dimension_numbers<[1], [0], [0], [1], [0, 0, 1, 1], [], []>} : vector<2x64xbf16>, vector<64x256xbf16>, vector<2x256xf32> -> vector<2x256xf32>
    %84 = arith.addf %79, %83 : vector<2x256xf32>
    %c30 = arith.constant 30 : index
    %c0_56 = arith.constant 0 : index
    %85 = vector.load %arg10[%c30, %c0_56] : memref<32x64xf32, #tpu.memory_space<vmem>>, vector<2x64xf32>
    %86 = arith.truncf %85 : vector<2x64xf32> to vector<2x64xbf16>
    %c960 = arith.constant 960 : index
    %c0_57 = arith.constant 0 : index
    %87 = vector.load %arg4[%c960, %c0_57] : memref<1024x256xbf16, #tpu.memory_space<vmem>>, vector<64x256xbf16>
    %cst_58 = arith.constant dense<0.000000e+00> : vector<2x256xf32>
    %88 = tpu.matmul %86, %87, %cst_58 {dimension_numbers = #tpu.dot_dimension_numbers<[1], [0], [0], [1], [0, 0, 1, 1], [], []>} : vector<2x64xbf16>, vector<64x256xbf16>, vector<2x256xf32> -> vector<2x256xf32>
    %89 = arith.addf %84, %88 : vector<2x256xf32>
    %c0_59 = arith.constant 0 : index
    %c0_60 = arith.constant 0 : index
    %90 = vector.load %arg5[%c0_59, %c0_60] : memref<1x256xf32, #tpu.memory_space<vmem>>, vector<1x256xf32>
    %91 = vector.broadcast %90 : vector<1x256xf32> to vector<2x256xf32>
    %92 = arith.addf %89, %91 : vector<2x256xf32>
    %cst_61 = arith.constant 0.000000e+00 : f32
    %93 = vector.broadcast %cst_61 : f32 to vector<2x256xf32>
    %94 = arith.maximumf %92, %93 : vector<2x256xf32>
    %95 = arith.truncf %94 : vector<2x256xf32> to vector<2x256xbf16>
    %c0_62 = arith.constant 0 : index
    %c0_63 = arith.constant 0 : index
    %96 = vector.load %arg6[%c0_62, %c0_63] : memref<256x128xbf16, #tpu.memory_space<vmem>>, vector<256x128xbf16>
    %cst_64 = arith.constant dense<0.000000e+00> : vector<2x128xf32>
    %97 = tpu.matmul %95, %96, %cst_64 {dimension_numbers = #tpu.dot_dimension_numbers<[1], [0], [0], [1], [0, 0, 1, 1], [], []>} : vector<2x256xbf16>, vector<256x128xbf16>, vector<2x128xf32> -> vector<2x128xf32>
    %c0_65 = arith.constant 0 : index
    %c0_66 = arith.constant 0 : index
    %98 = vector.load %arg7[%c0_65, %c0_66] : memref<1x128xf32, #tpu.memory_space<vmem>>, vector<1x128xf32>
    %99 = vector.broadcast %98 : vector<1x128xf32> to vector<2x128xf32>
    %100 = arith.addf %97, %99 : vector<2x128xf32>
    %c0_67 = arith.constant 0 : index
    %c0_68 = arith.constant 0 : index
    %101 = vector.load %arg8[%c0_67, %c0_68] : memref<2x128xf32, #tpu.memory_space<vmem>>, vector<2x128xf32>
    tpu.vector_store %arg8[%c0_67, %c0_68], %100 {strides = array<i32>} : memref<2x128xf32, #tpu.memory_space<vmem>>, vector<2x128xf32>,
    %102 = tpu.iota {dimensions = array<i32: 1>} : vector<2x128xi32>
    %c1_i32 = arith.constant 1 : i32
    %103 = vector.broadcast %c1_i32 : i32 to vector<2x128xi32>
    %104 = arith.cmpi sge, %102, %103 : vector<2x128xi32>
    %c7_i32 = arith.constant 7 : i32
    %105 = vector.broadcast %c7_i32 : i32 to vector<2x128xi32>
    %106 = arith.cmpi slt, %102, %105 : vector<2x128xi32>
    %107 = arith.andi %104, %106 : vector<2x128xi1>
    %cst_69 = arith.constant -1.000000e+30 : f32
    %108 = vector.broadcast %cst_69 : f32 to vector<2x128xf32>
    %109 = arith.select %107, %100, %108 : vector<2x128xi1>, vector<2x128xf32>
    %cst_70 = arith.constant dense<0xFF800000> : vector<2xf32>
    %110 = vector.multi_reduction <maximumf>, %109, %cst_70 [1] : vector<2x128xf32> to vector<2xf32>
    %111 = vector.shape_cast %110 : vector<2xf32> to vector<2x1xf32>
    %112 = vector.broadcast %111 : vector<2x1xf32> to vector<2x128xf32>
    %113 = arith.subf %100, %112 : vector<2x128xf32>
    %cst_71 = arith.constant -1.000000e+30 : f32
    %114 = vector.broadcast %cst_71 : f32 to vector<2x128xf32>
    %115 = arith.select %107, %113, %114 : vector<2x128xi1>, vector<2x128xf32>
    %116 = math.exp %115 : vector<2x128xf32>
    %cst_72 = arith.constant dense<0.000000e+00> : vector<2xf32>
    %117 = vector.multi_reduction <add>, %116, %cst_72 [1] : vector<2x128xf32> to vector<2xf32>
    %118 = vector.shape_cast %117 : vector<2xf32> to vector<2x1xf32>
    %119 = vector.broadcast %111 : vector<2x1xf32> to vector<2x128xf32>
    %120 = arith.subf %100, %119 : vector<2x128xf32>
    %121 = math.log %118 : vector<2x1xf32>
    %122 = vector.broadcast %121 : vector<2x1xf32> to vector<2x128xf32>
    %123 = arith.subf %120, %122 : vector<2x128xf32>
    %cst_73 = arith.constant 0.000000e+00 : f32
    %124 = vector.broadcast %cst_73 : f32 to vector<2x128xf32>
    %125 = arith.select %107, %123, %124 : vector<2x128xi1>, vector<2x128xf32>
    %c0_74 = arith.constant 0 : index
    %c0_75 = arith.constant 0 : index
    %126 = vector.load %arg9[%c0_74, %c0_75] : memref<2x128xf32, #tpu.memory_space<vmem>>, vector<2x128xf32>
    tpu.vector_store %arg9[%c0_74, %c0_75], %125 {strides = array<i32>} : memref<2x128xf32, #tpu.memory_space<vmem>>, vector<2x128xf32>,
    return
  }
  func.func @transform_0(%arg0: i32) -> (i32, i32) {
    %c0_i32 = arith.constant 0 : i32
    %c0_i32_0 = arith.constant 0 : i32
    %c0_i32_1 = arith.constant 0 : i32
    return %c0_i32, %c0_i32_0 : i32, i32
  }
  func.func @transform_1(%arg0: i32) -> (i32, i32) {
    %c0_i32 = arith.constant 0 : i32
    %c0_i32_0 = arith.constant 0 : i32
    %c0_i32_1 = arith.constant 0 : i32
    return %c0_i32, %c0_i32_0 : i32, i32
  }
  func.func @transform_2(%arg0: i32) -> (i32, i32) {
    %c0_i32 = arith.constant 0 : i32
    %c0_i32_0 = arith.constant 0 : i32
    %c0_i32_1 = arith.constant 0 : i32
    return %c0_i32, %c0_i32_0 : i32, i32
  }
  func.func @transform_3(%arg0: i32) -> (i32, i32) {
    %c0_i32 = arith.constant 0 : i32
    %c0_i32_0 = arith.constant 0 : i32
    %c0_i32_1 = arith.constant 0 : i32
    return %c0_i32, %c0_i32_0 : i32, i32
  }
  func.func @transform_4(%arg0: i32) -> (i32, i32) {
    %c0_i32 = arith.constant 0 : i32
    %c0_i32_0 = arith.constant 0 : i32
    %c0_i32_1 = arith.constant 0 : i32
    return %c0_i32, %c0_i32_0 : i32, i32
  }
  func.func @transform_5(%arg0: i32) -> (i32, i32) {
    %c0_i32 = arith.constant 0 : i32
    %c0_i32_0 = arith.constant 0 : i32
    %c0_i32_1 = arith.constant 0 : i32
    return %c0_i32, %c0_i32_0 : i32, i32
  }
  func.func @transform_6(%arg0: i32) -> (i32, i32) {
    %c0_i32 = arith.constant 0 : i32
    %c0_i32_0 = arith.constant 0 : i32
    %c0_i32_1 = arith.constant 0 : i32
    return %c0_i32, %c0_i32_0 : i32, i32
  }
  func.func @transform_7(%arg0: i32) -> (i32, i32) {
    %c0_i32 = arith.constant 0 : i32
    %c0_i32_0 = arith.constant 0 : i32
    %c0_i32_1 = arith.constant 0 : i32
    return %c0_i32, %c0_i32_0 : i32, i32
  }
  func.func @transform_8(%arg0: i32) -> (i32, i32) {
    %c0_i32 = arith.constant 0 : i32
    %c0_i32_0 = arith.constant 0 : i32
    %c0_i32_1 = arith.constant 0 : i32
    return %c0_i32, %c0_i32_0 : i32, i32
  }
}

</mosaic_0001>

<bundles_post_ra>
// kernel: small_thick_net_forward.2
= control target key start
LH: loop header
LB: loop body
LE: loop exit
PB: predicated region body
PF: predicated region fallthrough
CT: control target
= control target key end

     0   :  { %s1424_s1 = inlined_call_operand.vmem [shape: bf16[128,128], index: 1, kind: input, shape index: {}]   ;;  %s1425_s2 = inlined_call_operand.vmem [shape: f32[1,128], index: 2, kind: input, shape index: {}]   ;;  %s1426_s0 = inlined_call_operand.vmem [shape: bf16[512,128], index: 0, kind: input, shape index: {}]   ;;  %s1427_s3 = inlined_call_operand.vmem [shape: bf16[512,128], index: 3, kind: output, shape index: {}]  }
   0x1   :  { %v902_v0 = vld [vmem:[%s1424_s1 + $0x38] sm:$0xff]  ;;  %v901_v1 = vld [vmem:[%s1424_s1 + $0x30] sm:$0xff]  ;;  %v900_v2 = vld [vmem:[%s1424_s1 + $0x28] sm:$0xff] }
   0x2   :  { %338 = vmatpush.bf16.msra.mxu0 %v902_v0  ;;  %1094 = vmatpush.bf16.msra.mxu1 %v902_v0  ;;  %v899_v3 = vld [vmem:[%s1424_s1 + $0x20] sm:$0xff]  ;;  %v898_v4 = vld [vmem:[%s1424_s1 + $0x18] sm:$0xff]  ;;  %v897_v5 = vld [vmem:[%s1424_s1 + $0x10] sm:$0xff] }
   0x3   :  { %1095 = vmatpush.bf16.msra.mxu2 %v902_v0  ;;  %1096 = vmatpush.bf16.msra.mxu3 %v902_v0  ;;  %v896_v6 = vld [vmem:[%s1424_s1 + $0x8] sm:$0xff]  ;;  %v895_v7 = vld [vmem:[%s1424_s1] sm:$0xff]  ;;  %v865_v16 = vld [vmem:[%s1426_s0 + $0x10] sm:$0xff] }
   0x4   :  { %v863_v8 = vld [vmem:[%s1426_s0] sm:$0xff]  ;;  %v864_v12 = vld [vmem:[%s1426_s0 + $0x8] sm:$0xff]  ;;  %v873_v17 = vld [vmem:[%s1426_s0 + $0x50] sm:$0xff] }
   0x5   :  { %v871_v9 = vld [vmem:[%s1426_s0 + $0x40] sm:$0xff]  ;;  %v872_v13 = vld [vmem:[%s1426_s0 + $0x48] sm:$0xff]  ;;  %v881_v18 = vld [vmem:[%s1426_s0 + $0x90] sm:$0xff] }
   0x6   :  { %339 = vmatpush.bf16.msra.mxu0 %v901_v1  ;;  %1097 = vmatpush.bf16.msra.mxu1 %v901_v1  ;;  %v879_v10 = vld [vmem:[%s1426_s0 + $0x80] sm:$0xff]  ;;  %v880_v14 = vld [vmem:[%s1426_s0 + $0x88] sm:$0xff]  ;;  %v889_v19 = vld [vmem:[%s1426_s0 + $0xd0] sm:$0xff] }
   0x7   :  { %1098 = vmatpush.bf16.msra.mxu2 %v901_v1  ;;  %1099 = vmatpush.bf16.msra.mxu3 %v901_v1  ;;  %v887_v11 = vld [vmem:[%s1426_s0 + $0xc0] sm:$0xff]  ;;  %v888_v15 = vld [vmem:[%s1426_s0 + $0xc8] sm:$0xff]  ;;  %v866_v20 = vld [vmem:[%s1426_s0 + $0x18] sm:$0xff] }
   0x8   :  { %v874_v21 = vld [vmem:[%s1426_s0 + $0x58] sm:$0xff]  ;;  %v867_v24 = vld [vmem:[%s1426_s0 + $0x20] sm:$0xff]  ;;  %v868_v28 = vld [vmem:[%s1426_s0 + $0x28] sm:$0xff] }
   0x9   :  { %v882_v22 = vld [vmem:[%s1426_s0 + $0x98] sm:$0xff]  ;;  %v875_v25 = vld [vmem:[%s1426_s0 + $0x60] sm:$0xff]  ;;  %v876_v29 = vld [vmem:[%s1426_s0 + $0x68] sm:$0xff] }
   0xa   :  { %340 = vmatpush.bf16.msra.mxu0 %v900_v2  ;;  %1100 = vmatpush.bf16.msra.mxu1 %v900_v2  ;;  %v890_v23 = vld [vmem:[%s1426_s0 + $0xd8] sm:$0xff]  ;;  %v883_v26 = vld [vmem:[%s1426_s0 + $0xa0] sm:$0xff]  ;;  %v884_v30 = vld [vmem:[%s1426_s0 + $0xa8] sm:$0xff] }
   0xb   :  { %1101 = vmatpush.bf16.msra.mxu2 %v900_v2  ;;  %1102 = vmatpush.bf16.msra.mxu3 %v900_v2  ;;  %v891_v27 = vld [vmem:[%s1426_s0 + $0xe0] sm:$0xff]  ;;  %v892_v31 = vld [vmem:[%s1426_s0 + $0xe8] sm:$0xff]  ;;  %v869_v32 = vld [vmem:[%s1426_s0 + $0x30] sm:$0xff] }
   0xc   :  { %v877_v33 = vld [vmem:[%s1426_s0 + $0x70] sm:$0xff]  ;;  %v870_v36 = vld [vmem:[%s1426_s0 + $0x38] sm:$0xff]  ;;  %v1262_v42 = vld [vmem:[%s1425_s2] ss:$0 sm:$0xff] }
   0xd   :  { %v885_v34 = vld [vmem:[%s1426_s0 + $0xb0] sm:$0xff]  ;;  %v878_v37 = vld [vmem:[%s1426_s0 + $0x78] sm:$0xff] }
   0xe   :  { %341 = vmatpush.bf16.msra.mxu0 %v899_v3  ;;  %1103 = vmatpush.bf16.msra.mxu1 %v899_v3  ;;  %v893_v35 = vld [vmem:[%s1426_s0 + $0xf0] sm:$0xff]  ;;  %v886_v38 = vld [vmem:[%s1426_s0 + $0xb8] sm:$0xff] }
   0xf   :  { %1104 = vmatpush.bf16.msra.mxu2 %v899_v3  ;;  %1105 = vmatpush.bf16.msra.mxu3 %v899_v3  ;;  %v894_v39 = vld [vmem:[%s1426_s0 + $0xf8] sm:$0xff] }
  0x12   :  { %342 = vmatpush.bf16.msra.mxu0 %v898_v4  ;;  %1106 = vmatpush.bf16.msra.mxu1 %v898_v4 }
  0x13   :  { %1107 = vmatpush.bf16.msra.mxu2 %v898_v4  ;;  %1108 = vmatpush.bf16.msra.mxu3 %v898_v4 }
  0x16   :  { %343 = vmatpush.bf16.msra.mxu0 %v897_v5  ;;  %1109 = vmatpush.bf16.msra.mxu1 %v897_v5 }
  0x17   :  { %1110 = vmatpush.bf16.msra.mxu2 %v897_v5  ;;  %1111 = vmatpush.bf16.msra.mxu3 %v897_v5 }
  0x1a   :  { %344 = vmatpush.bf16.msra.mxu0 %v896_v6  ;;  %1112 = vmatpush.bf16.msra.mxu1 %v896_v6 }
  0x1b   :  { %1113 = vmatpush.bf16.msra.mxu2 %v896_v6  ;;  %1114 = vmatpush.bf16.msra.mxu3 %v896_v6 }
  0x1e   :  { %345 = vmatpush.bf16.msra.mxu0 %v895_v7  ;;  %1115 = vmatpush.bf16.msra.mxu1 %v895_v7 }
  0x1f   :  { %1116 = vmatpush.bf16.msra.mxu2 %v895_v7  ;;  %1117 = vmatpush.bf16.msra.mxu3 %v895_v7 }
  0x21   :  { %346 = vmatmul.bf16.vlgmr.msra.gmra.mxu0 %v863_v8  ;;  %386 = vmatmul.bf16.vlgmr.msra.gmra.mxu1 %v871_v9 }
  0x22   :  { %426 = vmatmul.bf16.vlgmr.msra.gmra.mxu2 %v879_v10  ;;  %466 = vmatmul.bf16.vlgmr.msra.gmra.mxu3 %v887_v11 }
  0x31   :  { %351 = vmatmul.bf16.gmra.mxu0 %v864_v12  ;;  %391 = vmatmul.bf16.gmra.mxu1 %v872_v13 }
  0x32   :  { %431 = vmatmul.bf16.gmra.mxu2 %v880_v14  ;;  %471 = vmatmul.bf16.gmra.mxu3 %v888_v15 }
  0x41   :  { %356 = vmatmul.bf16.gmra.mxu0 %v865_v16  ;;  %396 = vmatmul.bf16.gmra.mxu1 %v873_v17 }
  0x42   :  { %436 = vmatmul.bf16.gmra.mxu2 %v881_v18  ;;  %476 = vmatmul.bf16.gmra.mxu3 %v889_v19 }
  0x51   :  { %361 = vmatmul.bf16.gmra.mxu0 %v866_v20  ;;  %401 = vmatmul.bf16.gmra.mxu1 %v874_v21 }
  0x52   :  { %441 = vmatmul.bf16.gmra.mxu2 %v882_v22  ;;  %481 = vmatmul.bf16.gmra.mxu3 %v890_v23 }
  0x61   :  { %366 = vmatmul.bf16.gmra.mxu0 %v867_v24  ;;  %406 = vmatmul.bf16.gmra.mxu1 %v875_v25 }
  0x62   :  { %446 = vmatmul.bf16.gmra.mxu2 %v883_v26  ;;  %486 = vmatmul.bf16.gmra.mxu3 %v891_v27 }
  0x71   :  { %371 = vmatmul.bf16.gmra.mxu0 %v868_v28  ;;  %411 = vmatmul.bf16.gmra.mxu1 %v876_v29 }
  0x72   :  { %451 = vmatmul.bf16.gmra.mxu2 %v884_v30  ;;  %491 = vmatmul.bf16.gmra.mxu3 %v892_v31 }
  0x81   :  { %376 = vmatmul.bf16.gmra.mxu0 %v869_v32  ;;  %416 = vmatmul.bf16.gmra.mxu1 %v877_v33 }
  0x82   :  { %456 = vmatmul.bf16.gmra.mxu2 %v885_v34  ;;  %496 = vmatmul.bf16.gmra.mxu3 %v893_v35 }
  0x91   :  { %381 = vmatmul.bf16.gmra.mxu0 %v870_v36  ;;  %421 = vmatmul.bf16.gmra.mxu1 %v878_v37 }
  0x92   :  { %461 = vmatmul.bf16.gmra.mxu2 %v886_v38  ;;  %501 = vmatmul.bf16.gmra.mxu3 %v894_v39 }
  0x9e   :  { %v347_v40 = vpop.f32.mrf.mxu0  ;;  %v387_v41 = vpop.f32.mrf.mxu1 }
  0x9f   :  { %v348_v43 = vadd.f32 %v1262_v42, %v347_v40  ;;  %v388_v44 = vadd.f32 %v1262_v42, %v387_v41 }
  0xa1   :  { %v507_v51 = vmax.f32 %v348_v43, 0.0  ;;  %v523_v52 = vmax.f32 %v388_v44, 0.0 }
  0xa5   :  { %v427_v45 = vpop.f32.mrf.mxu2  ;;  %v467_v46 = vpop.f32.mrf.mxu3 }
  0xa6   :  { %v349_v47 = vpop.f32.mrf.mxu0  ;;  %v389_v48 = vpop.f32.mrf.mxu1  ;;  %v428_v57 = vadd.f32 %v1262_v42, %v427_v45  ;;  %v468_v58 = vadd.f32 %v1262_v42, %v467_v46 }
  0xa7   :  { %v350_v49 = vadd.f32 %v1262_v42, %v349_v47  ;;  %v390_v50 = vadd.f32 %v1262_v42, %v389_v48 }
  0xa8   :  { %v539_v1 = vmax.f32 %v428_v57, 0.0  ;;  %v555_v2 = vmax.f32 %v468_v58, 0.0 }
  0xa9   :  { %v508_v53 = vmax.f32 %v350_v49, 0.0  ;;  %v524_v54 = vmax.f32 %v390_v50, 0.0 }
  0xab   :  { %v906_v55 = vpack.c.bf16 %v508_v53, %v507_v51  ;;  %v946_v56 = vpack.c.bf16 %v524_v54, %v523_v52 }
  0xad   :  { %907 = vst [vmem:[%s1427_s3] sm:$0xff] %v906_v55   ;;  %v429_v59 = vpop.f32.mrf.mxu2  ;;  %v469_v60 = vpop.f32.mrf.mxu3 }
  0xae   :  { %1070 = vst [vmem:[%s1427_s3 + $0x40] sm:$0xff] %v946_v56   ;;  %v430_v61 = vadd.f32 %v1262_v42, %v429_v59  ;;  %v470_v62 = vadd.f32 %v1262_v42, %v469_v60  ;;  %v352_v63 = vpop.f32.mrf.mxu0  ;;  %v392_v0 = vpop.f32.mrf.mxu1 }
  0xaf   :  { %v353_v7 = vadd.f32 %v1262_v42, %v352_v63  ;;  %v393_v8 = vadd.f32 %v1262_v42, %v392_v0 }
  0xb0   :  { %v540_v3 = vmax.f32 %v430_v61, 0.0  ;;  %v556_v4 = vmax.f32 %v470_v62, 0.0 }
  0xb1   :  { %v509_v15 = vmax.f32 %v353_v7, 0.0  ;;  %v525_v16 = vmax.f32 %v393_v8, 0.0 }
  0xb2   :  { %v986_v5 = vpack.c.bf16 %v540_v3, %v539_v1  ;;  %v1026_v6 = vpack.c.bf16 %v556_v4, %v555_v2 }
  0xb4   :  { %1078 = vst [vmem:[%s1427_s3 + $0x80] sm:$0xff] %v986_v5  }
  0xb5   :  { %1086 = vst [vmem:[%s1427_s3 + $0xc0] sm:$0xff] %v1026_v6   ;;  %v432_v9 = vpop.f32.mrf.mxu2  ;;  %v472_v10 = vpop.f32.mrf.mxu3 }
  0xb6   :  { %v354_v11 = vpop.f32.mrf.mxu0  ;;  %v394_v12 = vpop.f32.mrf.mxu1  ;;  %v433_v21 = vadd.f32 %v1262_v42, %v432_v9  ;;  %v473_v22 = vadd.f32 %v1262_v42, %v472_v10 }
  0xb7   :  { %v355_v13 = vadd.f32 %v1262_v42, %v354_v11  ;;  %v395_v14 = vadd.f32 %v1262_v42, %v394_v12 }
  0xb8   :  { %v541_v29 = vmax.f32 %v433_v21, 0.0  ;;  %v557_v30 = vmax.f32 %v473_v22, 0.0 }
  0xb9   :  { %v510_v17 = vmax.f32 %v355_v13, 0.0  ;;  %v526_v18 = vmax.f32 %v395_v14, 0.0 }
  0xbb   :  { %v911_v19 = vpack.c.bf16 %v510_v17, %v509_v15  ;;  %v951_v20 = vpack.c.bf16 %v526_v18, %v525_v16 }
  0xbd   :  { %1063 = vst [vmem:[%s1427_s3 + $0x8] sm:$0xff] %v911_v19   ;;  %v434_v23 = vpop.f32.mrf.mxu2  ;;  %v474_v24 = vpop.f32.mrf.mxu3 }
  0xbe   :  { %1071 = vst [vmem:[%s1427_s3 + $0x48] sm:$0xff] %v951_v20   ;;  %v435_v25 = vadd.f32 %v1262_v42, %v434_v23  ;;  %v475_v26 = vadd.f32 %v1262_v42, %v474_v24  ;;  %v357_v27 = vpop.f32.mrf.mxu0  ;;  %v397_v28 = vpop.f32.mrf.mxu1 }
  0xbf   :  { %v358_v35 = vadd.f32 %v1262_v42, %v357_v27  ;;  %v398_v36 = vadd.f32 %v1262_v42, %v397_v28 }
  0xc0   :  { %v542_v31 = vmax.f32 %v435_v25, 0.0  ;;  %v558_v32 = vmax.f32 %v475_v26, 0.0 }
  0xc1   :  { %v511_v44 = vmax.f32 %v358_v35, 0.0  ;;  %v527_v45 = vmax.f32 %v398_v36, 0.0 }
  0xc2   :  { %v991_v33 = vpack.c.bf16 %v542_v31, %v541_v29  ;;  %v1031_v34 = vpack.c.bf16 %v558_v32, %v557_v30 }
  0xc4   :  { %1079 = vst [vmem:[%s1427_s3 + $0x88] sm:$0xff] %v991_v33  }
  0xc5   :  { %1087 = vst [vmem:[%s1427_s3 + $0xc8] sm:$0xff] %v1031_v34   ;;  %v437_v37 = vpop.f32.mrf.mxu2  ;;  %v477_v38 = vpop.f32.mrf.mxu3 }
  0xc6   :  { %v359_v39 = vpop.f32.mrf.mxu0  ;;  %v399_v40 = vpop.f32.mrf.mxu1  ;;  %v438_v50 = vadd.f32 %v1262_v42, %v437_v37  ;;  %v478_v51 = vadd.f32 %v1262_v42, %v477_v38 }
  0xc7   :  { %v360_v41 = vadd.f32 %v1262_v42, %v359_v39  ;;  %v400_v43 = vadd.f32 %v1262_v42, %v399_v40 }
  0xc8   :  { %v543_v58 = vmax.f32 %v438_v50, 0.0  ;;  %v559_v59 = vmax.f32 %v478_v51, 0.0 }
  0xc9   :  { %v512_v46 = vmax.f32 %v360_v41, 0.0  ;;  %v528_v47 = vmax.f32 %v400_v43, 0.0 }
  0xcb   :  { %v916_v48 = vpack.c.bf16 %v512_v46, %v511_v44  ;;  %v956_v49 = vpack.c.bf16 %v528_v47, %v527_v45 }
  0xcd   :  { %1064 = vst [vmem:[%s1427_s3 + $0x10] sm:$0xff] %v916_v48   ;;  %v439_v52 = vpop.f32.mrf.mxu2  ;;  %v479_v53 = vpop.f32.mrf.mxu3 }
  0xce   :  { %1072 = vst [vmem:[%s1427_s3 + $0x50] sm:$0xff] %v956_v49   ;;  %v440_v54 = vadd.f32 %v1262_v42, %v439_v52  ;;  %v480_v55 = vadd.f32 %v1262_v42, %v479_v53  ;;  %v362_v56 = vpop.f32.mrf.mxu0  ;;  %v402_v57 = vpop.f32.mrf.mxu1 }
  0xcf   :  { %v363_v0 = vadd.f32 %v1262_v42, %v362_v56  ;;  %v403_v1 = vadd.f32 %v1262_v42, %v402_v57 }
  0xd0   :  { %v544_v60 = vmax.f32 %v440_v54, 0.0  ;;  %v560_v61 = vmax.f32 %v480_v55, 0.0 }
  0xd1   :  { %v513_v8 = vmax.f32 %v363_v0, 0.0  ;;  %v529_v9 = vmax.f32 %v403_v1, 0.0 }
  0xd2   :  { %v996_v62 = vpack.c.bf16 %v544_v60, %v543_v58  ;;  %v1036_v63 = vpack.c.bf16 %v560_v61, %v559_v59 }
  0xd4   :  { %1080 = vst [vmem:[%s1427_s3 + $0x90] sm:$0xff] %v996_v62  }
  0xd5   :  { %1088 = vst [vmem:[%s1427_s3 + $0xd0] sm:$0xff] %v1036_v63   ;;  %v442_v2 = vpop.f32.mrf.mxu2  ;;  %v482_v3 = vpop.f32.mrf.mxu3 }
  0xd6   :  { %v364_v4 = vpop.f32.mrf.mxu0  ;;  %v404_v5 = vpop.f32.mrf.mxu1  ;;  %v443_v14 = vadd.f32 %v1262_v42, %v442_v2  ;;  %v483_v15 = vadd.f32 %v1262_v42, %v482_v3 }
  0xd7   :  { %v365_v6 = vadd.f32 %v1262_v42, %v364_v4  ;;  %v405_v7 = vadd.f32 %v1262_v42, %v404_v5 }
  0xd8   :  { %v545_v22 = vmax.f32 %v443_v14, 0.0  ;;  %v561_v23 = vmax.f32 %v483_v15, 0.0 }
  0xd9   :  { %v514_v10 = vmax.f32 %v365_v6, 0.0  ;;  %v530_v11 = vmax.f32 %v405_v7, 0.0 }
  0xdb   :  { %v921_v12 = vpack.c.bf16 %v514_v10, %v513_v8  ;;  %v961_v13 = vpack.c.bf16 %v530_v11, %v529_v9 }
  0xdd   :  { %1065 = vst [vmem:[%s1427_s3 + $0x18] sm:$0xff] %v921_v12   ;;  %v444_v16 = vpop.f32.mrf.mxu2  ;;  %v484_v17 = vpop.f32.mrf.mxu3 }
  0xde   :  { %1073 = vst [vmem:[%s1427_s3 + $0x58] sm:$0xff] %v961_v13   ;;  %v445_v18 = vadd.f32 %v1262_v42, %v444_v16  ;;  %v485_v19 = vadd.f32 %v1262_v42, %v484_v17  ;;  %v367_v20 = vpop.f32.mrf.mxu0  ;;  %v407_v21 = vpop.f32.mrf.mxu1 }
  0xdf   :  { %v368_v28 = vadd.f32 %v1262_v42, %v367_v20  ;;  %v408_v29 = vadd.f32 %v1262_v42, %v407_v21 }
  0xe0   :  { %v546_v24 = vmax.f32 %v445_v18, 0.0  ;;  %v562_v25 = vmax.f32 %v485_v19, 0.0 }
  0xe1   :  { %v515_v36 = vmax.f32 %v368_v28, 0.0  ;;  %v531_v37 = vmax.f32 %v408_v29, 0.0 }
  0xe2   :  { %v1001_v26 = vpack.c.bf16 %v546_v24, %v545_v22  ;;  %v1041_v27 = vpack.c.bf16 %v562_v25, %v561_v23 }
  0xe4   :  { %1081 = vst [vmem:[%s1427_s3 + $0x98] sm:$0xff] %v1001_v26  }
  0xe5   :  { %1089 = vst [vmem:[%s1427_s3 + $0xd8] sm:$0xff] %v1041_v27   ;;  %v447_v30 = vpop.f32.mrf.mxu2  ;;  %v487_v31 = vpop.f32.mrf.mxu3 }
  0xe6   :  { %v369_v32 = vpop.f32.mrf.mxu0  ;;  %v409_v33 = vpop.f32.mrf.mxu1  ;;  %v448_v43 = vadd.f32 %v1262_v42, %v447_v30  ;;  %v488_v44 = vadd.f32 %v1262_v42, %v487_v31 }
  0xe7   :  { %v370_v34 = vadd.f32 %v1262_v42, %v369_v32  ;;  %v410_v35 = vadd.f32 %v1262_v42, %v409_v33 }
  0xe8   :  { %v547_v51 = vmax.f32 %v448_v43, 0.0  ;;  %v563_v52 = vmax.f32 %v488_v44, 0.0 }
  0xe9   :  { %v516_v38 = vmax.f32 %v370_v34, 0.0  ;;  %v532_v39 = vmax.f32 %v410_v35, 0.0 }
  0xeb   :  { %v926_v40 = vpack.c.bf16 %v516_v38, %v515_v36  ;;  %v966_v41 = vpack.c.bf16 %v532_v39, %v531_v37 }
  0xed   :  { %1066 = vst [vmem:[%s1427_s3 + $0x20] sm:$0xff] %v926_v40   ;;  %v449_v45 = vpop.f32.mrf.mxu2  ;;  %v489_v46 = vpop.f32.mrf.mxu3 }
  0xee   :  { %1074 = vst [vmem:[%s1427_s3 + $0x60] sm:$0xff] %v966_v41   ;;  %v450_v47 = vadd.f32 %v1262_v42, %v449_v45  ;;  %v490_v48 = vadd.f32 %v1262_v42, %v489_v46  ;;  %v372_v49 = vpop.f32.mrf.mxu0  ;;  %v412_v50 = vpop.f32.mrf.mxu1 }
  0xef   :  { %v373_v57 = vadd.f32 %v1262_v42, %v372_v49  ;;  %v413_v58 = vadd.f32 %v1262_v42, %v412_v50 }
  0xf0   :  { %v548_v53 = vmax.f32 %v450_v47, 0.0  ;;  %v564_v54 = vmax.f32 %v490_v48, 0.0 }
  0xf1   :  { %v517_v1 = vmax.f32 %v373_v57, 0.0  ;;  %v533_v2 = vmax.f32 %v413_v58, 0.0 }
  0xf2   :  { %v1006_v55 = vpack.c.bf16 %v548_v53, %v547_v51  ;;  %v1046_v56 = vpack.c.bf16 %v564_v54, %v563_v52 }
  0xf4   :  { %1082 = vst [vmem:[%s1427_s3 + $0xa0] sm:$0xff] %v1006_v55  }
  0xf5   :  { %1090 = vst [vmem:[%s1427_s3 + $0xe0] sm:$0xff] %v1046_v56   ;;  %v452_v59 = vpop.f32.mrf.mxu2  ;;  %v492_v60 = vpop.f32.mrf.mxu3 }
  0xf6   :  { %v374_v61 = vpop.f32.mrf.mxu0  ;;  %v414_v62 = vpop.f32.mrf.mxu1  ;;  %v453_v7 = vadd.f32 %v1262_v42, %v452_v59  ;;  %v493_v8 = vadd.f32 %v1262_v42, %v492_v60 }
  0xf7   :  { %v375_v63 = vadd.f32 %v1262_v42, %v374_v61  ;;  %v415_v0 = vadd.f32 %v1262_v42, %v414_v62 }
  0xf8   :  { %v549_v15 = vmax.f32 %v453_v7, 0.0  ;;  %v565_v16 = vmax.f32 %v493_v8, 0.0 }
  0xf9   :  { %v518_v3 = vmax.f32 %v375_v63, 0.0  ;;  %v534_v4 = vmax.f32 %v415_v0, 0.0 }
  0xfb   :  { %v931_v5 = vpack.c.bf16 %v518_v3, %v517_v1  ;;  %v971_v6 = vpack.c.bf16 %v534_v4, %v533_v2 }
  0xfd   :  { %1067 = vst [vmem:[%s1427_s3 + $0x28] sm:$0xff] %v931_v5   ;;  %v454_v9 = vpop.f32.mrf.mxu2  ;;  %v494_v10 = vpop.f32.mrf.mxu3 }
  0xfe   :  { %1075 = vst [vmem:[%s1427_s3 + $0x68] sm:$0xff] %v971_v6   ;;  %v455_v11 = vadd.f32 %v1262_v42, %v454_v9  ;;  %v495_v12 = vadd.f32 %v1262_v42, %v494_v10  ;;  %v377_v13 = vpop.f32.mrf.mxu0  ;;  %v417_v14 = vpop.f32.mrf.mxu1 }
  0xff   :  { %v378_v21 = vadd.f32 %v1262_v42, %v377_v13  ;;  %v418_v22 = vadd.f32 %v1262_v42, %v417_v14 }
 0x100   :  { %v550_v17 = vmax.f32 %v455_v11, 0.0  ;;  %v566_v18 = vmax.f32 %v495_v12, 0.0 }
 0x101   :  { %v519_v29 = vmax.f32 %v378_v21, 0.0  ;;  %v535_v30 = vmax.f32 %v418_v22, 0.0 }
 0x102   :  { %v1011_v19 = vpack.c.bf16 %v550_v17, %v549_v15  ;;  %v1051_v20 = vpack.c.bf16 %v566_v18, %v565_v16 }
 0x104   :  { %1083 = vst [vmem:[%s1427_s3 + $0xa8] sm:$0xff] %v1011_v19  }
 0x105   :  { %1091 = vst [vmem:[%s1427_s3 + $0xe8] sm:$0xff] %v1051_v20   ;;  %v457_v23 = vpop.f32.mrf.mxu2  ;;  %v497_v24 = vpop.f32.mrf.mxu3 }
 0x106   :  { %v379_v25 = vpop.f32.mrf.mxu0  ;;  %v419_v26 = vpop.f32.mrf.mxu1  ;;  %v458_v35 = vadd.f32 %v1262_v42, %v457_v23  ;;  %v498_v36 = vadd.f32 %v1262_v42, %v497_v24 }
 0x107   :  { %v380_v27 = vadd.f32 %v1262_v42, %v379_v25  ;;  %v420_v28 = vadd.f32 %v1262_v42, %v419_v26 }
 0x108   :  { %v551_v44 = vmax.f32 %v458_v35, 0.0  ;;  %v567_v45 = vmax.f32 %v498_v36, 0.0 }
 0x109   :  { %v520_v31 = vmax.f32 %v380_v27, 0.0  ;;  %v536_v32 = vmax.f32 %v420_v28, 0.0 }
 0x10b   :  { %v936_v33 = vpack.c.bf16 %v520_v31, %v519_v29  ;;  %v976_v34 = vpack.c.bf16 %v536_v32, %v535_v30 }
 0x10d   :  { %1068 = vst [vmem:[%s1427_s3 + $0x30] sm:$0xff] %v936_v33   ;;  %v459_v37 = vpop.f32.mrf.mxu2  ;;  %v499_v38 = vpop.f32.mrf.mxu3 }
 0x10e   :  { %1076 = vst [vmem:[%s1427_s3 + $0x70] sm:$0xff] %v976_v34   ;;  %v460_v39 = vadd.f32 %v1262_v42, %v459_v37  ;;  %v500_v40 = vadd.f32 %v1262_v42, %v499_v38  ;;  %v382_v41 = vpop.f32.mrf.mxu0  ;;  %v422_v43 = vpop.f32.mrf.mxu1 }
 0x10f   :  { %v383_v50 = vadd.f32 %v1262_v42, %v382_v41  ;;  %v423_v51 = vadd.f32 %v1262_v42, %v422_v43 }
 0x110   :  { %v552_v46 = vmax.f32 %v460_v39, 0.0  ;;  %v568_v47 = vmax.f32 %v500_v40, 0.0 }
 0x111   :  { %v521_v58 = vmax.f32 %v383_v50, 0.0  ;;  %v537_v59 = vmax.f32 %v423_v51, 0.0 }
 0x112   :  { %v1016_v48 = vpack.c.bf16 %v552_v46, %v551_v44  ;;  %v1056_v49 = vpack.c.bf16 %v568_v47, %v567_v45 }
 0x114   :  { %1084 = vst [vmem:[%s1427_s3 + $0xb0] sm:$0xff] %v1016_v48  }
 0x115   :  { %1092 = vst [vmem:[%s1427_s3 + $0xf0] sm:$0xff] %v1056_v49   ;;  %v462_v52 = vpop.f32.mrf.mxu2  ;;  %v502_v53 = vpop.f32.mrf.mxu3 }
 0x116   :  { %v384_v54 = vpop.f32.mrf.mxu0  ;;  %v424_v55 = vpop.f32.mrf.mxu1  ;;  %v463_v0 = vadd.f32 %v1262_v42, %v462_v52  ;;  %v503_v1 = vadd.f32 %v1262_v42, %v502_v53 }
 0x117   :  { %v385_v56 = vadd.f32 %v1262_v42, %v384_v54  ;;  %v425_v57 = vadd.f32 %v1262_v42, %v424_v55 }
 0x118   :  { %v553_v6 = vmax.f32 %v463_v0, 0.0  ;;  %v569_v7 = vmax.f32 %v503_v1, 0.0 }
 0x119   :  { %v522_v60 = vmax.f32 %v385_v56, 0.0  ;;  %v538_v61 = vmax.f32 %v425_v57, 0.0 }
 0x11b   :  { %v941_v62 = vpack.c.bf16 %v522_v60, %v521_v58  ;;  %v981_v63 = vpack.c.bf16 %v538_v61, %v537_v59 }
 0x11d   :  { %1069 = vst [vmem:[%s1427_s3 + $0x38] sm:$0xff] %v941_v62   ;;  %v464_v2 = vpop.f32.mrf.mxu2  ;;  %v504_v3 = vpop.f32.mrf.mxu3 }
 0x11e   :  { %1077 = vst [vmem:[%s1427_s3 + $0x78] sm:$0xff] %v981_v63   ;;  %v465_v4 = vadd.f32 %v1262_v42, %v464_v2  ;;  %v505_v5 = vadd.f32 %v1262_v42, %v504_v3 }
 0x120   :  { %v554_v8 = vmax.f32 %v465_v4, 0.0  ;;  %v570_v9 = vmax.f32 %v505_v5, 0.0 }
 0x122   :  { %v1021_v10 = vpack.c.bf16 %v554_v8, %v553_v6  ;;  %v1061_v11 = vpack.c.bf16 %v570_v9, %v569_v7 }
 0x124   :  { %1085 = vst [vmem:[%s1427_s3 + $0xb8] sm:$0xff] %v1021_v10  }
 0x125   :  { %1093 = vst [vmem:[%s1427_s3 + $0xf8] sm:$0xff] %v1061_v11  }

// kernel: small_thick_net_forward.3
= control target key start
LH: loop header
LB: loop body
LE: loop exit
PB: predicated region body
PF: predicated region fallthrough
CT: control target
= control target key end

     0   :  { %vm2416_vm0 = vcmask 523264   ;;  %vm3890_vm4 = vcmask 1041408   ;;  %s7976_s1 = inlined_call_operand.vmem [shape: bf16[3200,64], index: 1, kind: input, shape index: {}]   ;;  %s7977_s0 = inlined_call_operand.vmem [shape: bf16[32,3200], index: 0, kind: input, shape index: {}]   ;;  %s7978_s2 = inlined_call_operand.vmem [shape: f32[1,64], index: 2, kind: input, shape index: {}]   ;;  %s7979_s3 = inlined_call_operand.vmem [shape: bf16[1024,256], index: 3, kind: input, shape index: {}]   ;;  %s7980_s6 = inlined_call_operand.vmem [shape: f32[1,128], index: 6, kind: input, shape index: {}]   ;;  %s7981_s5 = inlined_call_operand.vmem [shape: bf16[256,128], index: 5, kind: input, shape index: {}]   ;;  %s7982_s4 = inlined_call_operand.vmem [shape: f32[1,256], index: 4, kind: input, shape index: {}]   ;;  %s7983_s7 = inlined_call_operand.vmem [shape: f32[2,128], index: 7, kind: output, shape index: {0}]   ;;  %s7984_s8 = inlined_call_operand.vmem [shape: f32[2,128], index: 8, kind: output, shape index: {1}]  }
   0x1   :  { %v5579_v0 = vld [vmem:[%s7976_s1 + $0x38] sm:$0xff]  ;;  %v5578_v4 = vld [vmem:[%s7976_s1 + $0x30] sm:$0xff]  ;;  %v5577_v8 = vld [vmem:[%s7976_s1 + $0x28] sm:$0xff] }
   0x2   :  { %v5595_v1 = vld [vmem:[%s7976_s1 + $0xb8] sm:$0xff]  ;;  %1937 = vmatpush.bf16.msra.mxu0 %v5579_v0  ;;  %v5594_v5 = vld [vmem:[%s7976_s1 + $0xb0] sm:$0xff]  ;;  %v5593_v9 = vld [vmem:[%s7976_s1 + $0xa8] sm:$0xff] }
   0x3   :  { %v5587_v2 = vld [vmem:[%s7976_s1 + $0x78] sm:$0xff]  ;;  %1975 = vmatpush.bf16.msra.mxu2 %v5595_v1  ;;  %v5586_v6 = vld [vmem:[%s7976_s1 + $0x70] sm:$0xff]  ;;  %v5585_v10 = vld [vmem:[%s7976_s1 + $0x68] sm:$0xff] }
   0x4   :  { %v5603_v3 = vld [vmem:[%s7976_s1 + $0xf8] sm:$0xff]  ;;  %1956 = vmatpush.bf16.msra.mxu1 %v5587_v2  ;;  %v5602_v7 = vld [vmem:[%s7976_s1 + $0xf0] sm:$0xff]  ;;  %v5601_v11 = vld [vmem:[%s7976_s1 + $0xe8] sm:$0xff] }
   0x5   :  { %1994 = vmatpush.bf16.msra.mxu3 %v5603_v3  ;;  %v5576_v12 = vld [vmem:[%s7976_s1 + $0x20] sm:$0xff]  ;;  %v5575_v16 = vld [vmem:[%s7976_s1 + $0x18] sm:$0xff]  ;;  %v5574_v20 = vld [vmem:[%s7976_s1 + $0x10] sm:$0xff] }
   0x6   :  { %1938 = vmatpush.bf16.msra.mxu0 %v5578_v4  ;;  %v5592_v13 = vld [vmem:[%s7976_s1 + $0xa0] sm:$0xff]  ;;  %v5591_v17 = vld [vmem:[%s7976_s1 + $0x98] sm:$0xff]  ;;  %v5590_v21 = vld [vmem:[%s7976_s1 + $0x90] sm:$0xff] }
   0x7   :  { %1976 = vmatpush.bf16.msra.mxu2 %v5594_v5  ;;  %v5584_v14 = vld [vmem:[%s7976_s1 + $0x60] sm:$0xff]  ;;  %v5583_v18 = vld [vmem:[%s7976_s1 + $0x58] sm:$0xff]  ;;  %v5582_v22 = vld [vmem:[%s7976_s1 + $0x50] sm:$0xff] }
   0x8   :  { %1957 = vmatpush.bf16.msra.mxu1 %v5586_v6  ;;  %v5600_v15 = vld [vmem:[%s7976_s1 + $0xe0] sm:$0xff]  ;;  %v5599_v19 = vld [vmem:[%s7976_s1 + $0xd8] sm:$0xff]  ;;  %v5598_v23 = vld [vmem:[%s7976_s1 + $0xd0] sm:$0xff] }
   0x9   :  { %1995 = vmatpush.bf16.msra.mxu3 %v5602_v7  ;;  %v5573_v24 = vld [vmem:[%s7976_s1 + $0x8] sm:$0xff]  ;;  %v5572_v28 = vld [vmem:[%s7976_s1] sm:$0xff]  ;;  %v3926_v39 = vld [vmem:[%s7977_s0 + $0x6c] sm:$0xf0] }
   0xa   :  { %1939 = vmatpush.bf16.msra.mxu0 %v5577_v8  ;;  %v5589_v25 = vld [vmem:[%s7976_s1 + $0x88] sm:$0xff]  ;;  %v5588_v29 = vld [vmem:[%s7976_s1 + $0x80] sm:$0xff]  ;;  %v5611_v40 = vld [vmem:[%s7976_s1 + $0x138] sm:$0xff] }
   0xb   :  { %1977 = vmatpush.bf16.msra.mxu2 %v5593_v9  ;;  %v5581_v26 = vld [vmem:[%s7976_s1 + $0x48] sm:$0xff]  ;;  %v5580_v30 = vld [vmem:[%s7976_s1 + $0x40] sm:$0xff]  ;;  %v5627_v41 = vld [vmem:[%s7976_s1 + $0x1b8] sm:$0xff] }
   0xc   :  { %1958 = vmatpush.bf16.msra.mxu1 %v5585_v10  ;;  %v5597_v27 = vld [vmem:[%s7976_s1 + $0xc8] sm:$0xff]  ;;  %v5596_v31 = vld [vmem:[%s7976_s1 + $0xc0] sm:$0xff]  ;;  %v5619_v46 = vld [vmem:[%s7976_s1 + $0x178] sm:$0xff] }
   0xd   :  { %1996 = vmatpush.bf16.msra.mxu3 %v5601_v11  ;;  %v3916_v32 = vld [vmem:[%s7977_s0] sm:$0xf]  ;;  %v5534_v33 = vld [vmem:[%s7977_s0 + $0x60] sm:$0xf0]  ;;  %v3924_v34 = vld [vmem:[%s7977_s0 + $0x8] sm:$0xf] }
   0xe   :  { %1940 = vmatpush.bf16.msra.mxu0 %v5576_v12  ;;  %v5535_v35 = vld [vmem:[%s7977_s0 + $0x68] sm:$0xf0]  ;;  %v5522_v36 = vld [vmem:[%s7977_s0 + $0x4] sm:$0xf]  ;;  %v3918_v37 = vld [vmem:[%s7977_s0 + $0x64] sm:$0xf0]  ;;  %v3917_v42 = vor.u32 %v5534_v33, %v3916_v32 }
   0xf   :  { %1978 = vmatpush.bf16.msra.mxu2 %v5592_v13  ;;  %v5523_v38 = vld [vmem:[%s7977_s0 + $0xc] sm:$0xf]  ;;  %v3925_v43 = vor.u32 %v5535_v35, %v3924_v34  ;;  %v3921_v44 = vor.u32 %v5522_v36, %v3918_v37  ;;  %v5635_v47 = vld [vmem:[%s7976_s1 + $0x1f8] sm:$0xff]  ;;  %v5610_v48 = vld [vmem:[%s7976_s1 + $0x130] sm:$0xff] }
  0x10   :  { %1959 = vmatpush.bf16.msra.mxu1 %v5584_v14  ;;  %v3929_v45 = vor.u32 %v5523_v38, %v3926_v39  ;;  %v5626_v49 = vld [vmem:[%s7976_s1 + $0x1b0] sm:$0xff]  ;;  %v5609_v52 = vld [vmem:[%s7976_s1 + $0x128] sm:$0xff]  ;;  %v5608_v56 = vld [vmem:[%s7976_s1 + $0x120] sm:$0xff] }
  0x11   :  { %1997 = vmatpush.bf16.msra.mxu3 %v5600_v15  ;;  %v5618_v50 = vld [vmem:[%s7976_s1 + $0x170] sm:$0xff]  ;;  %v5625_v53 = vld [vmem:[%s7976_s1 + $0x1a8] sm:$0xff]  ;;  %v5624_v57 = vld [vmem:[%s7976_s1 + $0x1a0] sm:$0xff] }
  0x12   :  { %1941 = vmatpush.bf16.msra.mxu0 %v5575_v16  ;;  %v5634_v51 = vld [vmem:[%s7976_s1 + $0x1f0] sm:$0xff]  ;;  %v5617_v54 = vld [vmem:[%s7976_s1 + $0x168] sm:$0xff]  ;;  %v5616_v58 = vld [vmem:[%s7976_s1 + $0x160] sm:$0xff] }
  0x13   :  { %1979 = vmatpush.bf16.msra.mxu2 %v5591_v17  ;;  %v5633_v55 = vld [vmem:[%s7976_s1 + $0x1e8] sm:$0xff]  ;;  %v5632_v59 = vld [vmem:[%s7976_s1 + $0x1e0] sm:$0xff]  ;;  %v4024_v62 = vld [vmem:[%s7977_s0 + $0xd0] sm:$0xf] }
  0x14   :  { %1960 = vmatpush.bf16.msra.mxu1 %v5583_v18  ;;  %v4016_v60 = vld [vmem:[%s7977_s0 + $0xc8] sm:$0xf]  ;;  %v5559_v61 = vld [vmem:[%s7977_s0 + $0x128] sm:$0xf0]  ;;  %v5560_v63 = vld [vmem:[%s7977_s0 + $0x130] sm:$0xf0] }
  0x15   :  { %1998 = vmatpush.bf16.msra.mxu3 %v5599_v19  ;;  %v5547_v0 = vld [vmem:[%s7977_s0 + $0xcc] sm:$0xf]  ;;  %v4018_v1 = vld [vmem:[%s7977_s0 + $0x12c] sm:$0xf0]  ;;  %v5548_v2 = vld [vmem:[%s7977_s0 + $0xd4] sm:$0xf]  ;;  %v4017_v6 = vor.u32 %v5559_v61, %v4016_v60  ;;  %v4025_v7 = vor.u32 %v5560_v63, %v4024_v62 }
  0x16   :  { %1942 = vmatpush.bf16.msra.mxu0 %v5574_v20  ;;  %v4026_v3 = vld [vmem:[%s7977_s0 + $0x134] sm:$0xf0]  ;;  %v4021_v8 = vor.u32 %v5547_v0, %v4018_v1  ;;  %v5606_v12 = vld [vmem:[%s7976_s1 + $0x110] sm:$0xff]  ;;  %v5605_v16 = vld [vmem:[%s7976_s1 + $0x108] sm:$0xff] }
  0x17   :  { %1980 = vmatpush.bf16.msra.mxu2 %v5590_v21  ;;  %v5607_v4 = vld [vmem:[%s7976_s1 + $0x118] sm:$0xff]  ;;  %v4029_v9 = vor.u32 %v5548_v2, %v4026_v3  ;;  %v5622_v13 = vld [vmem:[%s7976_s1 + $0x190] sm:$0xff]  ;;  %v5621_v17 = vld [vmem:[%s7976_s1 + $0x188] sm:$0xff] }
  0x18   :  { %1961 = vmatpush.bf16.msra.mxu1 %v5582_v22  ;;  %v5623_v5 = vld [vmem:[%s7976_s1 + $0x198] sm:$0xff]  ;;  %v5614_v14 = vld [vmem:[%s7976_s1 + $0x150] sm:$0xff]  ;;  %v5613_v18 = vld [vmem:[%s7976_s1 + $0x148] sm:$0xff] }
  0x19   :  { %1999 = vmatpush.bf16.msra.mxu3 %v5598_v23  ;;  %v5615_v10 = vld [vmem:[%s7976_s1 + $0x158] sm:$0xff]  ;;  %v5630_v15 = vld [vmem:[%s7976_s1 + $0x1d0] sm:$0xff]  ;;  %v5629_v19 = vld [vmem:[%s7976_s1 + $0x1c8] sm:$0xff] }
  0x1a   :  { %1943 = vmatpush.bf16.msra.mxu0 %v5573_v24  ;;  %v5631_v11 = vld [vmem:[%s7976_s1 + $0x1d8] sm:$0xff]  ;;  %v5604_v20 = vld [vmem:[%s7976_s1 + $0x100] sm:$0xff]  ;;  %v3932_v22 = vld [vmem:[%s7977_s0 + $0x10] sm:$0xf] }
  0x1b   :  { %1981 = vmatpush.bf16.msra.mxu2 %v5589_v25  ;;  %v5620_v21 = vld [vmem:[%s7976_s1 + $0x180] sm:$0xff]  ;;  %v5536_v25 = vld [vmem:[%s7977_s0 + $0x70] sm:$0xf0]  ;;  %v5525_v32 = vld [vmem:[%s7977_s0 + $0x1c] sm:$0xf] }
  0x1c   :  { %1962 = vmatpush.bf16.msra.mxu1 %v5581_v26  ;;  %v5612_v23 = vld [vmem:[%s7976_s1 + $0x140] sm:$0xff]  ;;  %v5643_v26 = vld [vmem:[%s7976_s1 + $0x238] sm:$0xff]  ;;  %v3933_v36 = vor.u32 %v5536_v25, %v3932_v22  ;;  %v4042_v61 = vld [vmem:[%s7977_s0 + $0x144] sm:$0xf0] }
  0x1d   :  { %2000 = vmatpush.bf16.msra.mxu3 %v5597_v27  ;;  %v5628_v24 = vld [vmem:[%s7976_s1 + $0x1c0] sm:$0xff]  ;;  %v5659_v27 = vld [vmem:[%s7976_s1 + $0x2b8] sm:$0xff]  ;;  %v3950_v25 = vld [vmem:[%s7977_s0 + $0x84] sm:$0xf0] }
  0x1e   :  { %1944 = vmatpush.bf16.msra.mxu0 %v5572_v28  ;;  %v3940_v28 = vld [vmem:[%s7977_s0 + $0x18] sm:$0xf]  ;;  %v3942_v33 = vld [vmem:[%s7977_s0 + $0x7c] sm:$0xf0]  ;;  %v5550_v60 = vld [vmem:[%s7977_s0 + $0xe4] sm:$0xf] }
  0x1f   :  { %1982 = vmatpush.bf16.msra.mxu2 %v5588_v29  ;;  %v5537_v29 = vld [vmem:[%s7977_s0 + $0x78] sm:$0xf0]  ;;  %v3945_v39 = vor.u32 %v5525_v32, %v3942_v33  ;;  %v4045_v3 = vor.u32 %v5550_v60, %v4042_v61  ;;  %v5526_v22 = vld [vmem:[%s7977_s0 + $0x24] sm:$0xf]  ;;  %v5674_v32 = vld [vmem:[%s7976_s1 + $0x330] sm:$0xff] }
  0x20   :  { %1963 = vmatpush.bf16.msra.mxu1 %v5580_v30  ;;  %v5524_v30 = vld [vmem:[%s7977_s0 + $0x14] sm:$0xf]  ;;  %v5651_v34 = vld [vmem:[%s7976_s1 + $0x278] sm:$0xff]  ;;  %v3941_v37 = vor.u32 %v5537_v29, %v3940_v28 }
  0x21   :  { %2001 = vmatpush.bf16.msra.mxu3 %v5596_v31  ;;  %1945 = vmatmul.bf16.vlgmr.msra.gmra.mxu0 %v3917_v42  ;;  %v3934_v31 = vld [vmem:[%s7977_s0 + $0x74] sm:$0xf0]  ;;  %v5650_v42 = vld [vmem:[%s7976_s1 + $0x270] sm:$0xff] }
  0x22   :  { %2013 = vmatpush.bf16.msrb.mxu0 %v5611_v40  ;;  %1983 = vmatmul.bf16.vlgmr.msra.gmra.mxu2 %v3925_v43  ;;  %v5667_v35 = vld [vmem:[%s7976_s1 + $0x2f8] sm:$0xff]  ;;  %v3937_v38 = vor.u32 %v5524_v30, %v3934_v31  ;;  %v5642_v40 = vld [vmem:[%s7976_s1 + $0x230] sm:$0xff]  ;;  %v3953_v30 = vor.u32 %v5526_v22, %v3950_v25 }
  0x23   :  { %2051 = vmatpush.bf16.msrb.mxu2 %v5627_v41  ;;  %1964 = vmatmul.bf16.vlgmr.msra.gmra.mxu1 %v3921_v44  ;;  %v5658_v41 = vld [vmem:[%s7976_s1 + $0x2b0] sm:$0xff]  ;;  %v5641_v44 = vld [vmem:[%s7976_s1 + $0x228] sm:$0xff]  ;;  %v5647_v62 = vld [vmem:[%s7976_s1 + $0x258] sm:$0xff] }
  0x24   :  { %2002 = vmatmul.bf16.vlgmr.msra.gmra.mxu3 %v3929_v45  ;;  %2032 = vmatpush.bf16.msrb.mxu1 %v5619_v46  ;;  %v5666_v43 = vld [vmem:[%s7976_s1 + $0x2f0] sm:$0xff]  ;;  %v5657_v45 = vld [vmem:[%s7976_s1 + $0x2a8] sm:$0xff]  ;;  %v5663_v63 = vld [vmem:[%s7976_s1 + $0x2d8] sm:$0xff] }
  0x25   :  { %2070 = vmatpush.bf16.msrb.mxu3 %v5635_v47  ;;  %v5649_v46 = vld [vmem:[%s7976_s1 + $0x268] sm:$0xff]  ;;  %v5690_v33 = vld [vmem:[%s7976_s1 + $0x3b0] sm:$0xff] }
  0x26   :  { %2014 = vmatpush.bf16.msrb.mxu0 %v5610_v48  ;;  %v5665_v47 = vld [vmem:[%s7976_s1 + $0x2e8] sm:$0xff]  ;;  %v5640_v48 = vld [vmem:[%s7976_s1 + $0x220] sm:$0xff]  ;;  %v5670_v60 = vld [vmem:[%s7976_s1 + $0x310] sm:$0xff] }
  0x27   :  { %2052 = vmatpush.bf16.msrb.mxu2 %v5626_v49  ;;  %v5656_v49 = vld [vmem:[%s7976_s1 + $0x2a0] sm:$0xff]  ;;  %v5686_v61 = vld [vmem:[%s7976_s1 + $0x390] sm:$0xff] }
  0x28   :  { %2033 = vmatpush.bf16.msrb.mxu1 %v5618_v50  ;;  %v5648_v50 = vld [vmem:[%s7976_s1 + $0x260] sm:$0xff]  ;;  %v5722_v25 = vld [vmem:[%s7976_s1 + $0x4b0] sm:$0xff] }
  0x29   :  { %2071 = vmatpush.bf16.msrb.mxu3 %v5634_v51  ;;  %v5664_v51 = vld [vmem:[%s7976_s1 + $0x2e0] sm:$0xff] }
  0x2a   :  { %2015 = vmatpush.bf16.msrb.mxu0 %v5609_v52  ;;  %v4032_v52 = vld [vmem:[%s7977_s0 + $0xd8] sm:$0xf] }
  0x2b   :  { %2053 = vmatpush.bf16.msrb.mxu2 %v5625_v53  ;;  %v5561_v53 = vld [vmem:[%s7977_s0 + $0x138] sm:$0xf0] }
  0x2c   :  { %2034 = vmatpush.bf16.msrb.mxu1 %v5617_v54  ;;  %v4040_v54 = vld [vmem:[%s7977_s0 + $0xe0] sm:$0xf]  ;;  %v4033_v0 = vor.u32 %v5561_v53, %v4032_v52  ;;  %v5552_v52 = vld [vmem:[%s7977_s0 + $0xf4] sm:$0xf]  ;;  %v4058_v53 = vld [vmem:[%s7977_s0 + $0x154] sm:$0xf0] }
  0x2d   :  { %2072 = vmatpush.bf16.msrb.mxu3 %v5633_v55  ;;  %v5562_v55 = vld [vmem:[%s7977_s0 + $0x140] sm:$0xf0] }
  0x2e   :  { %2016 = vmatpush.bf16.msrb.mxu0 %v5608_v56  ;;  %v5639_v56 = vld [vmem:[%s7976_s1 + $0x218] sm:$0xff]  ;;  %v4041_v1 = vor.u32 %v5562_v55, %v4040_v54 }
  0x2f   :  { %2054 = vmatpush.bf16.msrb.mxu2 %v5624_v57  ;;  %v5655_v57 = vld [vmem:[%s7976_s1 + $0x298] sm:$0xff] }
  0x30   :  { %2035 = vmatpush.bf16.msrb.mxu1 %v5616_v58  ;;  %v5549_v58 = vld [vmem:[%s7977_s0 + $0xdc] sm:$0xf] }
  0x31   :  { %2073 = vmatpush.bf16.msrb.mxu3 %v5632_v59  ;;  %1950 = vmatmul.bf16.gmra.mxu0 %v4017_v6  ;;  %v4034_v59 = vld [vmem:[%s7977_s0 + $0x13c] sm:$0xf0]  ;;  %v5646_v6 = vld [vmem:[%s7976_s1 + $0x250] sm:$0xff]  ;;  %v5679_v54 = vld [vmem:[%s7976_s1 + $0x358] sm:$0xff] }
  0x32   :  { %2017 = vmatpush.bf16.msrb.mxu0 %v5607_v4  ;;  %1988 = vmatmul.bf16.gmra.mxu2 %v4025_v7  ;;  %v4037_v2 = vor.u32 %v5549_v58, %v4034_v59  ;;  %v5638_v4 = vld [vmem:[%s7976_s1 + $0x210] sm:$0xff]  ;;  %v5695_v55 = vld [vmem:[%s7976_s1 + $0x3d8] sm:$0xff]  ;;  %v4061_v59 = vor.u32 %v5552_v52, %v4058_v53 }
  0x33   :  { %2055 = vmatpush.bf16.msrb.mxu2 %v5623_v5  ;;  %1969 = vmatmul.bf16.gmra.mxu1 %v4021_v8  ;;  %v5654_v5 = vld [vmem:[%s7976_s1 + $0x290] sm:$0xff]  ;;  %v5637_v8 = vld [vmem:[%s7976_s1 + $0x208] sm:$0xff] }
  0x34   :  { %2007 = vmatmul.bf16.gmra.mxu3 %v4029_v9  ;;  %2036 = vmatpush.bf16.msrb.mxu1 %v5615_v10  ;;  %v5662_v7 = vld [vmem:[%s7976_s1 + $0x2d0] sm:$0xff]  ;;  %v5653_v9 = vld [vmem:[%s7976_s1 + $0x288] sm:$0xff] }
  0x35   :  { %2074 = vmatpush.bf16.msrb.mxu3 %v5631_v11  ;;  %v5645_v10 = vld [vmem:[%s7976_s1 + $0x248] sm:$0xff]  ;;  %v5702_v52 = vld [vmem:[%s7976_s1 + $0x410] sm:$0xff] }
  0x36   :  { %2018 = vmatpush.bf16.msrb.mxu0 %v5606_v12  ;;  %v5661_v11 = vld [vmem:[%s7976_s1 + $0x2c8] sm:$0xff]  ;;  %v5636_v12 = vld [vmem:[%s7976_s1 + $0x200] sm:$0xff]  ;;  %v5718_v53 = vld [vmem:[%s7976_s1 + $0x490] sm:$0xff] }
  0x37   :  { %2056 = vmatpush.bf16.msrb.mxu2 %v5622_v13  ;;  %v5652_v13 = vld [vmem:[%s7976_s1 + $0x280] sm:$0xff] }
  0x38   :  { %2037 = vmatpush.bf16.msrb.mxu1 %v5614_v14  ;;  %v5644_v14 = vld [vmem:[%s7976_s1 + $0x240] sm:$0xff] }
  0x39   :  { %2075 = vmatpush.bf16.msrb.mxu3 %v5630_v15  ;;  %v5660_v15 = vld [vmem:[%s7976_s1 + $0x2c0] sm:$0xff] }
  0x3a   :  { %2019 = vmatpush.bf16.msrb.mxu0 %v5605_v16  ;;  %v3948_v16 = vld [vmem:[%s7977_s0 + $0x20] sm:$0xf] }
  0x3b   :  { %2057 = vmatpush.bf16.msrb.mxu2 %v5621_v17  ;;  %v5538_v17 = vld [vmem:[%s7977_s0 + $0x80] sm:$0xf0] }
  0x3c   :  { %2038 = vmatpush.bf16.msrb.mxu1 %v5613_v18  ;;  %v3956_v18 = vld [vmem:[%s7977_s0 + $0x28] sm:$0xf]  ;;  %v3949_v28 = vor.u32 %v5538_v17, %v3948_v16  ;;  %v5731_v16 = vld [vmem:[%s7976_s1 + $0x4f8] sm:$0xff] }
  0x3d   :  { %2076 = vmatpush.bf16.msrb.mxu3 %v5629_v19  ;;  %v5539_v19 = vld [vmem:[%s7977_s0 + $0x88] sm:$0xf0]  ;;  %v3966_v17 = vld [vmem:[%s7977_s0 + $0x94] sm:$0xf0] }
  0x3e   :  { %2020 = vmatpush.bf16.msrb.mxu0 %v5604_v20  ;;  %v5675_v20 = vld [vmem:[%s7976_s1 + $0x338] sm:$0xff]  ;;  %v3957_v29 = vor.u32 %v5539_v19, %v3956_v18  ;;  %v3974_v19 = vld [vmem:[%s7977_s0 + $0x9c] sm:$0xf0] }
  0x3f   :  { %2058 = vmatpush.bf16.msrb.mxu2 %v5620_v21  ;;  %v5691_v21 = vld [vmem:[%s7976_s1 + $0x3b8] sm:$0xff] }
  0x40   :  { %2039 = vmatpush.bf16.msrb.mxu1 %v5612_v23  ;;  %v5683_v23 = vld [vmem:[%s7976_s1 + $0x378] sm:$0xff] }
  0x41   :  { %2077 = vmatpush.bf16.msrb.mxu3 %v5628_v24  ;;  %2021 = vmatmul.bf16.vlgmr.msrb.gmra.mxu0 %v3933_v36  ;;  %v5699_v24 = vld [vmem:[%s7976_s1 + $0x3f8] sm:$0xff]  ;;  %v5673_v36 = vld [vmem:[%s7976_s1 + $0x328] sm:$0xff] }
  0x42   :  { %2089 = vmatpush.bf16.msra.mxu0 %v5643_v26  ;;  %2059 = vmatmul.bf16.vlgmr.msrb.gmra.mxu2 %v3941_v37  ;;  %v5527_v26 = vld [vmem:[%s7977_s0 + $0x2c] sm:$0xf]  ;;  %v5529_v18 = vld [vmem:[%s7977_s0 + $0x3c] sm:$0xf] }
  0x43   :  { %2127 = vmatpush.bf16.msra.mxu2 %v5659_v27  ;;  %2040 = vmatmul.bf16.vlgmr.msrb.gmra.mxu1 %v3937_v38  ;;  %v3958_v27 = vld [vmem:[%s7977_s0 + $0x8c] sm:$0xf0]  ;;  %v5689_v37 = vld [vmem:[%s7976_s1 + $0x3a8] sm:$0xff] }
  0x44   :  { %2108 = vmatpush.bf16.msra.mxu1 %v5651_v34  ;;  %2078 = vmatmul.bf16.vlgmr.msrb.gmra.mxu3 %v3945_v39  ;;  %v3961_v31 = vor.u32 %v5527_v26, %v3958_v27  ;;  %v5682_v34 = vld [vmem:[%s7976_s1 + $0x370] sm:$0xff]  ;;  %v5681_v38 = vld [vmem:[%s7976_s1 + $0x368] sm:$0xff] }
  0x45   :  { %2146 = vmatpush.bf16.msra.mxu3 %v5667_v35  ;;  %v5698_v35 = vld [vmem:[%s7976_s1 + $0x3f0] sm:$0xff]  ;;  %v5697_v39 = vld [vmem:[%s7976_s1 + $0x3e8] sm:$0xff] }
  0x46   :  { %2090 = vmatpush.bf16.msra.mxu0 %v5642_v40  ;;  %v5672_v40 = vld [vmem:[%s7976_s1 + $0x320] sm:$0xff]  ;;  %v5714_v26 = vld [vmem:[%s7976_s1 + $0x470] sm:$0xff] }
  0x47   :  { %2128 = vmatpush.bf16.msra.mxu2 %v5658_v41  ;;  %v5688_v41 = vld [vmem:[%s7976_s1 + $0x3a0] sm:$0xff]  ;;  %v5730_v27 = vld [vmem:[%s7976_s1 + $0x4f0] sm:$0xff] }
  0x48   :  { %2109 = vmatpush.bf16.msra.mxu1 %v5650_v42  ;;  %v5680_v42 = vld [vmem:[%s7976_s1 + $0x360] sm:$0xff] }
  0x49   :  { %2147 = vmatpush.bf16.msra.mxu3 %v5666_v43  ;;  %v5696_v43 = vld [vmem:[%s7976_s1 + $0x3e0] sm:$0xff] }
  0x4a   :  { %2091 = vmatpush.bf16.msra.mxu0 %v5641_v44  ;;  %v4048_v44 = vld [vmem:[%s7977_s0 + $0xe8] sm:$0xf] }
  0x4b   :  { %2129 = vmatpush.bf16.msra.mxu2 %v5657_v45  ;;  %v5563_v45 = vld [vmem:[%s7977_s0 + $0x148] sm:$0xf0] }
  0x4c   :  { %2110 = vmatpush.bf16.msra.mxu1 %v5649_v46  ;;  %v4056_v46 = vld [vmem:[%s7977_s0 + $0xf0] sm:$0xf] }
  0x4d   :  { %2148 = vmatpush.bf16.msra.mxu3 %v5665_v47  ;;  %v5564_v47 = vld [vmem:[%s7977_s0 + $0x150] sm:$0xf0] }
  0x4e   :  { %2092 = vmatpush.bf16.msra.mxu0 %v5640_v48  ;;  %v5671_v48 = vld [vmem:[%s7976_s1 + $0x318] sm:$0xff] }
  0x4f   :  { %2130 = vmatpush.bf16.msra.mxu2 %v5656_v49  ;;  %v5687_v49 = vld [vmem:[%s7976_s1 + $0x398] sm:$0xff] }
  0x50   :  { %2111 = vmatpush.bf16.msra.mxu1 %v5648_v50  ;;  %v5551_v50 = vld [vmem:[%s7977_s0 + $0xec] sm:$0xf] }
  0x51   :  { %2149 = vmatpush.bf16.msra.mxu3 %v5664_v51  ;;  %2026 = vmatmul.bf16.gmra.mxu0 %v4033_v0  ;;  %v4050_v51 = vld [vmem:[%s7977_s0 + $0x14c] sm:$0xf0]  ;;  %v5669_v0 = vld [vmem:[%s7976_s1 + $0x308] sm:$0xff] }
  0x52   :  { %2093 = vmatpush.bf16.msra.mxu0 %v5639_v56  ;;  %2064 = vmatmul.bf16.gmra.mxu2 %v4041_v1  ;;  %v4049_v56 = vor.u32 %v5563_v45, %v4048_v44  ;;  %v4053_v58 = vor.u32 %v5551_v50, %v4050_v51  ;;  %v5685_v1 = vld [vmem:[%s7976_s1 + $0x388] sm:$0xff]  ;;  %v5554_v44 = vld [vmem:[%s7977_s0 + $0x104] sm:$0xf] }
  0x53   :  { %2131 = vmatpush.bf16.msra.mxu2 %v5655_v57  ;;  %2045 = vmatmul.bf16.gmra.mxu1 %v4037_v2  ;;  %v4057_v57 = vor.u32 %v5564_v47, %v4056_v46  ;;  %v5677_v2 = vld [vmem:[%s7976_s1 + $0x348] sm:$0xff]  ;;  %v5711_v46 = vld [vmem:[%s7976_s1 + $0x458] sm:$0xff] }
  0x54   :  { %2112 = vmatpush.bf16.msra.mxu1 %v5647_v62  ;;  %2083 = vmatmul.bf16.gmra.mxu3 %v4045_v3  ;;  %v5678_v62 = vld [vmem:[%s7976_s1 + $0x350] sm:$0xff]  ;;  %v5693_v3 = vld [vmem:[%s7976_s1 + $0x3c8] sm:$0xff]  ;;  %v5727_v47 = vld [vmem:[%s7976_s1 + $0x4d8] sm:$0xff] }
  0x55   :  { %2150 = vmatpush.bf16.msra.mxu3 %v5663_v63  ;;  %v5694_v63 = vld [vmem:[%s7976_s1 + $0x3d0] sm:$0xff]  ;;  %v4074_v45 = vld [vmem:[%s7977_s0 + $0x164] sm:$0xf0] }
  0x56   :  { %2094 = vmatpush.bf16.msra.mxu0 %v5638_v4  ;;  %v5668_v4 = vld [vmem:[%s7976_s1 + $0x300] sm:$0xff]  ;;  %v4077_v51 = vor.u32 %v5554_v44, %v4074_v45  ;;  %v5751_v44 = vld [vmem:[%s7976_s1 + $0x598] sm:$0xff]  ;;  %v5555_v45 = vld [vmem:[%s7977_s0 + $0x10c] sm:$0xf] }
  0x57   :  { %2132 = vmatpush.bf16.msra.mxu2 %v5654_v5  ;;  %v5684_v5 = vld [vmem:[%s7976_s1 + $0x380] sm:$0xff] }
  0x58   :  { %2113 = vmatpush.bf16.msra.mxu1 %v5646_v6  ;;  %v5676_v6 = vld [vmem:[%s7976_s1 + $0x340] sm:$0xff] }
  0x59   :  { %2151 = vmatpush.bf16.msra.mxu3 %v5662_v7  ;;  %v5692_v7 = vld [vmem:[%s7976_s1 + $0x3c0] sm:$0xff] }
  0x5a   :  { %2095 = vmatpush.bf16.msra.mxu0 %v5637_v8  ;;  %v3964_v8 = vld [vmem:[%s7977_s0 + $0x30] sm:$0xf] }
  0x5b   :  { %2133 = vmatpush.bf16.msra.mxu2 %v5653_v9  ;;  %v5540_v9 = vld [vmem:[%s7977_s0 + $0x90] sm:$0xf0] }
  0x5c   :  { %2114 = vmatpush.bf16.msra.mxu1 %v5645_v10  ;;  %v3972_v10 = vld [vmem:[%s7977_s0 + $0x38] sm:$0xf] }
  0x5d   :  { %2152 = vmatpush.bf16.msra.mxu3 %v5661_v11  ;;  %v5541_v11 = vld [vmem:[%s7977_s0 + $0x98] sm:$0xf0] }
  0x5e   :  { %2096 = vmatpush.bf16.msra.mxu0 %v5636_v12  ;;  %v5707_v12 = vld [vmem:[%s7976_s1 + $0x438] sm:$0xff] }
  0x5f   :  { %2134 = vmatpush.bf16.msra.mxu2 %v5652_v13  ;;  %v5723_v13 = vld [vmem:[%s7976_s1 + $0x4b8] sm:$0xff] }
  0x60   :  { %2115 = vmatpush.bf16.msra.mxu1 %v5644_v14  ;;  %v5528_v14 = vld [vmem:[%s7977_s0 + $0x34] sm:$0xf] }
  0x61   :  { %2153 = vmatpush.bf16.msra.mxu3 %v5660_v15  ;;  %2097 = vmatmul.bf16.vlgmr.msra.gmra.mxu0 %v3949_v28  ;;  %v5715_v15 = vld [vmem:[%s7976_s1 + $0x478] sm:$0xff]  ;;  %v3969_v22 = vor.u32 %v5528_v14, %v3966_v17  ;;  %v5705_v28 = vld [vmem:[%s7976_s1 + $0x428] sm:$0xff] }
  0x62   :  { %2165 = vmatpush.bf16.msrb.mxu0 %v5675_v20  ;;  %2135 = vmatmul.bf16.vlgmr.msra.gmra.mxu2 %v3957_v29  ;;  %v3965_v20 = vor.u32 %v5540_v9, %v3964_v8  ;;  %v5721_v29 = vld [vmem:[%s7976_s1 + $0x4a8] sm:$0xff]  ;;  %v5747_v8 = vld [vmem:[%s7976_s1 + $0x578] sm:$0xff] }
  0x63   :  { %2203 = vmatpush.bf16.msrb.mxu2 %v5691_v21  ;;  %2116 = vmatmul.bf16.vlgmr.msra.gmra.mxu1 %v3953_v30  ;;  %v3973_v21 = vor.u32 %v5541_v11, %v3972_v10  ;;  %v5713_v30 = vld [vmem:[%s7976_s1 + $0x468] sm:$0xff]  ;;  %v5763_v9 = vld [vmem:[%s7976_s1 + $0x5f8] sm:$0xff] }
  0x64   :  { %2184 = vmatpush.bf16.msrb.mxu1 %v5683_v23  ;;  %2154 = vmatmul.bf16.vlgmr.msra.gmra.mxu3 %v3961_v31  ;;  %v3977_v23 = vor.u32 %v5529_v18, %v3974_v19  ;;  %v5729_v31 = vld [vmem:[%s7976_s1 + $0x4e8] sm:$0xff] }
  0x65   :  { %2222 = vmatpush.bf16.msrb.mxu3 %v5699_v24  ;;  %v5706_v24 = vld [vmem:[%s7976_s1 + $0x430] sm:$0xff]  ;;  %v3982_v10 = vld [vmem:[%s7977_s0 + $0xa4] sm:$0xf0]  ;;  %v5531_v11 = vld [vmem:[%s7977_s0 + $0x4c] sm:$0xf] }
  0x66   :  { %2166 = vmatpush.bf16.msrb.mxu0 %v5674_v32  ;;  %v5704_v32 = vld [vmem:[%s7976_s1 + $0x420] sm:$0xff] }
  0x67   :  { %2204 = vmatpush.bf16.msrb.mxu2 %v5690_v33  ;;  %v5720_v33 = vld [vmem:[%s7976_s1 + $0x4a0] sm:$0xff] }
  0x68   :  { %2185 = vmatpush.bf16.msrb.mxu1 %v5682_v34  ;;  %v5712_v34 = vld [vmem:[%s7976_s1 + $0x460] sm:$0xff] }
  0x69   :  { %2223 = vmatpush.bf16.msrb.mxu3 %v5698_v35  ;;  %v5728_v35 = vld [vmem:[%s7976_s1 + $0x4e0] sm:$0xff] }
  0x6a   :  { %2167 = vmatpush.bf16.msrb.mxu0 %v5673_v36  ;;  %v4064_v36 = vld [vmem:[%s7977_s0 + $0xf8] sm:$0xf] }
  0x6b   :  { %2205 = vmatpush.bf16.msrb.mxu2 %v5689_v37  ;;  %v5565_v37 = vld [vmem:[%s7977_s0 + $0x158] sm:$0xf0] }
  0x6c   :  { %2186 = vmatpush.bf16.msrb.mxu1 %v5681_v38  ;;  %v4072_v38 = vld [vmem:[%s7977_s0 + $0x100] sm:$0xf] }
  0x6d   :  { %2224 = vmatpush.bf16.msrb.mxu3 %v5697_v39  ;;  %v5566_v39 = vld [vmem:[%s7977_s0 + $0x160] sm:$0xf0] }
  0x6e   :  { %2168 = vmatpush.bf16.msrb.mxu0 %v5672_v40  ;;  %v5703_v40 = vld [vmem:[%s7976_s1 + $0x418] sm:$0xff] }
  0x6f   :  { %2206 = vmatpush.bf16.msrb.mxu2 %v5688_v41  ;;  %v5719_v41 = vld [vmem:[%s7976_s1 + $0x498] sm:$0xff] }
  0x70   :  { %2187 = vmatpush.bf16.msrb.mxu1 %v5680_v42  ;;  %v5553_v42 = vld [vmem:[%s7977_s0 + $0xfc] sm:$0xf] }
  0x71   :  { %2225 = vmatpush.bf16.msrb.mxu3 %v5696_v43  ;;  %2102 = vmatmul.bf16.gmra.mxu0 %v4049_v56  ;;  %v4066_v43 = vld [vmem:[%s7977_s0 + $0x15c] sm:$0xf0]  ;;  %v5701_v56 = vld [vmem:[%s7976_s1 + $0x408] sm:$0xff] }
  0x72   :  { %2169 = vmatpush.bf16.msrb.mxu0 %v5671_v48  ;;  %2140 = vmatmul.bf16.gmra.mxu2 %v4057_v57  ;;  %v4065_v48 = vor.u32 %v5565_v37, %v4064_v36  ;;  %v4069_v50 = vor.u32 %v5553_v42, %v4066_v43  ;;  %v5717_v57 = vld [vmem:[%s7976_s1 + $0x488] sm:$0xff]  ;;  %v5752_v36 = vld [vmem:[%s7976_s1 + $0x5a0] sm:$0xff]  ;;  %v5568_v42 = vld [vmem:[%s7977_s0 + $0x170] sm:$0xf0] }
  0x73   :  { %2207 = vmatpush.bf16.msrb.mxu2 %v5687_v49  ;;  %2121 = vmatmul.bf16.gmra.mxu1 %v4053_v58  ;;  %v4073_v49 = vor.u32 %v5566_v39, %v4072_v38  ;;  %v5709_v58 = vld [vmem:[%s7976_s1 + $0x448] sm:$0xff]  ;;  %v5744_v37 = vld [vmem:[%s7976_s1 + $0x560] sm:$0xff]  ;;  %v5735_v43 = vld [vmem:[%s7976_s1 + $0x518] sm:$0xff] }
  0x74   :  { %2188 = vmatpush.bf16.msrb.mxu1 %v5679_v54  ;;  %2159 = vmatmul.bf16.gmra.mxu3 %v4061_v59  ;;  %v5710_v54 = vld [vmem:[%s7976_s1 + $0x450] sm:$0xff]  ;;  %v5725_v59 = vld [vmem:[%s7976_s1 + $0x4c8] sm:$0xff]  ;;  %v5760_v38 = vld [vmem:[%s7976_s1 + $0x5e0] sm:$0xff] }
  0x75   :  { %2226 = vmatpush.bf16.msrb.mxu3 %v5695_v55  ;;  %v5726_v55 = vld [vmem:[%s7976_s1 + $0x4d0] sm:$0xff]  ;;  %v4080_v39 = vld [vmem:[%s7977_s0 + $0x108] sm:$0xf] }
  0x76   :  { %2170 = vmatpush.bf16.msrb.mxu0 %v5670_v60  ;;  %v5700_v60 = vld [vmem:[%s7976_s1 + $0x400] sm:$0xff] }
  0x77   :  { %2208 = vmatpush.bf16.msrb.mxu2 %v5686_v61  ;;  %v5716_v61 = vld [vmem:[%s7976_s1 + $0x480] sm:$0xff] }
  0x78   :  { %2189 = vmatpush.bf16.msrb.mxu1 %v5678_v62  ;;  %v5708_v62 = vld [vmem:[%s7976_s1 + $0x440] sm:$0xff] }
  0x79   :  { %2227 = vmatpush.bf16.msrb.mxu3 %v5694_v63  ;;  %v5724_v63 = vld [vmem:[%s7976_s1 + $0x4c0] sm:$0xff] }
  0x7a   :  { %2171 = vmatpush.bf16.msrb.mxu0 %v5669_v0  ;;  %v3980_v0 = vld [vmem:[%s7977_s0 + $0x40] sm:$0xf] }
  0x7b   :  { %2209 = vmatpush.bf16.msrb.mxu2 %v5685_v1  ;;  %v5542_v1 = vld [vmem:[%s7977_s0 + $0xa0] sm:$0xf0] }
  0x7c   :  { %2190 = vmatpush.bf16.msrb.mxu1 %v5677_v2  ;;  %v3988_v2 = vld [vmem:[%s7977_s0 + $0x48] sm:$0xf] }
  0x7d   :  { %2228 = vmatpush.bf16.msrb.mxu3 %v5693_v3  ;;  %v6651_v3 = vld [vmem:[%s7978_s2] ss:$0 sm:$0xff] }
  0x7e   :  { %2172 = vmatpush.bf16.msrb.mxu0 %v5668_v4  ;;  %v5543_v4 = vld [vmem:[%s7977_s0 + $0xa8] sm:$0xf0] }
  0x7f   :  { %2210 = vmatpush.bf16.msrb.mxu2 %v5684_v5  ;;  %v5739_v5 = vld [vmem:[%s7976_s1 + $0x538] sm:$0xff]  ;;  %v3989_v14 = vor.u32 %v5543_v4, %v3988_v2  ;;  %v5749_v2 = vld [vmem:[%s7976_s1 + $0x588] sm:$0xff] }
  0x80   :  { %2191 = vmatpush.bf16.msrb.mxu1 %v5676_v6  ;;  %v5755_v6 = vld [vmem:[%s7976_s1 + $0x5b8] sm:$0xff] }
  0x81   :  { %2229 = vmatpush.bf16.msrb.mxu3 %v5692_v7  ;;  %2173 = vmatmul.bf16.vlgmr.msrb.gmra.mxu0 %v3965_v20  ;;  %v5530_v7 = vld [vmem:[%s7977_s0 + $0x44] sm:$0xf]  ;;  %v5738_v20 = vld [vmem:[%s7976_s1 + $0x530] sm:$0xff] }
  0x82   :  { %2241 = vmatpush.bf16.msra.mxu0 %v5707_v12  ;;  %2211 = vmatmul.bf16.vlgmr.msrb.gmra.mxu2 %v3973_v21  ;;  %v3990_v12 = vld [vmem:[%s7977_s0 + $0xac] sm:$0xf0] }
  0x83   :  { %2279 = vmatpush.bf16.msra.mxu2 %v5723_v13  ;;  %2192 = vmatmul.bf16.vlgmr.msrb.gmra.mxu1 %v3969_v22  ;;  %v3981_v13 = vor.u32 %v5542_v1, %v3980_v0  ;;  %v3993_v17 = vor.u32 %v5531_v11, %v3990_v12  ;;  %v5754_v21 = vld [vmem:[%s7976_s1 + $0x5b0] sm:$0xff]  ;;  %v5733_v1 = vld [vmem:[%s7976_s1 + $0x508] sm:$0xff]  ;;  %v5732_v12 = vld [vmem:[%s7976_s1 + $0x500] sm:$0xff] }
  0x84   :  { %2260 = vmatpush.bf16.msra.mxu1 %v5715_v15  ;;  %2230 = vmatmul.bf16.vlgmr.msrb.gmra.mxu3 %v3977_v23  ;;  %v5746_v22 = vld [vmem:[%s7976_s1 + $0x570] sm:$0xff] }
  0x85   :  { %2298 = vmatpush.bf16.msra.mxu3 %v5731_v16  ;;  %v3985_v16 = vor.u32 %v5530_v7, %v3982_v10  ;;  %v5762_v23 = vld [vmem:[%s7976_s1 + $0x5f0] sm:$0xff] }
  0x86   :  { %2242 = vmatpush.bf16.msra.mxu0 %v5706_v24 }
  0x87   :  { %2280 = vmatpush.bf16.msra.mxu2 %v5722_v25  ;;  %v5737_v25 = vld [vmem:[%s7976_s1 + $0x528] sm:$0xff] }
  0x88   :  { %2261 = vmatpush.bf16.msra.mxu1 %v5714_v26  ;;  %v5753_v26 = vld [vmem:[%s7976_s1 + $0x5a8] sm:$0xff] }
  0x89   :  { %2299 = vmatpush.bf16.msra.mxu3 %v5730_v27 }
  0x8a   :  { %2243 = vmatpush.bf16.msra.mxu0 %v5705_v28  ;;  %v5745_v28 = vld [vmem:[%s7976_s1 + $0x568] sm:$0xff] }
  0x8b   :  { %2281 = vmatpush.bf16.msra.mxu2 %v5721_v29  ;;  %v5761_v29 = vld [vmem:[%s7976_s1 + $0x5e8] sm:$0xff] }
  0x8c   :  { %2262 = vmatpush.bf16.msra.mxu1 %v5713_v30 }
  0x8d   :  { %2300 = vmatpush.bf16.msra.mxu3 %v5729_v31 }
  0x8e   :  { %2244 = vmatpush.bf16.msra.mxu0 %v5704_v32 }
  0x8f   :  { %2282 = vmatpush.bf16.msra.mxu2 %v5720_v33 }
  0x90   :  { %2263 = vmatpush.bf16.msra.mxu1 %v5712_v34 }
  0x91   :  { %2301 = vmatpush.bf16.msra.mxu3 %v5728_v35  ;;  %2178 = vmatmul.bf16.gmra.mxu0 %v4065_v48  ;;  %v5736_v35 = vld [vmem:[%s7976_s1 + $0x520] sm:$0xff]  ;;  %v4090_v48 = vld [vmem:[%s7977_s0 + $0x174] sm:$0xf0] }
  0x92   :  { %2245 = vmatpush.bf16.msra.mxu0 %v5703_v40  ;;  %2216 = vmatmul.bf16.gmra.mxu2 %v4073_v49  ;;  %v5567_v40 = vld [vmem:[%s7977_s0 + $0x168] sm:$0xf0] }
  0x93   :  { %2283 = vmatpush.bf16.msra.mxu2 %v5719_v41  ;;  %2197 = vmatmul.bf16.gmra.mxu1 %v4069_v50  ;;  %v4088_v41 = vld [vmem:[%s7977_s0 + $0x110] sm:$0xf]  ;;  %v5743_v50 = vld [vmem:[%s7976_s1 + $0x558] sm:$0xff] }
  0x94   :  { %2264 = vmatpush.bf16.msra.mxu1 %v5711_v46  ;;  %2235 = vmatmul.bf16.gmra.mxu3 %v4077_v51  ;;  %v4082_v46 = vld [vmem:[%s7977_s0 + $0x16c] sm:$0xf0]  ;;  %v5759_v51 = vld [vmem:[%s7976_s1 + $0x5d8] sm:$0xff] }
  0x95   :  { %2302 = vmatpush.bf16.msra.mxu3 %v5727_v47  ;;  %v5556_v47 = vld [vmem:[%s7977_s0 + $0x114] sm:$0xf] }
  0x96   :  { %2246 = vmatpush.bf16.msra.mxu0 %v5702_v52 }
  0x97   :  { %2284 = vmatpush.bf16.msra.mxu2 %v5718_v53  ;;  %v4081_v53 = vor.u32 %v5567_v40, %v4080_v39  ;;  %v5769_v39 = vld [vmem:[%s7976_s1 + $0x628] sm:$0xff] }
  0x98   :  { %2265 = vmatpush.bf16.msra.mxu1 %v5710_v54  ;;  %v4089_v54 = vor.u32 %v5568_v42, %v4088_v41 }
  0x99   :  { %2303 = vmatpush.bf16.msra.mxu3 %v5726_v55 }
  0x9a   :  { %2247 = vmatpush.bf16.msra.mxu0 %v5701_v56  ;;  %v4085_v56 = vor.u32 %v5555_v45, %v4082_v46  ;;  %v5768_v45 = vld [vmem:[%s7976_s1 + $0x620] sm:$0xff]  ;;  %v4096_v46 = vld [vmem:[%s7977_s0 + $0x118] sm:$0xf] }
  0x9b   :  { %2285 = vmatpush.bf16.msra.mxu2 %v5717_v57  ;;  %v4093_v57 = vor.u32 %v5556_v47, %v4090_v48  ;;  %v5569_v47 = vld [vmem:[%s7977_s0 + $0x178] sm:$0xf0]  ;;  %v4104_v48 = vld [vmem:[%s7977_s0 + $0x120] sm:$0xf] }
  0x9c   :  { %2266 = vmatpush.bf16.msra.mxu1 %v5709_v58 }
  0x9d   :  { %2304 = vmatpush.bf16.msra.mxu3 %v5725_v59 }
  0x9e   :  { %2248 = vmatpush.bf16.msra.mxu0 %v5700_v60  ;;  %v1946_v15 = vpop.f32.mrf.mxu0  ;;  %v5734_v60 = vld [vmem:[%s7976_s1 + $0x510] sm:$0xff] }
  0x9f   :  { %2286 = vmatpush.bf16.msra.mxu2 %v5716_v61  ;;  %v1947_v18 = vadd.f32 %v6651_v3, %v1946_v15  ;;  %v5750_v61 = vld [vmem:[%s7976_s1 + $0x590] sm:$0xff]  ;;  %v5756_v15 = vld [vmem:[%s7976_s1 + $0x5c0] sm:$0xff] }
  0xa0   :  { %2267 = vmatpush.bf16.msra.mxu1 %v5708_v62  ;;  %v1965_v19 = vpop.f32.mrf.mxu1  ;;  %v5742_v62 = vld [vmem:[%s7976_s1 + $0x550] sm:$0xff] }
  0xa1   :  { %2305 = vmatpush.bf16.msra.mxu3 %v5724_v63  ;;  %v1966_v24 = vadd.f32 %v1965_v19, %v1947_v18  ;;  %2249 = vmatmul.bf16.vlgmr.msra.gmra.mxu0 %v3981_v13  ;;  %v5758_v63 = vld [vmem:[%s7976_s1 + $0x5d0] sm:$0xff]  ;;  %v5748_v13 = vld [vmem:[%s7976_s1 + $0x580] sm:$0xff]  ;;  %v5771_v18 = vld [vmem:[%s7976_s1 + $0x638] sm:$0xff] }
  0xa2   :  { %2317 = vmatpush.bf16.msrb.mxu0 %v5739_v5  ;;  %2287 = vmatmul.bf16.vlgmr.msra.gmra.mxu2 %v3989_v14  ;;  %v5741_v5 = vld [vmem:[%s7976_s1 + $0x548] sm:$0xff]  ;;  %v5740_v14 = vld [vmem:[%s7976_s1 + $0x540] sm:$0xff]  ;;  %v4004_v19 = vld [vmem:[%s7977_s0 + $0x58] sm:$0xf] }
  0xa3   :  { %2355 = vmatpush.bf16.msrb.mxu2 %v5755_v6  ;;  %2268 = vmatmul.bf16.vlgmr.msra.gmra.mxu1 %v3985_v16  ;;  %v5757_v6 = vld [vmem:[%s7976_s1 + $0x5c8] sm:$0xff]  ;;  %v3996_v16 = vld [vmem:[%s7977_s0 + $0x50] sm:$0xf] }
  0xa4   :  { %2336 = vmatpush.bf16.msrb.mxu1 %v5747_v8  ;;  %2306 = vmatmul.bf16.vlgmr.msra.gmra.mxu3 %v3993_v17  ;;  %v5544_v17 = vld [vmem:[%s7977_s0 + $0xb0] sm:$0xf0] }
  0xa5   :  { %2374 = vmatpush.bf16.msrb.mxu3 %v5763_v9  ;;  %v1984_v27 = vpop.f32.mrf.mxu2 }
  0xa6   :  { %2318 = vmatpush.bf16.msrb.mxu0 %v5738_v20  ;;  %v1985_v30 = vadd.f32 %v1984_v27, %v1966_v24  ;;  %v6705_v32 = vpop.f32.mrf.mxu0  ;;  %v5545_v20 = vld [vmem:[%s7977_s0 + $0xb8] sm:$0xf0]  ;;  %v4006_v24 = vld [vmem:[%s7977_s0 + $0xbc] sm:$0xf0]  ;;  %v3997_v27 = vor.u32 %v5544_v17, %v3996_v16  ;;  %v5546_v16 = vld [vmem:[%s7977_s0 + $0xc0] sm:$0xf0] }
  0xa7   :  { %2356 = vmatpush.bf16.msrb.mxu2 %v5754_v21  ;;  %v2003_v31 = vpop.f32.mrf.mxu3  ;;  %v5532_v21 = vld [vmem:[%s7977_s0 + $0x54] sm:$0xf] }
  0xa8   :  { %2337 = vmatpush.bf16.msrb.mxu1 %v5746_v22  ;;  %v6707_v33 = vadd.f32 %v2003_v31, %v1985_v30  ;;  %v6709_v34 = vpop.f32.mrf.mxu1  ;;  %v3998_v22 = vld [vmem:[%s7977_s0 + $0xb4] sm:$0xf0] }
  0xa9   :  { %2375 = vmatpush.bf16.msrb.mxu3 %v5762_v23  ;;  %v5533_v23 = vld [vmem:[%s7977_s0 + $0x5c] sm:$0xf]  ;;  %v4001_v30 = vor.u32 %v5532_v21, %v3998_v22 }
  0xaa   :  { %2319 = vmatpush.bf16.msrb.mxu0 %v5737_v25  ;;  %v4009_v31 = vor.u32 %v5533_v23, %v4006_v24 }
  0xab   :  { %2357 = vmatpush.bf16.msrb.mxu2 %v5753_v26 }
  0xac   :  { %2338 = vmatpush.bf16.msrb.mxu1 %v5745_v28  ;;  %v4005_v28 = vor.u32 %v5545_v20, %v4004_v19 }
  0xad   :  { %2376 = vmatpush.bf16.msrb.mxu3 %v5761_v29  ;;  %v6753_v49 = vpop.f32.mrf.mxu2 }
  0xae   :  { %2320 = vmatpush.bf16.msrb.mxu0 %v5736_v35  ;;  %v1951_v55 = vpop.f32.mrf.mxu0 }
  0xaf   :  { %2358 = vmatpush.bf16.msrb.mxu2 %v5752_v36  ;;  %v6761_v52 = vpop.f32.mrf.mxu3  ;;  %v1952_v58 = vadd.f32 %v6651_v3, %v1951_v55  ;;  %v5558_v55 = vld [vmem:[%s7977_s0 + $0x124] sm:$0xf] }
  0xb0   :  { %2339 = vmatpush.bf16.msrb.mxu1 %v5744_v37  ;;  %v1970_v59 = vpop.f32.mrf.mxu1  ;;  %v5770_v37 = vld [vmem:[%s7976_s1 + $0x630] sm:$0xff] }
  0xb1   :  { %2377 = vmatpush.bf16.msrb.mxu3 %v5760_v38  ;;  %v1971_v0 = vadd.f32 %v1970_v59, %v1952_v58  ;;  %2254 = vmatmul.bf16.gmra.mxu0 %v4081_v53  ;;  %v5557_v53 = vld [vmem:[%s7977_s0 + $0x11c] sm:$0xf]  ;;  %v4097_v59 = vor.u32 %v5569_v47, %v4096_v46 }
  0xb2   :  { %2321 = vmatpush.bf16.msrb.mxu0 %v5735_v43  ;;  %2292 = vmatmul.bf16.gmra.mxu2 %v4089_v54  ;;  %v4098_v54 = vld [vmem:[%s7977_s0 + $0x17c] sm:$0xf0] }
  0xb3   :  { %2359 = vmatpush.bf16.msrb.mxu2 %v5751_v44  ;;  %2273 = vmatmul.bf16.gmra.mxu1 %v4085_v56  ;;  %v4106_v56 = vld [vmem:[%s7977_s0 + $0x184] sm:$0xf0] }
  0xb4   :  { %2340 = vmatpush.bf16.msrb.mxu1 %v5743_v50  ;;  %2311 = vmatmul.bf16.gmra.mxu3 %v4093_v57  ;;  %v5570_v50 = vld [vmem:[%s7977_s0 + $0x180] sm:$0xf0] }
  0xb5   :  { %2378 = vmatpush.bf16.msrb.mxu3 %v5759_v51  ;;  %v1989_v4 = vpop.f32.mrf.mxu2  ;;  %v5767_v51 = vld [vmem:[%s7976_s1 + $0x618] sm:$0xff] }
  0xb6   :  { %2322 = vmatpush.bf16.msrb.mxu0 %v5734_v60  ;;  %v1990_v7 = vadd.f32 %v1989_v4, %v1971_v0  ;;  %v6788_v9 = vpop.f32.mrf.mxu0  ;;  %v4105_v60 = vor.u32 %v5570_v50, %v4104_v48 }
  0xb7   :  { %2360 = vmatpush.bf16.msrb.mxu2 %v5750_v61  ;;  %v2008_v8 = vpop.f32.mrf.mxu3 }
  0xb8   :  { %2341 = vmatpush.bf16.msrb.mxu1 %v5742_v62  ;;  %v6790_v10 = vadd.f32 %v2008_v8, %v1990_v7  ;;  %v6792_v11 = vpop.f32.mrf.mxu1  ;;  %v4101_v62 = vor.u32 %v5557_v53, %v4098_v54 }
  0xb9   :  { %2379 = vmatpush.bf16.msrb.mxu3 %v5758_v63  ;;  %v4109_v63 = vor.u32 %v5558_v55, %v4106_v56 }
  0xba   :  { %2323 = vmatpush.bf16.msrb.mxu0 %v5733_v1 }
  0xbb   :  { %2361 = vmatpush.bf16.msrb.mxu2 %v5749_v2  ;;  %v5766_v2 = vld [vmem:[%s7976_s1 + $0x610] sm:$0xff] }
  0xbc   :  { %2342 = vmatpush.bf16.msrb.mxu1 %v5741_v5  ;;  %v5765_v5 = vld [vmem:[%s7976_s1 + $0x608] sm:$0xff] }
  0xbd   :  { %2380 = vmatpush.bf16.msrb.mxu3 %v5757_v6  ;;  %v6833_v25 = vpop.f32.mrf.mxu2 }
  0xbe   :  { %2324 = vmatpush.bf16.msrb.mxu0 %v5732_v12  ;;  %v2022_v29 = vpop.f32.mrf.mxu0 }
  0xbf   :  { %2362 = vmatpush.bf16.msrb.mxu2 %v5748_v13  ;;  %v6835_v26 = vpop.f32.mrf.mxu3  ;;  %v2023_v35 = vadd.f32 %v2022_v29, %v6707_v33 }
  0xc0   :  { %2343 = vmatpush.bf16.msrb.mxu1 %v5740_v14  ;;  %v2041_v36 = vpop.f32.mrf.mxu1  ;;  %v5764_v14 = vld [vmem:[%s7976_s1 + $0x600] sm:$0xff] }
  0xc1   :  { %2381 = vmatpush.bf16.msrb.mxu3 %v5756_v15  ;;  %v2042_v38 = vadd.f32 %v2041_v36, %v2023_v35  ;;  %2325 = vmatmul.bf16.vlgmr.msrb.gmra.mxu0 %v3997_v27  ;;  %v4012_v15 = vld [vmem:[%s7977_s0 + $0x60] sm:$0xf]  ;;  %v4112_v35 = vld [vmem:[%s7977_s0 + $0x128] sm:$0xf]  ;;  %v5571_v36 = vld [vmem:[%s7977_s0 + $0x188] sm:$0xf0] }
  0xc2   :  { %2393 = vmatpush.bf16.msra.mxu0 %v5771_v18  ;;  %2363 = vmatmul.bf16.vlgmr.msrb.gmra.mxu2 %v4005_v28  ;;  %v4013_v19 = vor.u32 %v5546_v16, %v4012_v15  ;;  %v1949_v16 = vadd.f32 %v6651_v3, %v6705_v32  ;;  %v4940_v32 = vld [vmem:[%s7979_s3 + $0x70] sm:$0xf] }
  0xc3   :  { %2344 = vmatmul.bf16.vlgmr.msrb.gmra.mxu1 %v4001_v30 }
  0xc4   :  { %2382 = vmatmul.bf16.vlgmr.msrb.gmra.mxu3 %v4009_v31 }
  0xc5   :  { %v2060_v40 = vpop.f32.mrf.mxu2 }
  0xc6   :  { %2394 = vmatpush.bf16.msra.mxu0 %v5770_v37  ;;  %v2061_v41 = vadd.f32 %v2060_v40, %v2042_v38  ;;  %v6844_v43 = vpop.f32.mrf.mxu0 }
  0xc7   :  { %v2079_v42 = vpop.f32.mrf.mxu3 }
  0xc8   :  { %v2080_v33 = vadd.f32 %v2079_v42, %v2061_v41  ;;  %v6846_v44 = vpop.f32.mrf.mxu1 }
  0xca   :  { %2395 = vmatpush.bf16.msra.mxu0 %v5769_v39  ;;  %v4113_v39 = vor.u32 %v5571_v36, %v4112_v35 }
  0xcd   :  { %v6878_v57 = vpop.f32.mrf.mxu2 }
  0xce   :  { %2396 = vmatpush.bf16.msra.mxu0 %v5768_v45  ;;  %v2027_v61 = vpop.f32.mrf.mxu0 }
  0xcf   :  { %v6880_v58 = vpop.f32.mrf.mxu3  ;;  %v2028_v0 = vadd.f32 %v2027_v61, %v6790_v10 }
  0xd0   :  { %v2046_v1 = vpop.f32.mrf.mxu1 }
  0xd1   :  { %v2047_v4 = vadd.f32 %v2046_v1, %v2028_v0  ;;  %2330 = vmatmul.bf16.gmra.mxu0 %v4097_v59 }
  0xd2   :  { %2397 = vmatpush.bf16.msra.mxu0 %v5767_v51  ;;  %2368 = vmatmul.bf16.gmra.mxu2 %v4105_v60 }
  0xd3   :  { %2349 = vmatmul.bf16.gmra.mxu1 %v4101_v62 }
  0xd4   :  { %2387 = vmatmul.bf16.gmra.mxu3 %v4109_v63 }
  0xd5   :  { %v2065_v6 = vpop.f32.mrf.mxu2 }
  0xd6   :  { %2398 = vmatpush.bf16.msra.mxu0 %v5766_v2  ;;  %v2066_v7 = vadd.f32 %v2065_v6, %v2047_v4  ;;  %v6889_v10 = vpop.f32.mrf.mxu0 }
  0xd7   :  { %v2084_v8 = vpop.f32.mrf.mxu3 }
  0xd8   :  { %v2085_v12 = vadd.f32 %v2084_v8, %v2066_v7  ;;  %v6891_v13 = vpop.f32.mrf.mxu1 }
  0xda   :  { %2399 = vmatpush.bf16.msra.mxu0 %v5765_v5 }
  0xdd   :  { %v6902_v17 = vpop.f32.mrf.mxu2 }
  0xde   :  { %2400 = vmatpush.bf16.msra.mxu0 %v5764_v14  ;;  %v2098_v20 = vpop.f32.mrf.mxu0 }
  0xdf   :  { %v6904_v18 = vpop.f32.mrf.mxu3  ;;  %v2099_v21 = vadd.f32 %v2098_v20, %v2080_v33  ;;  %v1968_v20 = vadd.f32 %v6709_v34, %v1949_v16  ;;  %v5787_v34 = vld [vmem:[%s7979_s3 + $0x74] sm:$0xf0] }
  0xe0   :  { %v2117_v22 = vpop.f32.mrf.mxu1  ;;  %v4941_v36 = vor.u32 %v5787_v34, %v4940_v32  ;;  %v5803_v32 = vld [vmem:[%s7979_s3 + $0xf4] sm:$0xf0] }
  0xe1   :  { %v2118_v23 = vadd.f32 %v2117_v22, %v2099_v21  ;;  %2401 = vmatmul.bf16.vlgmr.msra.gmra.mxu0 %v4013_v19  ;;  %v1987_v21 = vadd.f32 %v6753_v49, %v1968_v20  ;;  %v1954_v49 = vadd.f32 %v6651_v3, %v6788_v9  ;;  %v5784_v20 = vld [vmem:[%s7979_s3 + $0x64] sm:$0xf] }
  0xe2   :  { %2488 = vmatpush.bf16.msra.mxu1 %v4941_v36 }
  0xe3   :  { %v1973_v3 = vadd.f32 %v6792_v11, %v1954_v49  ;;  %v4974_v11 = vld [vmem:[%s7979_s3 + $0x30] sm:$0xf] }
  0xe5   :  { %v2136_v24 = vpop.f32.mrf.mxu2 }
  0xe6   :  { %v2137_v27 = vadd.f32 %v2136_v24, %v2118_v23  ;;  %v6906_v29 = vpop.f32.mrf.mxu0 }
  0xe7   :  { %v2155_v28 = vpop.f32.mrf.mxu3 }
  0xe8   :  { %v2156_v30 = vadd.f32 %v2155_v28, %v2137_v27  ;;  %v6908_v31 = vpop.f32.mrf.mxu1  ;;  %v2006_v27 = vadd.f32 %v6761_v52, %v1987_v21  ;;  %v4934_v21 = vld [vmem:[%s7979_s3 + $0x68] sm:$0xf0] }
  0xea   :  { %v2025_v28 = vadd.f32 %v6844_v43, %v2006_v27 }
  0xec   :  { %v2044_v52 = vadd.f32 %v6846_v44, %v2025_v28  ;;  %v1992_v44 = vadd.f32 %v6833_v25, %v1973_v3  ;;  %v4937_v28 = vor.u32 %v5784_v20, %v4934_v21 }
  0xed   :  { %v6916_v37 = vpop.f32.mrf.mxu2 }
  0xee   :  { %v2103_v40 = vpop.f32.mrf.mxu0  ;;  %v2063_v43 = vadd.f32 %v6878_v57, %v2044_v52  ;;  %v4932_v57 = vld [vmem:[%s7979_s3 + $0x60] sm:$0xf] }
  0xef   :  { %v6918_v38 = vpop.f32.mrf.mxu3  ;;  %v2104_v41 = vadd.f32 %v2103_v40, %v2085_v12  ;;  %v5786_v40 = vld [vmem:[%s7979_s3 + $0x74] sm:$0xf]  ;;  %v4966_v52 = vld [vmem:[%s7979_s3 + $0x20] sm:$0xf] }
  0xf0   :  { %v2122_v42 = vpop.f32.mrf.mxu1 }
  0xf1   :  { %v2123_v33 = vadd.f32 %v2122_v42, %v2104_v41  ;;  %2406 = vmatmul.bf16.gmra.mxu0 %v4113_v39  ;;  %v4942_v41 = vld [vmem:[%s7979_s3 + $0x78] sm:$0xf0] }
  0xf2   :  { %v4945_v42 = vor.u32 %v5786_v40, %v4942_v41 }
  0xf4   :  { %2501 = vmatpush.bf16.msra.mxu2 %v4945_v42 }
  0xf5   :  { %v2141_v45 = vpop.f32.mrf.mxu2 }
  0xf6   :  { %v2142_v46 = vadd.f32 %v2141_v45, %v2123_v33  ;;  %v6920_v48 = vpop.f32.mrf.mxu0  ;;  %v2082_v33 = vadd.f32 %v6880_v58, %v2063_v43  ;;  %v5785_v45 = vld [vmem:[%s7979_s3 + $0x64] sm:$0xf0]  ;;  %v5779_v58 = vld [vmem:[%s7979_s3 + $0x34] sm:$0xf0] }
  0xf7   :  { %v2160_v47 = vpop.f32.mrf.mxu3  ;;  %v4933_v25 = vor.u32 %v5785_v45, %v4932_v57 }
  0xf8   :  { %v2161_v50 = vadd.f32 %v2160_v47, %v2142_v46  ;;  %v6922_v51 = vpop.f32.mrf.mxu1  ;;  %2502 = vmatpush.bf16.msra.mxu2 %v4937_v28  ;;  %v5799_v28 = vld [vmem:[%s7979_s3 + $0xd4] sm:$0xf0] }
  0xf9   :  { %2489 = vmatpush.bf16.msra.mxu1 %v4933_v25 }
  0xfd   :  { %v6924_v53 = vpop.f32.mrf.mxu2 }
  0xfe   :  { %v2174_v55 = vpop.f32.mrf.mxu0 }
  0xff   :  { %v6926_v54 = vpop.f32.mrf.mxu3  ;;  %v6928_v56 = vadd.f32 %v2174_v55, %v2156_v30  ;;  %v4975_v55 = vor.u32 %v5779_v58, %v4974_v11  ;;  %v5782_v58 = vld [vmem:[%s7979_s3 + $0x54] sm:$0xf] }
 0x100   :  { %v6930_v59 = vpop.f32.mrf.mxu1 }
 0x101   :  { %2557 = vmatpush.bf16.msra.mxu3 %v4975_v55  ;;  %v2194_v3 = vadd.f32 %v6930_v59, %v6928_v56  ;;  %v4958_v55 = vld [vmem:[%s7979_s3 + $0x10] sm:$0xf] }
 0x105   :  { %v6932_v60 = vpop.f32.mrf.mxu2 }
 0x106   :  { %v6936_v62 = vpop.f32.mrf.mxu0  ;;  %v2213_v25 = vadd.f32 %v6932_v60, %v2194_v3 }
 0x107   :  { %v6934_v61 = vpop.f32.mrf.mxu3 }
 0x108   :  { %v6938_v63 = vpop.f32.mrf.mxu1  ;;  %v2232_v20 = vadd.f32 %v6934_v61, %v2213_v25 }
 0x10d   :  { %v6940_v0 = vpop.f32.mrf.mxu2 }
 0x10e   :  { %v2179_v1 = vpop.f32.mrf.mxu0 }
 0x10f   :  { %v6942_v2 = vpop.f32.mrf.mxu3  ;;  %v6944_v4 = vadd.f32 %v2179_v1, %v2161_v50  ;;  %v2101_v50 = vadd.f32 %v6906_v29, %v2082_v33  ;;  %v2011_v1 = vadd.f32 %v6835_v26, %v1992_v44  ;;  %v5042_v26 = vld [vmem:[%s7979_s3 + $0xf0] sm:$0xf]  ;;  %v5034_v44 = vld [vmem:[%s7979_s3 + $0xe0] sm:$0xf] }
 0x110   :  { %v6946_v5 = vpop.f32.mrf.mxu1  ;;  %v5043_v49 = vor.u32 %v5803_v32, %v5042_v26 }
 0x111   :  { %v2030_v27 = vadd.f32 %v6889_v10, %v2011_v1  ;;  %v2120_v29 = vadd.f32 %v6908_v31, %v2101_v50  ;;  %v4924_v10 = vld [vmem:[%s7979_s3 + $0x50] sm:$0xf]  ;;  %v5783_v31 = vld [vmem:[%s7979_s3 + $0x54] sm:$0xf0] }
 0x112   :  { %v4925_v41 = vor.u32 %v5783_v31, %v4924_v10  ;;  %2717 = vmatpush.bf16.msrb.mxu0 %v5043_v49  ;;  %v5775_v1 = vld [vmem:[%s7979_s3 + $0x14] sm:$0xf0]  ;;  %v5780_v10 = vld [vmem:[%s7979_s3 + $0x44] sm:$0xf]  ;;  %v4950_v31 = vld [vmem:[%s7979_s3] sm:$0xf] }
 0x113   :  { %v2139_v36 = vadd.f32 %v6916_v37, %v2120_v29  ;;  %v2049_v43 = vadd.f32 %v6891_v13, %v2030_v27  ;;  %v5777_v37 = vld [vmem:[%s7979_s3 + $0x24] sm:$0xf0]  ;;  %v4959_v27 = vor.u32 %v5775_v1, %v4958_v55 }
 0x114   :  { %v4967_v42 = vor.u32 %v5777_v37, %v4966_v52  ;;  %v5801_v13 = vld [vmem:[%s7979_s3 + $0xe4] sm:$0xf0]  ;;  %2490 = vmatpush.bf16.msra.mxu1 %v4925_v41 }
 0x115   :  { %v6948_v6 = vpop.f32.mrf.mxu2  ;;  %v2068_v33 = vadd.f32 %v6902_v17, %v2049_v43  ;;  %v5035_v45 = vor.u32 %v5801_v13, %v5034_v44  ;;  %v2158_v11 = vadd.f32 %v6918_v38, %v2139_v36  ;;  %v4926_v17 = vld [vmem:[%s7979_s3 + $0x58] sm:$0xf0]  ;;  %v4916_v38 = vld [vmem:[%s7979_s3 + $0x40] sm:$0xf]  ;;  %v5797_v43 = vld [vmem:[%s7979_s3 + $0xc4] sm:$0xf0] }
 0x116   :  { %v6950_v7 = vpop.f32.mrf.mxu0  ;;  %2558 = vmatpush.bf16.msra.mxu3 %v4967_v42  ;;  %v4929_v50 = vor.u32 %v5782_v58, %v4926_v17  ;;  %v5794_v58 = vld [vmem:[%s7979_s3 + $0xb4] sm:$0xf]  ;;  %v5010_v17 = vld [vmem:[%s7979_s3 + $0xb8] sm:$0xf0] }
 0x117   :  { %v6952_v8 = vpop.f32.mrf.mxu3  ;;  %2718 = vmatpush.bf16.msrb.mxu0 %v5035_v45  ;;  %v2177_v56 = vadd.f32 %v6936_v62, %v2158_v11  ;;  %v2087_v60 = vadd.f32 %v6904_v18, %v2068_v33  ;;  %v5781_v62 = vld [vmem:[%s7979_s3 + $0x44] sm:$0xf0]  ;;  %v5026_v18 = vld [vmem:[%s7979_s3 + $0xd0] sm:$0xf]  ;;  %v5778_v45 = vld [vmem:[%s7979_s3 + $0x34] sm:$0xf] }
 0x118   :  { %v6954_v12 = vpop.f32.mrf.mxu1  ;;  %v4917_v21 = vor.u32 %v5781_v62, %v4916_v38  ;;  %2503 = vmatpush.bf16.msra.mxu2 %v4929_v50  ;;  %v5027_v49 = vor.u32 %v5799_v28, %v5026_v18  ;;  %v5819_v50 = vld [vmem:[%s7979_s3 + $0x174] sm:$0xf0]  ;;  %v2199_v62 = vadd.f32 %v6946_v5, %v6944_v4  ;;  %v4968_v18 = vld [vmem:[%s7979_s3 + $0x28] sm:$0xf0]  ;;  %v5000_v4 = vld [vmem:[%s7979_s3 + $0xa0] sm:$0xf] }
 0x119   :  { %v2106_v29 = vadd.f32 %v6920_v48, %v2087_v60  ;;  %v2196_v61 = vadd.f32 %v6938_v63, %v2177_v56  ;;  %v4918_v48 = vld [vmem:[%s7979_s3 + $0x48] sm:$0xf0]  ;;  %v5773_v63 = vld [vmem:[%s7979_s3 + $0x4] sm:$0xf0] }
 0x11a   :  { %2491 = vmatpush.bf16.msra.mxu1 %v4917_v21  ;;  %2559 = vmatpush.bf16.msra.mxu3 %v4959_v27  ;;  %v4921_v52 = vor.u32 %v5780_v10, %v4918_v48  ;;  %v4951_v37 = vor.u32 %v5773_v63, %v4950_v31  ;;  %v5776_v27 = vld [vmem:[%s7979_s3 + $0x24] sm:$0xf]  ;;  %v2218_v5 = vadd.f32 %v6948_v6, %v2199_v62  ;;  %v5793_v28 = vld [vmem:[%s7979_s3 + $0xa4] sm:$0xf0]  ;;  %v4960_v63 = vld [vmem:[%s7979_s3 + $0x18] sm:$0xf0] }
 0x11b   :  { %2719 = vmatpush.bf16.msrb.mxu0 %v5027_v49  ;;  %v2215_v41 = vadd.f32 %v6940_v0, %v2196_v61  ;;  %v2125_v42 = vadd.f32 %v6922_v51, %v2106_v29  ;;  %v4976_v0 = vld [vmem:[%s7979_s3 + $0x38] sm:$0xf0]  ;;  %v5008_v51 = vld [vmem:[%s7979_s3 + $0xb0] sm:$0xf]  ;;  %v5792_v29 = vld [vmem:[%s7979_s3 + $0xa4] sm:$0xf] }
 0x11c   :  { %2504 = vmatpush.bf16.msra.mxu2 %v4921_v52  ;;  %v4979_v56 = vor.u32 %v5778_v45, %v4976_v0  ;;  %v5002_v49 = vld [vmem:[%s7979_s3 + $0xa8] sm:$0xf0]  ;;  %v5817_v10 = vld [vmem:[%s7979_s3 + $0x164] sm:$0xf0]  ;;  %v5815_v45 = vld [vmem:[%s7979_s3 + $0x154] sm:$0xf0] }
 0x11d   :  { %v6956_v14 = vpop.f32.mrf.mxu2  ;;  %v2144_v33 = vadd.f32 %v6924_v53, %v2125_v42  ;;  %v2234_v11 = vadd.f32 %v6942_v2, %v2215_v41  ;;  %v5795_v53 = vld [vmem:[%s7979_s3 + $0xb4] sm:$0xf0]  ;;  %v5013_v2 = vor.u32 %v5794_v58, %v5010_v17  ;;  %v5005_v6 = vor.u32 %v5792_v29, %v5002_v49  ;;  %v5790_v41 = vld [vmem:[%s7979_s3 + $0x94] sm:$0xf]  ;;  %v5772_v58 = vld [vmem:[%s7979_s3 + $0x4] sm:$0xf] }
 0x11e   :  { %v6958_v15 = vpop.f32.mrf.mxu0  ;;  %2560 = vmatpush.bf16.msra.mxu3 %v4951_v37  ;;  %v5009_v60 = vor.u32 %v5795_v53, %v5008_v51  ;;  %2570 = vmatpush.bf16.msrb.mxu1 %v4979_v56  ;;  %v2237_v37 = vadd.f32 %v6952_v8, %v2218_v5  ;;  %v4984_v17 = vld [vmem:[%s7979_s3 + $0x80] sm:$0xf] }
 0x11f   :  { %v6962_v19 = vpop.f32.mrf.mxu3  ;;  %v2251_v36 = vadd.f32 %v6958_v15, %v2232_v20  ;;  %v5018_v15 = vld [vmem:[%s7979_s3 + $0xc0] sm:$0xf]  ;;  %v2163_v20 = vadd.f32 %v6926_v54, %v2144_v33  ;;  %v4971_v54 = vor.u32 %v5776_v27, %v4968_v18  ;;  %v5094_v33 = vld [vmem:[%s7979_s3 + $0x150] sm:$0xf] }
 0x120   :  { %v6966_v22 = vpop.f32.mrf.mxu1  ;;  %v5019_v3 = vor.u32 %v5797_v43, %v5018_v15  ;;  %2636 = vmatpush.bf16.msrb.mxu2 %v5009_v60 }
 0x121   :  { %v2270_v13 = vadd.f32 %v6966_v22, %v2251_v36  ;;  %v2182_v61 = vadd.f32 %v6950_v7, %v2163_v20  ;;  %v5001_v36 = vor.u32 %v5793_v28, %v5000_v4  ;;  %v5774_v7 = vld [vmem:[%s7979_s3 + $0x14] sm:$0xf] }
 0x122   :  { %2720 = vmatpush.bf16.msrb.mxu0 %v5019_v3  ;;  %2649 = vmatpush.bf16.msrb.mxu3 %v5013_v2  ;;  %v4963_v43 = vor.u32 %v5774_v7, %v4960_v63  ;;  %v5788_v2 = vld [vmem:[%s7979_s3 + $0x84] sm:$0xf]  ;;  %v5811_v7 = vld [vmem:[%s7979_s3 + $0x134] sm:$0xf0]  ;;  %v5810_v63 = vld [vmem:[%s7979_s3 + $0x134] sm:$0xf] }
 0x123   :  { %2571 = vmatpush.bf16.msrb.mxu1 %v4971_v54  ;;  %v2201_v0 = vadd.f32 %v6954_v12, %v2182_v61  ;;  %v4952_v12 = vld [vmem:[%s7979_s3 + $0x8] sm:$0xf0] }
 0x124   :  { %2637 = vmatpush.bf16.msrb.mxu2 %v5001_v36  ;;  %v4955_v60 = vor.u32 %v5772_v58, %v4952_v12  ;;  %v5809_v58 = vld [vmem:[%s7979_s3 + $0x124] sm:$0xf0]  ;;  %v5808_v12 = vld [vmem:[%s7979_s3 + $0x124] sm:$0xf] }
 0x125   :  { %v6970_v24 = vpop.f32.mrf.mxu2  ;;  %v2220_v53 = vadd.f32 %v6956_v14, %v2201_v0  ;;  %v5789_v14 = vld [vmem:[%s7979_s3 + $0x84] sm:$0xf0] }
 0x126   :  { %v6968_v23 = vpop.f32.mrf.mxu0  ;;  %v2289_v22 = vadd.f32 %v6970_v24, %v2270_v13  ;;  %v5110_v24 = vld [vmem:[%s7979_s3 + $0x170] sm:$0xf]  ;;  %2650 = vmatpush.bf16.msrb.mxu3 %v5005_v6  ;;  %v4994_v13 = vld [vmem:[%s7979_s3 + $0x98] sm:$0xf0]  ;;  %v4985_v62 = vor.u32 %v5789_v14, %v4984_v17 }
 0x127   :  { %v6974_v30 = vpop.f32.mrf.mxu3  ;;  %v2253_v55 = vadd.f32 %v6968_v23, %v2234_v11  ;;  %v5111_v1 = vor.u32 %v5819_v50, %v5110_v24  ;;  %v4997_v8 = vor.u32 %v5790_v41, %v4994_v13  ;;  %2572 = vmatpush.bf16.msrb.mxu1 %v4963_v43  ;;  %v4986_v24 = vld [vmem:[%s7979_s3 + $0x88] sm:$0xf0]  ;;  %v2239_v18 = vadd.f32 %v6962_v19, %v2220_v53  ;;  %v5068_v53 = vld [vmem:[%s7979_s3 + $0x120] sm:$0xf] }
 0x128   :  { %v6987_v39 = vpop.f32.mrf.mxu1  ;;  %v2308_v23 = vadd.f32 %v6974_v30, %v2289_v22  ;;  %v5102_v30 = vld [vmem:[%s7979_s3 + $0x160] sm:$0xf] }
 0x129   :  { %2879 = vmatpush.bf16.msra.mxu0 %v5111_v1  ;;  %v2272_v48 = vadd.f32 %v6987_v39, %v2253_v55  ;;  %v5103_v52 = vor.u32 %v5817_v10, %v5102_v30  ;;  %v4992_v39 = vld [vmem:[%s7979_s3 + $0x90] sm:$0xf]  ;;  %v4989_v55 = vor.u32 %v5788_v2, %v4986_v24  ;;  %v5813_v1 = vld [vmem:[%s7979_s3 + $0x144] sm:$0xf0] }
 0x12a   :  { %2651 = vmatpush.bf16.msrb.mxu3 %v4997_v8 }
 0x12b   :  { %2573 = vmatpush.bf16.msrb.mxu1 %v4955_v60  ;;  %v5833_v60 = vld [vmem:[%s7979_s3 + $0x1e4] sm:$0xf0] }
 0x12d   :  { %v6997_v9 = vpop.f32.mrf.mxu2  ;;  %2880 = vmatpush.bf16.msra.mxu0 %v5103_v52  ;;  %v5044_v52 = vld [vmem:[%s7979_s3 + $0xf8] sm:$0xf0] }
 0x12e   :  { %v6984_v35 = vpop.f32.mrf.mxu0  ;;  %v2291_v3 = vadd.f32 %v6997_v9, %v2272_v48  ;;  %v5095_v9 = vor.u32 %v5815_v45, %v5094_v33  ;;  %2652 = vmatpush.bf16.msrb.mxu3 %v4989_v55  ;;  %v5069_v55 = vor.u32 %v5809_v58, %v5068_v53 }
 0x12f   :  { %v7010_v46 = vpop.f32.mrf.mxu3  ;;  %v2256_v11 = vadd.f32 %v6984_v35, %v2237_v37 }
 0x130   :  { %v7019_v16 = vpop.f32.mrf.mxu1  ;;  %v2310_v35 = vadd.f32 %v7010_v46, %v2291_v3  ;;  %v5086_v46 = vld [vmem:[%s7979_s3 + $0x140] sm:$0xf] }
 0x131   :  { %2881 = vmatpush.bf16.msra.mxu0 %v5095_v9  ;;  %v2275_v20 = vadd.f32 %v7019_v16, %v2256_v11  ;;  %v5087_v27 = vor.u32 %v5813_v1, %v5086_v46  ;;  %v5800_v11 = vld [vmem:[%s7979_s3 + $0xe4] sm:$0xf]  ;;  %v5798_v46 = vld [vmem:[%s7979_s3 + $0xd4] sm:$0xf]  ;;  %v5028_v1 = vld [vmem:[%s7979_s3 + $0xd8] sm:$0xf0] }
 0x135   :  { %v7035_v34 = vpop.f32.mrf.mxu2  ;;  %2882 = vmatpush.bf16.msra.mxu0 %v5087_v27 }
 0x136   :  { %v7012_v47 = vpop.f32.mrf.mxu0  ;;  %v2294_v4 = vadd.f32 %v7035_v34, %v2275_v20  ;;  %v5060_v20 = vld [vmem:[%s7979_s3 + $0x110] sm:$0xf] }
 0x137   :  { %v7062_v57 = vpop.f32.mrf.mxu3 }
 0x138   :  { %v7067_v59 = vpop.f32.mrf.mxu1  ;;  %v2313_v16 = vadd.f32 %v7062_v57, %v2294_v4  ;;  %v5802_v57 = vld [vmem:[%s7979_s3 + $0xf4] sm:$0xf] }
 0x139   :  { %v5047_v13 = vor.u32 %v5802_v57, %v5044_v52  ;;  %v5806_v4 = vld [vmem:[%s7979_s3 + $0x114] sm:$0xf]  ;;  %v5829_v57 = vld [vmem:[%s7979_s3 + $0x1c4] sm:$0xf0] }
 0x13d   :  { %v7096_v26 = vpop.f32.mrf.mxu2 }
 0x13e   :  { %v7048_v40 = vpop.f32.mrf.mxu0 }
 0x13f   :  { %v7122_v44 = vpop.f32.mrf.mxu3  ;;  %v2327_v31 = vadd.f32 %v7048_v40, %v2308_v23  ;;  %v5791_v40 = vld [vmem:[%s7979_s3 + $0x94] sm:$0xf0]  ;;  %v2258_v23 = vadd.f32 %v7012_v47, %v2239_v18 }
 0x140   :  { %v2345_v25 = vpop.f32.mrf.mxu1  ;;  %v4993_v42 = vor.u32 %v5791_v40, %v4992_v39  ;;  %v5178_v40 = vld [vmem:[%s7979_s3 + $0x1f0] sm:$0xf]  ;;  %v5807_v18 = vld [vmem:[%s7979_s3 + $0x114] sm:$0xf0] }
 0x141   :  { %v2346_v22 = vadd.f32 %v2345_v25, %v2327_v31  ;;  %v2277_v19 = vadd.f32 %v7067_v59, %v2258_v23  ;;  %v5076_v59 = vld [vmem:[%s7979_s3 + $0x130] sm:$0xf] }
 0x142   :  { %2638 = vmatpush.bf16.msrb.mxu2 %v4993_v42  ;;  %v5077_v9 = vor.u32 %v5811_v7, %v5076_v59 }
 0x143   :  { %v2296_v34 = vadd.f32 %v7096_v26, %v2277_v19 }
 0x145   :  { %v2364_v21 = vpop.f32.mrf.mxu2 }
 0x146   :  { %v7098_v32 = vpop.f32.mrf.mxu0  ;;  %v2365_v25 = vadd.f32 %v2364_v21, %v2346_v22  ;;  %2639 = vmatpush.bf16.msrb.mxu2 %v4985_v62 }
 0x147   :  { %v2383_v15 = vpop.f32.mrf.mxu3  ;;  %v2329_v21 = vadd.f32 %v7098_v32, %v2310_v35  ;;  %v5070_v35 = vld [vmem:[%s7979_s3 + $0x128] sm:$0xf0] }
 0x148   :  { %v2347_v56 = vpop.f32.mrf.mxu1  ;;  %v2384_v5 = vadd.f32 %v2383_v15, %v2365_v25  ;;  %v5078_v15 = vld [vmem:[%s7979_s3 + $0x138] sm:$0xf0]  ;;  %v5170_v25 = vld [vmem:[%s7979_s3 + $0x1e0] sm:$0xf] }
 0x149   :  { %v2348_v29 = vadd.f32 %v2347_v56, %v2329_v21  ;;  %v5081_v22 = vor.u32 %v5810_v63, %v5078_v15  ;;  %v5073_v21 = vor.u32 %v5808_v12, %v5070_v35  ;;  %v5171_v27 = vor.u32 %v5833_v60, %v5170_v25  ;;  %v5112_v15 = vld [vmem:[%s7979_s3 + $0x178] sm:$0xf0]  ;;  %v5136_v12 = vld [vmem:[%s7979_s3 + $0x1a0] sm:$0xf]  ;;  %v5824_v35 = vld [vmem:[%s7979_s3 + $0x1a4] sm:$0xf] }
 0x14a   :  { %v5138_v25 = vld [vmem:[%s7979_s3 + $0x1a8] sm:$0xf0]  ;;  %v5238_v60 = vld [vmem:[%s7979_s3 + $0x260] sm:$0xf] }
 0x14d   :  { %v2366_v50 = vpop.f32.mrf.mxu2 }
 0x14e   :  { %v7146_v38 = vpop.f32.mrf.mxu0  ;;  %v2367_v32 = vadd.f32 %v2366_v50, %v2348_v29  ;;  %v5831_v29 = vld [vmem:[%s7979_s3 + $0x1d4] sm:$0xf0] }
 0x14f   :  { %v2385_v54 = vpop.f32.mrf.mxu3  ;;  %v2332_v6 = vadd.f32 %v7146_v38, %v2313_v16  ;;  %v2315_v38 = vadd.f32 %v7122_v44, %v2296_v34  ;;  %v5835_v44 = vld [vmem:[%s7979_s3 + $0x1f4] sm:$0xf0]  ;;  %v5031_v16 = vor.u32 %v5798_v46, %v5028_v1  ;;  %v5052_v34 = vld [vmem:[%s7979_s3 + $0x100] sm:$0xf]  ;;  %v5128_v46 = vld [vmem:[%s7979_s3 + $0x190] sm:$0xf] }
 0x150   :  { %v2350_v61 = vpop.f32.mrf.mxu1  ;;  %v2386_v47 = vadd.f32 %v2385_v54, %v2367_v32  ;;  %v5179_v56 = vor.u32 %v5835_v44, %v5178_v40  ;;  %v5061_v32 = vor.u32 %v5807_v18, %v5060_v20  ;;  %v5823_v1 = vld [vmem:[%s7979_s3 + $0x194] sm:$0xf0]  ;;  %v5822_v20 = vld [vmem:[%s7979_s3 + $0x194] sm:$0xf] }
 0x151   :  { %v2351_v48 = vadd.f32 %v2350_v61, %v2332_v6  ;;  %v5796_v61 = vld [vmem:[%s7979_s3 + $0xc4] sm:$0xf]  ;;  %v5847_v18 = vld [vmem:[%s7979_s3 + $0x254] sm:$0xf0] }
 0x155   :  { %v2369_v30 = vpop.f32.mrf.mxu2 }
 0x156   :  { %v7214_v51 = vpop.f32.mrf.mxu0  ;;  %v2370_v43 = vadd.f32 %v2369_v30, %v2351_v48  ;;  %v5805_v30 = vld [vmem:[%s7979_s3 + $0x104] sm:$0xf0]  ;;  %v5054_v48 = vld [vmem:[%s7979_s3 + $0x108] sm:$0xf0] }
 0x157   :  { %v2388_v26 = vpop.f32.mrf.mxu3  ;;  %v2334_v41 = vadd.f32 %v7214_v51, %v2315_v38  ;;  %v5036_v51 = vld [vmem:[%s7979_s3 + $0xe8] sm:$0xf0]  ;;  %v5818_v38 = vld [vmem:[%s7979_s3 + $0x174] sm:$0xf]  ;;  %v5053_v63 = vor.u32 %v5805_v30, %v5052_v34 }
 0x158   :  { %v2352_v33 = vpop.f32.mrf.mxu1  ;;  %v2389_v17 = vadd.f32 %v2388_v26, %v2370_v43  ;;  %v5039_v62 = vor.u32 %v5800_v11, %v5036_v51  ;;  %v5144_v43 = vld [vmem:[%s7979_s3 + $0x1b0] sm:$0xf]  ;;  %v5816_v51 = vld [vmem:[%s7979_s3 + $0x164] sm:$0xf] }
 0x159   :  { %v2353_v14 = vadd.f32 %v2352_v33, %v2334_v41  ;;  %v5826_v41 = vld [vmem:[%s7979_s3 + $0x1b4] sm:$0xf]  ;;  %v5851_v33 = vld [vmem:[%s7979_s3 + $0x274] sm:$0xf0] }
 0x15d   :  { %v2371_v2 = vpop.f32.mrf.mxu2 }
 0x15e   :  { %v2402_v28 = vpop.f32.mrf.mxu0  ;;  %v2372_v23 = vadd.f32 %v2371_v2, %v2353_v14  ;;  %v5849_v14 = vld [vmem:[%s7979_s3 + $0x264] sm:$0xf0] }
 0x15f   :  { %v2403_v49 = vadd.f32 %v2402_v28, %v2384_v5  ;;  %v5062_v5 = vld [vmem:[%s7979_s3 + $0x118] sm:$0xf0]  ;;  %v5162_v28 = vld [vmem:[%s7979_s3 + $0x1d0] sm:$0xf] }
 0x160   :  { %v5065_v19 = vor.u32 %v5806_v4, %v5062_v5  ;;  %v5163_v6 = vor.u32 %v5831_v29, %v5162_v28  ;;  %v5129_v5 = vor.u32 %v5823_v1, %v5128_v46  ;;  %v5188_v1 = vld [vmem:[%s7979_s3 + $0x200] sm:$0xf] }
 0x161   :  { %v2412_v36 = vmax.f32 %v2403_v49, 0.0  ;;  %v2390_v49 = vpop.f32.mrf.mxu3 }
 0x163   :  { %2417 = vst.msk [vmem:[#allocation2] sm:$0xff] %vm2416_vm0, %v2412_v36  ;;  %v5020_v36 = vld [vmem:[%s7979_s3 + $0xc8] sm:$0xf0] }
 0x164   :  { %v5023_v7 = vor.u32 %v5796_v61, %v5020_v36  ;;  %v5122_v61 = vld [vmem:[%s7979_s3 + $0x188] sm:$0xf0]  ;;  %v5222_v36 = vld [vmem:[%s7979_s3 + $0x240] sm:$0xf] }
 0x166   :  { %v2404_v10 = vpop.f32.mrf.mxu0 }
 0x167   :  { %v2405_v31 = vadd.f32 %v2404_v10, %v2386_v47  ;;  %v5804_v47 = vld [vmem:[%s7979_s3 + $0x104] sm:$0xf]  ;;  %v2391_v10 = vadd.f32 %v2390_v49, %v2372_v23  ;;  %v5120_v49 = vld [vmem:[%s7979_s3 + $0x180] sm:$0xf] }
 0x168   :  { %v5057_v40 = vor.u32 %v5804_v47, %v5054_v48  ;;  %v5812_v23 = vld [vmem:[%s7979_s3 + $0x144] sm:$0xf]  ;;  %v5180_v48 = vld [vmem:[%s7979_s3 + $0x1f8] sm:$0xf0] }
 0x169   :  { %v2413_v39 = vmax.f32 %v2405_v31, 0.0  ;;  %v5154_v31 = vld [vmem:[%s7979_s3 + $0x1c0] sm:$0xf] }
 0x16a   :  { %v2431_v37 = vld [vmem:[#allocation2 + $0x2] sm:$0x3]  ;;  %v2421_v3 = vld [vmem:[#allocation2] sm:$0x3]  ;;  %v2660_v42 = vld [vmem:[#allocation2 + $0x6] sm:$0x3]  ;;  %v5155_v44 = vor.u32 %v5829_v57, %v5154_v31 }
 0x16b   :  { %2418 = vst.msk [vmem:[#allocation2 + $0x8] sm:$0xff] %vm2416_vm0, %v2413_v39  ;;  %v2432_v45 = vpack.c.bf16 %v2431_v37, %v2431_v37  ;;  %v7280_v0 = vpack.c.bf16 %v2421_v3, %v2421_v3  ;;  %v7282_v8 = vpack.c.bf16 %v2660_v42, %v2660_v42  ;;  %v2579_v59 = vld [vmem:[#allocation2 + $0x4] sm:$0x3]  ;;  %v5827_v39 = vld [vmem:[%s7979_s3 + $0x1b4] sm:$0xf0] }
 0x16c   :  { %v5146_v37 = vld [vmem:[%s7979_s3 + $0x1b8] sm:$0xf0]  ;;  %v5246_v3 = vld [vmem:[%s7979_s3 + $0x270] sm:$0xf]  ;;  %v5145_v11 = vor.u32 %v5827_v39, %v5144_v43 }
 0x16d   :  { %4946 = vmatmul.msk.bf16.vlgmr.msra.gmra.mxu1 %vm2416_vm0, %v2432_v45  ;;  %4947 = vmatmul.msk.bf16.vlgmr.msra.gmra.mxu2 %vm2416_vm0, %v2432_v45  ;;  %v2580_v45 = vpack.c.bf16 %v2579_v59, %v2579_v59  ;;  %v5149_v53 = vor.u32 %v5826_v41, %v5146_v37  ;;  %v5247_v58 = vor.u32 %v5851_v33, %v5246_v3  ;;  %v5843_v59 = vld [vmem:[%s7979_s3 + $0x234] sm:$0xf0]  ;;  %v5840_v33 = vld [vmem:[%s7979_s3 + $0x224] sm:$0xf] }
 0x16e   :  { %4980 = vmatmul.msk.bf16.vlgmr.msra.gmra.mxu3 %vm2416_vm0, %v7280_v0  ;;  %5048 = vmatmul.msk.bf16.vlgmr.msrb.gmra.mxu0 %vm2416_vm0, %v7282_v8  ;;  %v2407_v24 = vpop.f32.mrf.mxu0 }
 0x16f   :  { %v2408_v50 = vadd.f32 %v2407_v24, %v2389_v17  ;;  %2730 = vmatpush.bf16.msra.mxu1 %v5047_v13  ;;  %2798 = vmatpush.bf16.msra.mxu2 %v5077_v9  ;;  %v5115_v9 = vor.u32 %v5818_v38, %v5112_v15  ;;  %v5825_v17 = vld [vmem:[%s7979_s3 + $0x1a4] sm:$0xf0]  ;;  %v5814_v24 = vld [vmem:[%s7979_s3 + $0x154] sm:$0xf] }
 0x170   :  { %2811 = vmatpush.bf16.msra.mxu3 %v5081_v22  ;;  %3041 = vmatpush.bf16.msrb.mxu0 %v5179_v56  ;;  %v5104_v22 = vld [vmem:[%s7979_s3 + $0x168] sm:$0xf0]  ;;  %v5137_v2 = vor.u32 %v5825_v17, %v5136_v12  ;;  %v5842_v38 = vld [vmem:[%s7979_s3 + $0x234] sm:$0xf]  ;;  %v5196_v17 = vld [vmem:[%s7979_s3 + $0x210] sm:$0xf] }
 0x171   :  { %v2414_v54 = vmax.f32 %v2408_v50, 0.0  ;;  %v5096_v50 = vld [vmem:[%s7979_s3 + $0x158] sm:$0xf0] }
 0x172   :  { %v2822_v13 = vld [vmem:[#allocation2 + $0xa] sm:$0x3]  ;;  %v5099_v4 = vor.u32 %v5814_v24, %v5096_v50  ;;  %v2984_v34 = vld [vmem:[#allocation2 + $0xe] sm:$0x3]  ;;  %v5828_v50 = vld [vmem:[%s7979_s3 + $0x1c4] sm:$0xf] }
 0x173   :  { %2419 = vst.msk [vmem:[#allocation2 + $0x10] sm:$0xff] %vm2416_vm0, %v2414_v54  ;;  %2731 = vmatpush.bf16.msra.mxu1 %v5039_v62  ;;  %2799 = vmatpush.bf16.msra.mxu2 %v5069_v55  ;;  %v7394_v56 = vpack.c.bf16 %v2822_v13, %v2822_v13  ;;  %v5141_v62 = vor.u32 %v5824_v35, %v5138_v25  ;;  %v5088_v54 = vld [vmem:[%s7979_s3 + $0x148] sm:$0xf0]  ;;  %v5841_v13 = vld [vmem:[%s7979_s3 + $0x224] sm:$0xf0] }
 0x174   :  { %2812 = vmatpush.bf16.msra.mxu3 %v5073_v21  ;;  %3042 = vmatpush.bf16.msrb.mxu0 %v5171_v27  ;;  %v5239_v55 = vor.u32 %v5849_v14, %v5238_v60  ;;  %v5130_v21 = vld [vmem:[%s7979_s3 + $0x198] sm:$0xf0]  ;;  %v5230_v27 = vld [vmem:[%s7979_s3 + $0x250] sm:$0xf]  ;;  %v5091_v30 = vor.u32 %v5812_v23, %v5088_v54  ;;  %v7498_v41 = vpack.c.bf16 %v2984_v34, %v2984_v34  ;;  %v5839_v35 = vld [vmem:[%s7979_s3 + $0x214] sm:$0xf0] }
 0x175   :  { %v5133_v28 = vor.u32 %v5822_v20, %v5130_v21  ;;  %v5231_v29 = vor.u32 %v5847_v18, %v5230_v27  ;;  %v5838_v25 = vld [vmem:[%s7979_s3 + $0x214] sm:$0xf]  ;;  %v5198_v60 = vld [vmem:[%s7979_s3 + $0x218] sm:$0xf0]  ;;  %v5298_v14 = vld [vmem:[%s7979_s3 + $0x2d0] sm:$0xf]  ;;  %v5197_v24 = vor.u32 %v5839_v35, %v5196_v17 }
 0x176   :  { %v2409_v52 = vpop.f32.mrf.mxu0  ;;  %v5837_v20 = vld [vmem:[%s7979_s3 + $0x204] sm:$0xf0]  ;;  %v5836_v21 = vld [vmem:[%s7979_s3 + $0x204] sm:$0xf]  ;;  %v5190_v27 = vld [vmem:[%s7979_s3 + $0x208] sm:$0xf0] }
 0x177   :  { %v2410_v26 = vadd.f32 %v2409_v52, %v2391_v10  ;;  %2732 = vmatpush.bf16.msra.mxu1 %v5031_v16  ;;  %2800 = vmatpush.bf16.msra.mxu2 %v5061_v32  ;;  %v5821_v16 = vld [vmem:[%s7979_s3 + $0x184] sm:$0xf0]  ;;  %v5820_v32 = vld [vmem:[%s7979_s3 + $0x184] sm:$0xf]  ;;  %v5834_v10 = vld [vmem:[%s7979_s3 + $0x1f4] sm:$0xf] }
 0x178   :  { %2813 = vmatpush.bf16.msra.mxu3 %v5065_v19  ;;  %3043 = vmatpush.bf16.msrb.mxu0 %v5163_v6  ;;  %v5845_v19 = vld [vmem:[%s7979_s3 + $0x244] sm:$0xf0]  ;;  %v5121_v47 = vor.u32 %v5821_v16, %v5120_v49  ;;  %v5125_v31 = vor.u32 %v5820_v32, %v5122_v61  ;;  %v5212_v52 = vld [vmem:[%s7979_s3 + $0x230] sm:$0xf]  ;;  %v5183_v43 = vor.u32 %v5834_v10, %v5180_v48  ;;  %v5290_v18 = vld [vmem:[%s7979_s3 + $0x2c0] sm:$0xf] }
 0x179   :  { %v2415_v42 = vmax.f32 %v2410_v26, 0.0  ;;  %v2741_v6 = vld [vmem:[#allocation2 + $0x8] sm:$0x3]  ;;  %v5223_v57 = vor.u32 %v5845_v19, %v5222_v36  ;;  %v5214_v26 = vld [vmem:[%s7979_s3 + $0x238] sm:$0xf0]  ;;  %v5213_v39 = vor.u32 %v5843_v59, %v5212_v52  ;;  %v5193_v16 = vor.u32 %v5836_v21, %v5190_v27 }
 0x17a   :  { %v2742_v15 = vpack.c.bf16 %v2741_v6, %v2741_v6  ;;  %v5217_v37 = vor.u32 %v5842_v38, %v5214_v26  ;;  %v3146_v23 = vld [vmem:[#allocation2 + $0x12] sm:$0x3]  ;;  %v5248_v49 = vld [vmem:[%s7979_s3 + $0x278] sm:$0xf0]  ;;  %v5859_v36 = vld [vmem:[%s7979_s3 + $0x2b4] sm:$0xf0] }
 0x17b   :  { %2420 = vst.msk [vmem:[#allocation2 + $0x18] sm:$0xff] %vm2416_vm0, %v2415_v42  ;;  %2733 = vmatpush.bf16.msra.mxu1 %v5023_v7  ;;  %2801 = vmatpush.bf16.msra.mxu2 %v5053_v63  ;;  %v5314_v7 = vld [vmem:[%s7979_s3 + $0x2f0] sm:$0xf]  ;;  %v5867_v63 = vld [vmem:[%s7979_s3 + $0x2f4] sm:$0xf0]  ;;  %v7602_v52 = vpack.c.bf16 %v3146_v23, %v3146_v23 }
 0x17c   :  { %2814 = vmatpush.bf16.msra.mxu3 %v5057_v40  ;;  %3044 = vmatpush.bf16.msrb.mxu0 %v5155_v44  ;;  %v5832_v40 = vld [vmem:[%s7979_s3 + $0x1e4] sm:$0xf]  ;;  %v5172_v44 = vld [vmem:[%s7979_s3 + $0x1e8] sm:$0xf0]  ;;  %v5315_v3 = vor.u32 %v5867_v63, %v5314_v7  ;;  %v5204_v42 = vld [vmem:[%s7979_s3 + $0x220] sm:$0xf] }
 0x17d   :  { %4981 = vmatmul.msk.bf16.vlgmr.msrb.gmra.mxu1 %vm2416_vm0, %v7280_v0  ;;  %5014 = vmatmul.msk.bf16.vlgmr.msrb.gmra.mxu2 %vm2416_vm0, %v2580_v45  ;;  %v5107_v0 = vor.u32 %v5816_v51, %v5104_v22  ;;  %v5205_v51 = vor.u32 %v5841_v13, %v5204_v42  ;;  %v5830_v22 = vld [vmem:[%s7979_s3 + $0x1d4] sm:$0xf]  ;;  %v5280_v61 = vld [vmem:[%s7979_s3 + $0x2b0] sm:$0xf]  ;;  %v5282_v6 = vld [vmem:[%s7979_s3 + $0x2b8] sm:$0xf0] }
 0x17e   :  { %5015 = vmatmul.msk.bf16.vlgmr.msrb.gmra.mxu3 %vm2416_vm0, %v2580_v45  ;;  %5116 = vmatmul.msk.bf16.vlgmr.msra.gmra.mxu0 %vm2416_vm0, %v7394_v56  ;;  %v5206_v45 = vld [vmem:[%s7979_s3 + $0x228] sm:$0xf0]  ;;  %v5858_v19 = vld [vmem:[%s7979_s3 + $0x2b4] sm:$0xf]  ;;  %v5382_v34 = vld [vmem:[%s7979_s3 + $0x370] sm:$0xf]  ;;  %v5281_v48 = vor.u32 %v5859_v36, %v5280_v61 }
 0x17f   :  { %2892 = vmatpush.bf16.msrb.mxu1 %v5115_v9  ;;  %2960 = vmatpush.bf16.msrb.mxu2 %v5145_v11  ;;  %v5306_v9 = vld [vmem:[%s7979_s3 + $0x2e0] sm:$0xf]  ;;  %v5865_v11 = vld [vmem:[%s7979_s3 + $0x2e4] sm:$0xf0]  ;;  %v5285_v59 = vor.u32 %v5858_v19, %v5282_v6  ;;  %v5856_v63 = vld [vmem:[%s7979_s3 + $0x2a4] sm:$0xf] }
 0x180   :  { %2973 = vmatpush.bf16.msrb.mxu3 %v5149_v53  ;;  %3203 = vmatpush.bf16.msra.mxu0 %v5247_v58  ;;  %v5164_v53 = vld [vmem:[%s7979_s3 + $0x1d8] sm:$0xf0]  ;;  %v5209_v58 = vor.u32 %v5840_v33, %v5206_v45  ;;  %v5307_v12 = vor.u32 %v5865_v11, %v5306_v9  ;;  %v5272_v26 = vld [vmem:[%s7979_s3 + $0x2a0] sm:$0xf]  ;;  %v5857_v7 = vld [vmem:[%s7979_s3 + $0x2a4] sm:$0xf0] }
 0x181   :  { %v5264_v13 = vld [vmem:[%s7979_s3 + $0x290] sm:$0xf]  ;;  %v5855_v33 = vld [vmem:[%s7979_s3 + $0x294] sm:$0xf0]  ;;  %v5854_v45 = vld [vmem:[%s7979_s3 + $0x294] sm:$0xf] }
 0x182   :  { %v5266_v9 = vld [vmem:[%s7979_s3 + $0x298] sm:$0xf0]  ;;  %v5366_v11 = vld [vmem:[%s7979_s3 + $0x350] sm:$0xf]  ;;  %v5256_v35 = vld [vmem:[%s7979_s3 + $0x280] sm:$0xf] }
 0x183   :  { %2893 = vmatpush.bf16.msrb.mxu1 %v5107_v0  ;;  %2961 = vmatpush.bf16.msrb.mxu2 %v5137_v2  ;;  %v5863_v0 = vld [vmem:[%s7979_s3 + $0x2d4] sm:$0xf0]  ;;  %v5167_v2 = vor.u32 %v5830_v22, %v5164_v53  ;;  %v5265_v22 = vor.u32 %v5855_v33, %v5264_v13  ;;  %v5844_v53 = vld [vmem:[%s7979_s3 + $0x244] sm:$0xf]  ;;  %v5348_v27 = vld [vmem:[%s7979_s3 + $0x330] sm:$0xf] }
 0x184   :  { %2974 = vmatpush.bf16.msrb.mxu3 %v5141_v62  ;;  %3204 = vmatpush.bf16.msra.mxu0 %v5239_v55  ;;  %v5156_v62 = vld [vmem:[%s7979_s3 + $0x1c8] sm:$0xf0]  ;;  %v5201_v55 = vor.u32 %v5838_v25, %v5198_v60  ;;  %v5299_v46 = vor.u32 %v5863_v0, %v5298_v14  ;;  %v5853_v25 = vld [vmem:[%s7979_s3 + $0x284] sm:$0xf0]  ;;  %v5852_v60 = vld [vmem:[%s7979_s3 + $0x284] sm:$0xf] }
 0x185   :  { %v5159_v54 = vor.u32 %v5828_v50, %v5156_v62  ;;  %v5258_v14 = vld [vmem:[%s7979_s3 + $0x288] sm:$0xf0]  ;;  %v5358_v0 = vld [vmem:[%s7979_s3 + $0x340] sm:$0xf]  ;;  %v3308_v50 = vld [vmem:[#allocation2 + $0x16] sm:$0x3] }
 0x186   :  { %v5450_v23 = vld [vmem:[%s7979_s3 + $0x3f0] sm:$0xf]  ;;  %v7706_v61 = vpack.c.bf16 %v3308_v50, %v3308_v50  ;;  %v5340_v6 = vld [vmem:[%s7979_s3 + $0x320] sm:$0xf] }
 0x187   :  { %2894 = vmatpush.bf16.msrb.mxu1 %v5099_v4  ;;  %2962 = vmatpush.bf16.msrb.mxu2 %v5129_v5  ;;  %v5861_v4 = vld [vmem:[%s7979_s3 + $0x2c4] sm:$0xf0]  ;;  %v2903_v5 = vld [vmem:[#allocation2 + $0xc] sm:$0x3]  ;;  %v5324_v33 = vld [vmem:[%s7979_s3 + $0x300] sm:$0xf] }
 0x188   :  { %2975 = vmatpush.bf16.msrb.mxu3 %v5133_v28  ;;  %3205 = vmatpush.bf16.msra.mxu0 %v5231_v29  ;;  %v5189_v28 = vor.u32 %v5837_v20, %v5188_v1  ;;  %v5850_v29 = vld [vmem:[%s7979_s3 + $0x274] sm:$0xf]  ;;  %v5291_v32 = vor.u32 %v5861_v4, %v5290_v18  ;;  %v5316_v1 = vld [vmem:[%s7979_s3 + $0x2f8] sm:$0xf0]  ;;  %v5261_v20 = vor.u32 %v5852_v60, %v5258_v14  ;;  %v5875_v18 = vld [vmem:[%s7979_s3 + $0x334] sm:$0xf0] }
 0x189   :  { %v5251_v10 = vor.u32 %v5850_v29, %v5248_v49  ;;  %v5874_v4 = vld [vmem:[%s7979_s3 + $0x334] sm:$0xf]  ;;  %v5349_v49 = vor.u32 %v5875_v18, %v5348_v27  ;;  %v5416_v60 = vld [vmem:[%s7979_s3 + $0x3b0] sm:$0xf]  ;;  %v5891_v14 = vld [vmem:[%s7979_s3 + $0x3b4] sm:$0xf0] }
 0x18a   :  { %v5408_v27 = vld [vmem:[%s7979_s3 + $0x3a0] sm:$0xf]  ;;  %v5889_v18 = vld [vmem:[%s7979_s3 + $0x3a4] sm:$0xf0] }
 0x18b   :  { %2895 = vmatpush.bf16.msrb.mxu1 %v5091_v30  ;;  %2963 = vmatpush.bf16.msrb.mxu2 %v5121_v47  ;;  %v5883_v30 = vld [vmem:[%s7979_s3 + $0x374] sm:$0xf0]  ;;  %v2904_v47 = vpack.c.bf16 %v2903_v5, %v2903_v5  ;;  %v5350_v5 = vld [vmem:[%s7979_s3 + $0x338] sm:$0xf0] }
 0x18c   :  { %2976 = vmatpush.bf16.msrb.mxu3 %v5125_v31  ;;  %3206 = vmatpush.bf16.msra.mxu0 %v5223_v57  ;;  %v5848_v31 = vld [vmem:[%s7979_s3 + $0x264] sm:$0xf]  ;;  %v5240_v57 = vld [vmem:[%s7979_s3 + $0x268] sm:$0xf0]  ;;  %v5383_v38 = vor.u32 %v5883_v30, %v5382_v34  ;;  %v5353_v36 = vor.u32 %v5874_v4, %v5350_v5  ;;  %v5873_v34 = vld [vmem:[%s7979_s3 + $0x324] sm:$0xf0] }
 0x18d   :  { %5049 = vmatmul.msk.bf16.vlgmr.msra.gmra.mxu1 %vm2416_vm0, %v7282_v8  ;;  %5082 = vmatmul.msk.bf16.vlgmr.msra.gmra.mxu2 %vm2416_vm0, %v2742_v15  ;;  %v5175_v8 = vor.u32 %v5832_v40, %v5172_v44  ;;  %v5273_v40 = vor.u32 %v5857_v7, %v5272_v26  ;;  %v5846_v44 = vld [vmem:[%s7979_s3 + $0x254] sm:$0xf]  ;;  %v5872_v30 = vld [vmem:[%s7979_s3 + $0x324] sm:$0xf]  ;;  %v5332_v7 = vld [vmem:[%s7979_s3 + $0x310] sm:$0xf] }
 0x18e   :  { %5083 = vmatmul.msk.bf16.vlgmr.msra.gmra.mxu3 %vm2416_vm0, %v2742_v15  ;;  %5184 = vmatmul.msk.bf16.vlgmr.msrb.gmra.mxu0 %vm2416_vm0, %v7498_v41  ;;  %v5274_v15 = vld [vmem:[%s7979_s3 + $0x2a8] sm:$0xf0]  ;;  %v5888_v4 = vld [vmem:[%s7979_s3 + $0x3a4] sm:$0xf] }
 0x18f   :  { %3054 = vmatpush.bf16.msra.mxu1 %v5183_v43  ;;  %3122 = vmatpush.bf16.msra.mxu2 %v5213_v39  ;;  %v5374_v43 = vld [vmem:[%s7979_s3 + $0x360] sm:$0xf]  ;;  %v5881_v39 = vld [vmem:[%s7979_s3 + $0x364] sm:$0xf0]  ;;  %v5410_v5 = vld [vmem:[%s7979_s3 + $0x3a8] sm:$0xf0] }
 0x190   :  { %3135 = vmatpush.bf16.msra.mxu3 %v5217_v37  ;;  %3365 = vmatpush.bf16.msrb.mxu0 %v5315_v3  ;;  %v5232_v37 = vld [vmem:[%s7979_s3 + $0x258] sm:$0xf0]  ;;  %v5277_v3 = vor.u32 %v5856_v63, %v5274_v15  ;;  %v5375_v42 = vor.u32 %v5881_v39, %v5374_v43  ;;  %v5871_v63 = vld [vmem:[%s7979_s3 + $0x314] sm:$0xf0]  ;;  %v5870_v15 = vld [vmem:[%s7979_s3 + $0x314] sm:$0xf] }
 0x191   :  { %v5334_v43 = vld [vmem:[%s7979_s3 + $0x318] sm:$0xf0]  ;;  %v5434_v39 = vld [vmem:[%s7979_s3 + $0x3d0] sm:$0xf] }
 0x193   :  { %3055 = vmatpush.bf16.msra.mxu1 %v5175_v8  ;;  %3123 = vmatpush.bf16.msra.mxu2 %v5205_v51  ;;  %v5879_v8 = vld [vmem:[%s7979_s3 + $0x354] sm:$0xf0]  ;;  %v5235_v51 = vor.u32 %v5846_v44, %v5232_v37  ;;  %v5333_v44 = vor.u32 %v5871_v63, %v5332_v7  ;;  %v5860_v37 = vld [vmem:[%s7979_s3 + $0x2c4] sm:$0xf]  ;;  %v5898_v7 = vld [vmem:[%s7979_s3 + $0x3f4] sm:$0xf] }
 0x194   :  { %3136 = vmatpush.bf16.msra.mxu3 %v5209_v58  ;;  %3366 = vmatpush.bf16.msrb.mxu0 %v5307_v12  ;;  %v5224_v58 = vld [vmem:[%s7979_s3 + $0x248] sm:$0xf0]  ;;  %v5269_v12 = vor.u32 %v5854_v45, %v5266_v9  ;;  %v5367_v17 = vor.u32 %v5879_v8, %v5366_v11  ;;  %v5869_v45 = vld [vmem:[%s7979_s3 + $0x304] sm:$0xf0]  ;;  %v5868_v9 = vld [vmem:[%s7979_s3 + $0x304] sm:$0xf] }
 0x195   :  { %v5227_v62 = vor.u32 %v5844_v53, %v5224_v58  ;;  %v5326_v11 = vld [vmem:[%s7979_s3 + $0x308] sm:$0xf0]  ;;  %v5426_v8 = vld [vmem:[%s7979_s3 + $0x3c0] sm:$0xf]  ;;  %v5325_v58 = vor.u32 %v5869_v45, %v5324_v33  ;;  %v5452_v63 = vld [vmem:[%s7979_s3 + $0x3f8] sm:$0xf0] }
 0x196   :  { %v5428_v33 = vld [vmem:[%s7979_s3 + $0x3c8] sm:$0xf0] }
 0x197   :  { %3056 = vmatpush.bf16.msra.mxu1 %v5167_v2  ;;  %3124 = vmatpush.bf16.msra.mxu2 %v5197_v24  ;;  %v5877_v2 = vld [vmem:[%s7979_s3 + $0x344] sm:$0xf0]  ;;  %v3065_v24 = vld [vmem:[#allocation2 + $0x10] sm:$0x3] }
 0x198   :  { %3137 = vmatpush.bf16.msra.mxu3 %v5201_v55  ;;  %3367 = vmatpush.bf16.msrb.mxu0 %v5299_v46  ;;  %v5257_v55 = vor.u32 %v5853_v25, %v5256_v35  ;;  %v5866_v46 = vld [vmem:[%s7979_s3 + $0x2f4] sm:$0xf]  ;;  %v5359_v21 = vor.u32 %v5877_v2, %v5358_v0  ;;  %v5384_v25 = vld [vmem:[%s7979_s3 + $0x378] sm:$0xf0]  ;;  %v3470_v0 = vld [vmem:[#allocation2 + $0x1a] sm:$0x3] }
 0x199   :  { %v5319_v29 = vor.u32 %v5866_v46, %v5316_v1  ;;  %v5890_v2 = vld [vmem:[%s7979_s3 + $0x3b4] sm:$0xf]  ;;  %v5880_v46 = vld [vmem:[%s7979_s3 + $0x364] sm:$0xf]  ;;  %v7801_v1 = vpack.c.bf16 %v3470_v0, %v3470_v0 }
 0x19b   :  { %3057 = vmatpush.bf16.msra.mxu1 %v5159_v54  ;;  %3125 = vmatpush.bf16.msra.mxu2 %v5189_v28  ;;  %v5899_v54 = vld [vmem:[%s7979_s3 + $0x3f4] sm:$0xf0]  ;;  %v3066_v28 = vpack.c.bf16 %v3065_v24, %v3065_v24  ;;  %v5418_v24 = vld [vmem:[%s7979_s3 + $0x3b8] sm:$0xf0] }
 0x19c   :  { %3138 = vmatpush.bf16.msra.mxu3 %v5193_v16  ;;  %3368 = vmatpush.bf16.msrb.mxu0 %v5291_v32  ;;  %v5864_v16 = vld [vmem:[%s7979_s3 + $0x2e4] sm:$0xf]  ;;  %v5308_v32 = vld [vmem:[%s7979_s3 + $0x2e8] sm:$0xf0]  ;;  %v5451_v19 = vor.u32 %v5899_v54, %v5450_v23  ;;  %v5409_v54 = vor.u32 %v5889_v18, %v5408_v27 }
 0x19d   :  { %5117 = vmatmul.msk.bf16.vlgmr.msrb.gmra.mxu1 %vm2416_vm0, %v7394_v56  ;;  %5150 = vmatmul.msk.bf16.vlgmr.msrb.gmra.mxu2 %vm2416_vm0, %v2904_v47  ;;  %v5243_v56 = vor.u32 %v5848_v31, %v5240_v57  ;;  %v5341_v31 = vor.u32 %v5873_v34, %v5340_v6  ;;  %v5862_v57 = vld [vmem:[%s7979_s3 + $0x2d4] sm:$0xf]  ;;  %v5876_v34 = vld [vmem:[%s7979_s3 + $0x344] sm:$0xf] }
 0x19e   :  { %5151 = vmatmul.msk.bf16.vlgmr.msrb.gmra.mxu3 %vm2416_vm0, %v2904_v47  ;;  %5252 = vmatmul.msk.bf16.vlgmr.msra.gmra.mxu0 %vm2416_vm0, %v7602_v52  ;;  %v5342_v47 = vld [vmem:[%s7979_s3 + $0x328] sm:$0xf0] }
 0x19f   :  { %3216 = vmatpush.bf16.msrb.mxu1 %v5251_v10  ;;  %3284 = vmatpush.bf16.msrb.mxu2 %v5281_v48  ;;  %v5442_v10 = vld [vmem:[%s7979_s3 + $0x3e0] sm:$0xf]  ;;  %v5897_v48 = vld [vmem:[%s7979_s3 + $0x3e4] sm:$0xf0] }
 0x1a0   :  { %3297 = vmatpush.bf16.msrb.mxu3 %v5285_v59  ;;  %3527 = vmatpush.bf16.msra.mxu0 %v5383_v38  ;;  %v5300_v59 = vld [vmem:[%s7979_s3 + $0x2d8] sm:$0xf0]  ;;  %v5345_v38 = vor.u32 %v5872_v30, %v5342_v47  ;;  %v5443_v26 = vor.u32 %v5897_v48, %v5442_v10  ;;  %v5360_v47 = vld [vmem:[%s7979_s3 + $0x348] sm:$0xf0]  ;;  %v5392_v10 = vld [vmem:[%s7979_s3 + $0x380] sm:$0xf] }
 0x1a1   :  { %v5885_v48 = vld [vmem:[%s7979_s3 + $0x384] sm:$0xf0] }
 0x1a3   :  { %3217 = vmatpush.bf16.msrb.mxu1 %v5243_v56  ;;  %3285 = vmatpush.bf16.msrb.mxu2 %v5273_v40  ;;  %v5895_v56 = vld [vmem:[%s7979_s3 + $0x3d4] sm:$0xf0]  ;;  %v5303_v40 = vor.u32 %v5862_v57, %v5300_v59  ;;  %v5363_v57 = vor.u32 %v5876_v34, %v5360_v47  ;;  %v5393_v59 = vor.u32 %v5885_v48, %v5392_v10 }
 0x1a4   :  { %3298 = vmatpush.bf16.msrb.mxu3 %v5277_v3  ;;  %3528 = vmatpush.bf16.msra.mxu0 %v5375_v42  ;;  %v5292_v3 = vld [vmem:[%s7979_s3 + $0x2c8] sm:$0xf0]  ;;  %v5337_v42 = vor.u32 %v5870_v15, %v5334_v43  ;;  %v5435_v13 = vor.u32 %v5895_v56, %v5434_v39  ;;  %v3632_v15 = vld [vmem:[#allocation2 + $0x1e] sm:$0x3]  ;;  %v5455_v39 = vor.u32 %v5898_v7, %v5452_v63 }
 0x1a5   :  { %v5295_v53 = vor.u32 %v5860_v37, %v5292_v3  ;;  %v3633_v56 = vpack.c.bf16 %v3632_v15, %v3632_v15  ;;  %v5894_v3 = vld [vmem:[%s7979_s3 + $0x3d4] sm:$0xf] }
 0x1a6   :  { %v5906_v15 = vld [vmem:[%s7981_s5 + $0x30] sm:$0xff] }
 0x1a7   :  { %3218 = vmatpush.bf16.msrb.mxu1 %v5235_v51  ;;  %3286 = vmatpush.bf16.msrb.mxu2 %v5265_v22  ;;  %v5893_v51 = vld [vmem:[%s7979_s3 + $0x3c4] sm:$0xf0]  ;;  %v3227_v22 = vld [vmem:[#allocation2 + $0x14] sm:$0x3] }
 0x1a8   :  { %3299 = vmatpush.bf16.msrb.mxu3 %v5269_v12  ;;  %3529 = vmatpush.bf16.msra.mxu0 %v5367_v17  ;;  %v5882_v12 = vld [vmem:[%s7979_s3 + $0x374] sm:$0xf]  ;;  %v5329_v17 = vor.u32 %v5868_v9, %v5326_v11  ;;  %v5427_v35 = vor.u32 %v5893_v51, %v5426_v8  ;;  %v3228_v50 = vpack.c.bf16 %v3227_v22, %v3227_v22  ;;  %v3551_v9 = vld [vmem:[#allocation2 + $0x1c] sm:$0x3] }
 0x1a9   :  { %v3552_v11 = vpack.c.bf16 %v3551_v9, %v3551_v9 }
 0x1ab   :  { %3219 = vmatpush.bf16.msrb.mxu1 %v5227_v62  ;;  %3287 = vmatpush.bf16.msrb.mxu2 %v5257_v55  ;;  %v5387_v62 = vor.u32 %v5882_v12, %v5384_v25  ;;  %v5417_v55 = vor.u32 %v5891_v14, %v5416_v60 }
 0x1ac   :  { %3300 = vmatpush.bf16.msrb.mxu3 %v5261_v20  ;;  %3530 = vmatpush.bf16.msra.mxu0 %v5359_v21  ;;  %v5421_v20 = vor.u32 %v5890_v2, %v5418_v24  ;;  %v5376_v21 = vld [vmem:[%s7979_s3 + $0x368] sm:$0xf0] }
 0x1ad   :  { %5185 = vmatmul.msk.bf16.vlgmr.msra.gmra.mxu1 %vm2416_vm0, %v7498_v41  ;;  %5218 = vmatmul.msk.bf16.vlgmr.msra.gmra.mxu2 %vm2416_vm0, %v3066_v28  ;;  %v5311_v41 = vor.u32 %v5864_v16, %v5308_v32  ;;  %v5379_v23 = vor.u32 %v5880_v46, %v5376_v21  ;;  %v5887_v16 = vld [vmem:[%s7979_s3 + $0x394] sm:$0xf0]  ;;  %v5886_v32 = vld [vmem:[%s7979_s3 + $0x394] sm:$0xf] }
 0x1ae   :  { %5219 = vmatmul.msk.bf16.vlgmr.msra.gmra.mxu3 %vm2416_vm0, %v3066_v28  ;;  %5320 = vmatmul.msk.bf16.vlgmr.msrb.gmra.mxu0 %vm2416_vm0, %v7706_v61  ;;  %v5413_v28 = vor.u32 %v5888_v4, %v5410_v5 }
 0x1af   :  { %3378 = vmatpush.bf16.msra.mxu1 %v5319_v29  ;;  %3446 = vmatpush.bf16.msra.mxu2 %v5349_v49  ;;  %v5368_v29 = vld [vmem:[%s7979_s3 + $0x358] sm:$0xf0]  ;;  %v5400_v49 = vld [vmem:[%s7979_s3 + $0x390] sm:$0xf] }
 0x1b0   :  { %3459 = vmatpush.bf16.msra.mxu3 %v5353_v36  ;;  %3689 = vmatpush.bf16.msrb.mxu0 %v5451_v19  ;;  %v5402_v36 = vld [vmem:[%s7979_s3 + $0x398] sm:$0xf0]  ;;  %v5401_v6 = vor.u32 %v5887_v16, %v5400_v49 }
 0x1b1   :  { %v5405_v30 = vor.u32 %v5886_v32, %v5402_v36 }
 0x1b3   :  { %3379 = vmatpush.bf16.msra.mxu1 %v5311_v41  ;;  %3447 = vmatpush.bf16.msra.mxu2 %v5341_v31  ;;  %v5884_v41 = vld [vmem:[%s7979_s3 + $0x384] sm:$0xf]  ;;  %v5394_v31 = vld [vmem:[%s7979_s3 + $0x388] sm:$0xf0] }
 0x1b4   :  { %3460 = vmatpush.bf16.msra.mxu3 %v5345_v38  ;;  %3690 = vmatpush.bf16.msrb.mxu0 %v5443_v26  ;;  %v3389_v38 = vld [vmem:[#allocation2 + $0x18] sm:$0x3]  ;;  %v5397_v26 = vor.u32 %v5884_v41, %v5394_v31 }
 0x1b5   :  { %v3390_v43 = vpack.c.bf16 %v3389_v38, %v3389_v38  ;;  %v5907_v38 = vld [vmem:[%s7981_s5 + $0x38] sm:$0xff] }
 0x1b7   :  { %3380 = vmatpush.bf16.msra.mxu1 %v5303_v40  ;;  %3448 = vmatpush.bf16.msra.mxu2 %v5333_v44  ;;  %v5896_v40 = vld [vmem:[%s7979_s3 + $0x3e4] sm:$0xf]  ;;  %v5444_v44 = vld [vmem:[%s7979_s3 + $0x3e8] sm:$0xf0] }
 0x1b8   :  { %3461 = vmatpush.bf16.msra.mxu3 %v5337_v42  ;;  %3691 = vmatpush.bf16.msrb.mxu0 %v5435_v13  ;;  %v5447_v37 = vor.u32 %v5896_v40, %v5444_v44  ;;  %v5436_v42 = vld [vmem:[%s7979_s3 + $0x3d8] sm:$0xf0] }
 0x1b9   :  { %v5439_v13 = vor.u32 %v5894_v3, %v5436_v42  ;;  %v5914_v3 = vld [vmem:[%s7981_s5 + $0x70] sm:$0xff] }
 0x1bb   :  { %3381 = vmatpush.bf16.msra.mxu1 %v5295_v53  ;;  %3449 = vmatpush.bf16.msra.mxu2 %v5325_v58 }
 0x1bc   :  { %3462 = vmatpush.bf16.msra.mxu3 %v5329_v17  ;;  %3692 = vmatpush.bf16.msrb.mxu0 %v5427_v35 }
 0x1bd   :  { %5253 = vmatmul.msk.bf16.vlgmr.msrb.gmra.mxu1 %vm2416_vm0, %v7602_v52  ;;  %5286 = vmatmul.msk.bf16.vlgmr.msrb.gmra.mxu2 %vm2416_vm0, %v3228_v50  ;;  %v5878_v52 = vld [vmem:[%s7979_s3 + $0x354] sm:$0xf] }
 0x1be   :  { %5287 = vmatmul.msk.bf16.vlgmr.msrb.gmra.mxu3 %vm2416_vm0, %v3228_v50  ;;  %5388 = vmatmul.msk.bf16.vlgmr.msra.gmra.mxu0 %vm2416_vm0, %v7801_v1  ;;  %v5371_v19 = vor.u32 %v5878_v52, %v5368_v29 }
 0x1bf   :  { %3540 = vmatpush.bf16.msrb.mxu1 %v5387_v62  ;;  %3608 = vmatpush.bf16.msrb.mxu2 %v5417_v55 }
 0x1c0   :  { %3621 = vmatpush.bf16.msrb.mxu3 %v5421_v20 }
 0x1c3   :  { %3541 = vmatpush.bf16.msrb.mxu1 %v5379_v23  ;;  %3609 = vmatpush.bf16.msrb.mxu2 %v5409_v54 }
 0x1c4   :  { %3622 = vmatpush.bf16.msrb.mxu3 %v5413_v28 }
 0x1c7   :  { %3542 = vmatpush.bf16.msrb.mxu1 %v5371_v19  ;;  %3610 = vmatpush.bf16.msrb.mxu2 %v5401_v6 }
 0x1c8   :  { %3623 = vmatpush.bf16.msrb.mxu3 %v5405_v30 }
 0x1cb   :  { %3543 = vmatpush.bf16.msrb.mxu1 %v5363_v57  ;;  %3611 = vmatpush.bf16.msrb.mxu2 %v5393_v59 }
 0x1cc   :  { %3624 = vmatpush.bf16.msrb.mxu3 %v5397_v26 }
 0x1cd   :  { %5321 = vmatmul.msk.bf16.vlgmr.msra.gmra.mxu1 %vm2416_vm0, %v7706_v61  ;;  %5354 = vmatmul.msk.bf16.vlgmr.msra.gmra.mxu2 %vm2416_vm0, %v3390_v43  ;;  %v5892_v61 = vld [vmem:[%s7979_s3 + $0x3c4] sm:$0xf] }
 0x1ce   :  { %5355 = vmatmul.msk.bf16.vlgmr.msra.gmra.mxu3 %vm2416_vm0, %v3390_v43  ;;  %5456 = vmatmul.msk.bf16.vlgmr.msrb.gmra.mxu0 %vm2416_vm0, %v3633_v56  ;;  %v5431_v45 = vor.u32 %v5892_v61, %v5428_v33  ;;  %v5913_v61 = vld [vmem:[%s7981_s5 + $0x68] sm:$0xff]  ;;  %v5903_v33 = vld [vmem:[%s7981_s5 + $0x18] sm:$0xff] }
 0x1cf   :  { %3702 = vmatpush.bf16.msra.mxu1 %v5455_v39  ;;  %3857 = vmatpush.bf16.msra.mxu2 %v5907_v38  ;;  %v5915_v39 = vld [vmem:[%s7981_s5 + $0x78] sm:$0xff] }
 0x1d0   :  { %3870 = vmatpush.bf16.msra.mxu3 %v5915_v39 }
 0x1d3   :  { %3703 = vmatpush.bf16.msra.mxu1 %v5447_v37  ;;  %3858 = vmatpush.bf16.msra.mxu2 %v5906_v15  ;;  %v5904_v37 = vld [vmem:[%s7981_s5 + $0x20] sm:$0xff] }
 0x1d4   :  { %3871 = vmatpush.bf16.msra.mxu3 %v5914_v3 }
 0x1d7   :  { %3704 = vmatpush.bf16.msra.mxu1 %v5439_v13 }
 0x1d8   :  { %3872 = vmatpush.bf16.msra.mxu3 %v5913_v61 }
 0x1db   :  { %3705 = vmatpush.bf16.msra.mxu1 %v5431_v45 }
 0x1dd   :  { %5389 = vmatmul.msk.bf16.vlgmr.msrb.gmra.mxu1 %vm2416_vm0, %v7801_v1  ;;  %5422 = vmatmul.msk.bf16.vlgmr.msrb.gmra.mxu2 %vm2416_vm0, %v3552_v11 }
 0x1de   :  { %5423 = vmatmul.msk.bf16.vlgmr.msrb.gmra.mxu3 %vm2416_vm0, %v3552_v11 }
 0x1ea   :  { %v2493_v8 = vpop.f32.mrf.mxu1 }
 0x1eb   :  { %v2722_v51 = vpop.f32.mrf.mxu0 }
 0x1ed   :  { %5457 = vmatmul.msk.bf16.vlgmr.msra.gmra.mxu1 %vm2416_vm0, %v3633_v56  ;;  %v5905_v56 = vld [vmem:[%s7981_s5 + $0x28] sm:$0xff] }
 0x1ee   :  { %3859 = vmatpush.bf16.msra.mxu2 %v5905_v56 }
 0x1f0   :  { %v2506_v22 = vpop.f32.mrf.mxu2 }
 0x1f1   :  { %v2562_v53 = vpop.f32.mrf.mxu3 }
 0x1f2   :  { %v2563_v58 = vadd.f32 %v2562_v53, %v2493_v8  ;;  %v2495_v12 = vpop.f32.mrf.mxu1  ;;  %3860 = vmatpush.bf16.msra.mxu2 %v5904_v37  ;;  %v3884_v37 = vlaneseq }
 0x1f3   :  { %v2724_v17 = vpop.f32.mrf.mxu0  ;;  %v5901_v12 = vld [vmem:[%s7981_s5 + $0x8] sm:$0xff] }
 0x1f4   :  { %v5911_v17 = vld [vmem:[%s7981_s5 + $0x58] sm:$0xff] }
 0x1f6   :  { %3861 = vmatpush.bf16.msra.mxu2 %v5903_v33 }
 0x1f8   :  { %v2508_v35 = vpop.f32.mrf.mxu2 }
 0x1f9   :  { %v2564_v25 = vpop.f32.mrf.mxu3 }
 0x1fa   :  { %v2575_v60 = vpop.f32.mrf.mxu1 }
 0x1fb   :  { %v2576_v14 = vadd.f32 %v2575_v60, %v2506_v22  ;;  %v2884_v0 = vpop.f32.mrf.mxu0  ;;  %v5912_v22 = vld [vmem:[%s7981_s5 + $0x60] sm:$0xff] }
 0x1fc   :  { %3873 = vmatpush.bf16.msra.mxu3 %v5912_v22  ;;  %v5900_v60 = vld [vmem:[%s7981_s5] sm:$0xff] }
 0x200   :  { %v2641_v2 = vpop.f32.mrf.mxu2  ;;  %3874 = vmatpush.bf16.msra.mxu3 %v5911_v17 }
 0x201   :  { %v2658_v24 = vadd.f32 %v2641_v2, %v2563_v58  ;;  %v2654_v50 = vpop.f32.mrf.mxu3 }
 0x202   :  { %v2659_v62 = vadd.f32 %v2654_v50, %v2576_v14  ;;  %v2577_v55 = vpop.f32.mrf.mxu1  ;;  %v5910_v14 = vld [vmem:[%s7981_s5 + $0x50] sm:$0xff]  ;;  %v5909_v50 = vld [vmem:[%s7981_s5 + $0x48] sm:$0xff] }
 0x203   :  { %v2886_v46 = vpop.f32.mrf.mxu0  ;;  %v2739_v1 = vadd.f32 %v2722_v51, %v2658_v24  ;;  %v5902_v51 = vld [vmem:[%s7981_s5 + $0x10] sm:$0xff] }
 0x204   :  { %3862 = vmatpush.bf16.msra.mxu2 %v5902_v51  ;;  %3875 = vmatpush.bf16.msra.mxu3 %v5910_v14 }
 0x208   :  { %v2643_v20 = vpop.f32.mrf.mxu2  ;;  %3863 = vmatpush.bf16.msra.mxu2 %v5901_v12  ;;  %3876 = vmatpush.bf16.msra.mxu3 %v5909_v50 }
 0x209   :  { %v2656_v21 = vpop.f32.mrf.mxu3 }
 0x20a   :  { %v2735_v27 = vpop.f32.mrf.mxu1 }
 0x20b   :  { %v2740_v18 = vadd.f32 %v2735_v27, %v2659_v62  ;;  %v3046_v4 = vpop.f32.mrf.mxu0 }
 0x20c   :  { %3864 = vmatpush.bf16.msra.mxu2 %v5900_v60 }
 0x210   :  { %v2803_v5 = vpop.f32.mrf.mxu2 }
 0x211   :  { %v2820_v23 = vadd.f32 %v2803_v5, %v2739_v1  ;;  %v2816_v54 = vpop.f32.mrf.mxu3  ;;  %v5908_v1 = vld [vmem:[%s7981_s5 + $0x40] sm:$0xff] }
 0x212   :  { %v7894_v52 = vadd.f32 %v2816_v54, %v2740_v18  ;;  %v2737_v28 = vpop.f32.mrf.mxu1  ;;  %3877 = vmatpush.bf16.msra.mxu3 %v5908_v1 }
 0x213   :  { %v3048_v29 = vpop.f32.mrf.mxu0  ;;  %v2901_v49 = vadd.f32 %v2884_v0, %v2820_v23 }
 0x218   :  { %v2805_v16 = vpop.f32.mrf.mxu2 }
 0x219   :  { %v2818_v32 = vpop.f32.mrf.mxu3 }
 0x21a   :  { %v7896_v36 = vpop.f32.mrf.mxu1 }
 0x21b   :  { %v3208_v19 = vpop.f32.mrf.mxu0  ;;  %v2902_v21 = vadd.f32 %v7896_v36, %v7894_v52 }
 0x220   :  { %v2965_v6 = vpop.f32.mrf.mxu2 }
 0x221   :  { %v2982_v34 = vadd.f32 %v2965_v6, %v2901_v49  ;;  %v7898_v30 = vpop.f32.mrf.mxu3  ;;  %v3713_v49 = vld [vmem:[%s7982_s4] sm:$0x3] }
 0x222   :  { %v2899_v47 = vpop.f32.mrf.mxu1  ;;  %v2983_v18 = vadd.f32 %v7898_v30, %v2902_v21  ;;  %v3715_v36 = vperm.slane %v3713_v49, 0 }
 0x223   :  { %v3210_v10 = vpop.f32.mrf.mxu0  ;;  %v3063_v48 = vadd.f32 %v3046_v4, %v2982_v34 }
 0x228   :  { %v2967_v41 = vpop.f32.mrf.mxu2 }
 0x229   :  { %v2980_v31 = vpop.f32.mrf.mxu3 }
 0x22a   :  { %v7900_v57 = vpop.f32.mrf.mxu1 }
 0x22b   :  { %v3370_v59 = vpop.f32.mrf.mxu0  ;;  %v3064_v54 = vadd.f32 %v7900_v57, %v2983_v18 }
 0x230   :  { %v3127_v26 = vpop.f32.mrf.mxu2 }
 0x231   :  { %v3140_v7 = vpop.f32.mrf.mxu3  ;;  %v3144_v0 = vadd.f32 %v3127_v26, %v3063_v48 }
 0x232   :  { %v3061_v63 = vpop.f32.mrf.mxu1  ;;  %v3145_v29 = vadd.f32 %v3140_v7, %v3064_v54 }
 0x233   :  { %v3372_v43 = vpop.f32.mrf.mxu0  ;;  %v3225_v55 = vadd.f32 %v3208_v19, %v3144_v0  ;;  %v3716_v63 = vperm.slane %v3713_v49, 1 }
 0x238   :  { %v3129_v40 = vpop.f32.mrf.mxu2 }
 0x239   :  { %v3142_v44 = vpop.f32.mrf.mxu3 }
 0x23a   :  { %v3221_v42 = vpop.f32.mrf.mxu1 }
 0x23b   :  { %v3532_v13 = vpop.f32.mrf.mxu0  ;;  %v3226_v16 = vadd.f32 %v3221_v42, %v3145_v29  ;;  %v3885_v42 = vand.u32 127, %v3884_v37 }
 0x23d   :  { %vm3886_vm1 = vcmp.ge.s32.totalorder %v3885_v42, 1  ;;  %vm3887_vm2 = vcmp.lt.s32.totalorder %v3885_v42, 7 }
 0x23e   :  { %vm7960_vm3 = vmand %vm3886_vm1, %vm3887_vm2 }
 0x240   :  { %v3289_v45 = vpop.f32.mrf.mxu2 }
 0x241   :  { %v3302_v9 = vpop.f32.mrf.mxu3  ;;  %v3306_v20 = vadd.f32 %v3289_v45, %v3225_v55 }
 0x242   :  { %v3223_v11 = vpop.f32.mrf.mxu1  ;;  %v3307_v6 = vadd.f32 %v3302_v9, %v3226_v16 }
 0x243   :  { %v3534_v8 = vpop.f32.mrf.mxu0  ;;  %v3387_v4 = vadd.f32 %v3370_v59, %v3306_v20 }
 0x248   :  { %v3291_v53 = vpop.f32.mrf.mxu2 }
 0x249   :  { %v3304_v58 = vpop.f32.mrf.mxu3 }
 0x24a   :  { %v3383_v35 = vpop.f32.mrf.mxu1 }
 0x24b   :  { %v3694_v25 = vpop.f32.mrf.mxu0  ;;  %v3388_v30 = vadd.f32 %v3383_v35, %v3307_v6 }
 0x250   :  { %v3451_v2 = vpop.f32.mrf.mxu2 }
 0x251   :  { %v3464_v24 = vpop.f32.mrf.mxu3  ;;  %v3468_v28 = vadd.f32 %v3451_v2, %v3387_v4 }
 0x252   :  { %v3385_v62 = vpop.f32.mrf.mxu1  ;;  %v3469_v48 = vadd.f32 %v3464_v24, %v3388_v30 }
 0x253   :  { %v3696_v46 = vpop.f32.mrf.mxu0  ;;  %v3549_v32 = vadd.f32 %v3532_v13, %v3468_v28  ;;  %v5917_v13 = vld [vmem:[%s7980_s6] ss:$0 sm:$0xff] }
 0x258   :  { %v3453_v27 = vpop.f32.mrf.mxu2 }
 0x259   :  { %v3466_v5 = vpop.f32.mrf.mxu3 }
 0x25a   :  { %v3545_v23 = vpop.f32.mrf.mxu1 }
 0x25b   :  { %v3550_v31 = vadd.f32 %v3545_v23, %v3469_v48 }
 0x260   :  { %v3613_v19 = vpop.f32.mrf.mxu2 }
 0x261   :  { %v3630_v52 = vadd.f32 %v3613_v19, %v3549_v32  ;;  %v3626_v34 = vpop.f32.mrf.mxu3 }
 0x262   :  { %v3547_v47 = vpop.f32.mrf.mxu1  ;;  %v3631_v26 = vadd.f32 %v3626_v34, %v3550_v31 }
 0x263   :  { %v3711_v10 = vadd.f32 %v3694_v25, %v3630_v52 }
 0x265   :  { %v3719_v41 = vadd.f32 %v3715_v36, %v3711_v10 }
 0x267   :  { %v3721_v57 = vmax.f32 %v3719_v41, 0.0 }
 0x268   :  { %v3615_v59 = vpop.f32.mrf.mxu2 }
 0x269   :  { %v3723_v38 = vpack.c.bf16 %v3721_v57, %v3721_v57  ;;  %v3628_v7 = vpop.f32.mrf.mxu3 }
 0x26a   :  { %v3707_v15 = vpop.f32.mrf.mxu1 }
 0x26b   :  { %v3712_v43 = vadd.f32 %v3707_v15, %v3631_v26  ;;  %3865 = vmatmul.bf16.vlgmr.msra.gmra.mxu2 %v3723_v38 }
 0x26d   :  { %v3720_v39 = vadd.f32 %v3716_v63, %v3712_v43 }
 0x26f   :  { %v3722_v56 = vmax.f32 %v3720_v39, 0.0 }
 0x271   :  { %v3724_v40 = vpack.c.bf16 %v3722_v56, %v3722_v56 }
 0x272   :  { %v3709_v44 = vpop.f32.mrf.mxu1 }
 0x273   :  { %3878 = vmatmul.bf16.vlgmr.msra.gmra.mxu3 %v3724_v40 }
 0x2ee   :  { %v3866_v3 = vpop.f32.mrf.mxu2 }
 0x2ef   :  { %v3867_v61 = vadd.f32 %v5917_v13, %v3866_v3 }
 0x2f6   :  { %v3868_v33 = vpop.f32.mrf.mxu2  ;;  %v3879_v45 = vpop.f32.mrf.mxu3 }
 0x2f7   :  { %v3880_v11 = vadd.f32 %v3879_v45, %v3867_v61 }
 0x2f9   :  { %3883 = vst [vmem:[%s7983_s7] sm:$0x3] %v3880_v11  ;;  %v3889_v8 = vsel %vm7960_vm3, %v3880_v11, -1e+30 }
 0x2fa   :  { %v3891_v51 = vsel %vm3890_vm4, %v3889_v8, -inf }
 0x2fb   :  { %3892 = vmax.xlane.f32.xlu0 %v3891_v51 }
 0x2fe   :  { %v3881_v22 = vpop.f32.mrf.mxu3 }
 0x36e   :  { %v3893_v53 = vpop.xlane.xlu0 %3892 }
 0x36f   :  { %v3894_v58 = vsub.f32 %v3880_v11, %v3893_v53 }
 0x371   :  { %v3895_v12 = vsel %vm7960_vm3, %v3894_v58, -1e+30 }
 0x372   :  { %v3896_v17 = vmul.f32 1.442695, %v3895_v12 }
 0x374   :  { %5918 = vpow2.f32 %v3896_v17 }
 0x37a   :  { %v5919_v35 = vpop.eup %5918 }
 0x37b   :  { %v3898_v25 = vsel %vm3890_vm4, %v5919_v35, 0.0 }
 0x37c   :  { %3899 = vadd.xlane.f32.xlu0 %v3898_v25 }
 0x3ef   :  { %v3900_v60 = vpop.xlane.xlu0 %3899 }
 0x3f0   :  { %5920 = vlog2.f32 %v3900_v60 }
 0x3f6   :  { %v5921_v14 = vpop.eup %5920 }
 0x3f7   :  { %v3902_v0 = vmul.f32 0.6931472, %v5921_v14 }
 0x3f9   :  { %v3903_v2 = vsub.f32 %v3894_v58, %v3902_v0 }
 0x3fb   :  { %v3904_v24 = vsel %vm7960_vm3, %v3903_v2, 0.0 }
 0x3fc   :  { %3905 = vst [vmem:[%s7984_s8] sm:$0x3] %v3904_v24 }

</bundles_post_ra>
